<compile_context>
chip_gen: v7x
topology: tpu7x:2x2x1
jax: 0.10.0
libtpu: 0.0.40
codegen_flags: <defaults>
</compile_context>

<pallas_src>
import math

import jax
import jax.numpy as jnp
from jax.experimental import pallas as pl
from jax.experimental.pallas import tpu as pltpu

FC1, FC2, FC3 = 128, 128, 50
_LN_EPS = 1e-5
_LANES = 128


def _ceil_to(n, m):
    return ((n + m - 1) // m) * m


# ----------------------------------------------------------------------------
# Parameters (PyTorch-equivalent init) and packing into two resident slabs
# ----------------------------------------------------------------------------
def init_raw_params(key, state_size, action_size):
    """Per-layer params; weights stored as (in, out) so the kernel does x @ W + b."""
    dims = [
        ("fc1", state_size, FC1, True),
        ("fc2", FC1, FC2, True),
        ("fc3", FC2, FC3, True),
        ("c1", FC3, FC3, True),
        ("c2", FC3, FC3, True),
        ("cf", FC3, 1, False),
        ("a1", FC3, FC3, True),
        ("a2", FC3, FC3, True),
        ("af", FC3, action_size, True),
    ]
    raw = {}
    for name, din, dout, has_ln in dims:
        key, kw, kb = jax.random.split(key, 3)
        bound = 1.0 / math.sqrt(din)
        p = {
            "w": jax.random.uniform(kw, (din, dout), jnp.float32, -bound, bound),
            "b": jax.random.uniform(kb, (dout,), jnp.float32, -bound, bound),
        }
        if has_ln:
            p["g"] = jnp.ones((dout,), jnp.float32)
            p["beta"] = jnp.zeros((dout,), jnp.float32)
        raw[name] = p
    return raw


def pack_params(raw, state_size, action_size):
    """Pack all parameters into one lane-dense weight slab + one vector slab.

    Every weight segment is a full (rows, 128) tile (zeros outside the real
    (din, dout) block), so every layer in the kernel is a (TB,128)@(128,128)
    matmul with no lane slicing.  Head layout: critic chain in lanes [0,50),
    actor chain in lanes [50,100).  Final fused layer is [mu | value]: mu in
    lanes [0,A), value at lane A.
    """
    S, A = state_size, action_size
    assert A + 1 <= _LANES, "action_size + 1 must fit in 128 lanes"
    assert 2 * FC3 <= _LANES
    SP = _ceil_to(S, _LANES)

    def seg(rows, placements):
        m = jnp.zeros((rows, _LANES), jnp.float32)
        for r, c, w in placements:
            m = m.at[r:r + w.shape[0], c:c + w.shape[1]].set(w)
        return m

    segs = [
        seg(SP, [(0, 0, raw["fc1"]["w"])]),                               # S   -> 128
        seg(128, [(0, 0, raw["fc2"]["w"])]),                              # 128 -> 128
        seg(128, [(0, 0, raw["fc3"]["w"])]),                              # 128 -> 50
        seg(128, [(0, 0, raw["c1"]["w"]), (0, 50, raw["a1"]["w"])]),      # 50 -> 50|50
        seg(128, [(0, 0, raw["c2"]["w"]), (50, 50, raw["a2"]["w"])]),     # block-diag
        seg(128, [(50, 0, raw["af"]["w"]), (0, A, raw["cf"]["w"])]),      # [mu | value]
    ]
    offs, r = [], 0
    for s_ in segs:
        offs.append((r, s_.shape[0]))
        r += s_.shape[0]
    w_slab = jnp.concatenate(segs, axis=0)                                # (SP+640, 128)

    def vrow(*placements):
        v = jnp.zeros((_LANES,), jnp.float32)
        for off, vec in placements:
            v = v.at[off:off + vec.shape[0]].set(vec)
        return v

    rows = [
        vrow((0, raw["fc1"]["b"])), vrow((0, raw["fc1"]["g"])), vrow((0, raw["fc1"]["beta"])),  # 0-2
        vrow((0, raw["fc2"]["b"])), vrow((0, raw["fc2"]["g"])), vrow((0, raw["fc2"]["beta"])),  # 3-5
        vrow((0, raw["fc3"]["b"])), vrow((0, raw["fc3"]["g"])), vrow((0, raw["fc3"]["beta"])),  # 6-8
        vrow((0, raw["c1"]["b"]), (50, raw["a1"]["b"])),                                        # 9
        vrow((0, raw["c1"]["g"]), (50, raw["a1"]["g"])),                                        # 10
        vrow((0, raw["c1"]["beta"]), (50, raw["a1"]["beta"])),                                  # 11
        vrow((0, raw["c2"]["b"]), (50, raw["a2"]["b"])),                                        # 12
        vrow((0, raw["c2"]["g"]), (50, raw["a2"]["g"])),                                        # 13
        vrow((0, raw["c2"]["beta"]), (50, raw["a2"]["beta"])),                                  # 14
        vrow((0, raw["af"]["b"]), (A, raw["cf"]["b"])),                                         # 15 [b_mu | b_value]
        vrow((0, raw["af"]["g"])), vrow((0, raw["af"]["beta"])),                                # 16, 17
    ]
    nrows = _ceil_to(len(rows), 8)
    vec_slab = jnp.zeros((nrows, _LANES), jnp.float32).at[: len(rows)].set(jnp.stack(rows))
    return w_slab, vec_slab, tuple(offs)


# ----------------------------------------------------------------------------
# Kernel
# ----------------------------------------------------------------------------
def make_kernel(action_size, offs):
    A = action_size
    D3 = FC3

    def kernel(x_ref, w_ref, vec_ref, out_ref):
        vecs = vec_ref[...]                                               # (24,128) resident

        lane = jax.lax.broadcasted_iota(jnp.int32, (1, _LANES), 1)
        cmask = (lane < D3).astype(jnp.float32)                           # critic half [0,50)
        amask = ((lane >= D3) & (lane < 2 * D3)).astype(jnp.float32)      # actor half [50,100)
        mu_keep = lane < A                                                # actor output lanes
        mumask = mu_keep.astype(jnp.float32)

        def row(r):
            return vecs[r:r + 1, :]                                       # (1,128), broadcasts over TB

        def lin(h, seg_i, bias_row):
            r0, rows = offs[seg_i]
            w = w_ref[r0:r0 + rows, :]                                    # full 128-lane segment
            return jnp.dot(h, w, preferred_element_type=jnp.float32) + row(bias_row)

        def elu(z):
            return jnp.where(z > 0.0, z, jnp.exp(z) - 1.0)                # ELU, alpha=1

        def ln_elu(y, g_row, b_row, d):
            # LayerNorm over the first `d` lanes.  Lanes >= d of y are exactly 0
            # (zero-padded weight columns / bias) and gamma/beta are zero-padded,
            # so padded lanes come out as exactly 0 after LN+ELU.
            inv = 1.0 / d
            mean = jnp.sum(y, axis=-1, keepdims=True) * inv
            var = jnp.sum(y * y, axis=-1, keepdims=True) * inv - mean * mean
            z = (y - mean) * jax.lax.rsqrt(var + _LN_EPS) * row(g_row) + row(b_row)
            return elu(z)

        def ln_elu_halves(y, g_row, b_row):
            # Independent LayerNorm of critic half [0,50) and actor half [50,100),
            # done in place with lane masks (no slices / concatenates).
            inv = 1.0 / D3
            yy = y * y
            s1c = jnp.sum(y * cmask, axis=-1, keepdims=True)
            s2c = jnp.sum(yy * cmask, axis=-1, keepdims=True)
            s1a = jnp.sum(y * amask, axis=-1, keepdims=True)
            s2a = jnp.sum(yy * amask, axis=-1, keepdims=True)
            mc, ma = s1c * inv, s1a * inv
            rc = jax.lax.rsqrt(s2c * inv - mc * mc + _LN_EPS)
            ra = jax.lax.rsqrt(s2a * inv - ma * ma + _LN_EPS)
            mean = cmask * mc + amask * ma                                # per-lane select
            rstd = cmask * rc + amask * ra                                # lanes >= 100 -> 0
            z = (y - mean) * rstd * row(g_row) + row(b_row)
            return elu(z)                                                 # lanes >= 100 stay 0

        h = x_ref[...]                                                    # (TB, SP) f32
        # trunk
        h = ln_elu(lin(h, 0, 0), 1, 2, FC1)                               # fc1
        h = ln_elu(lin(h, 1, 3), 4, 5, FC2)                               # fc2
        h = ln_elu(lin(h, 2, 6), 7, 8, FC3)                               # fc3 (50 live lanes)
        # fused critic || actor head chain
        h = ln_elu_halves(lin(h, 3, 9), 10, 11)
        h = ln_elu_halves(lin(h, 4, 12), 13, 14)
        y = lin(h, 5, 15)                                                 # mu_raw in [0,A), value at lane A
        # actor final LayerNorm(A)+ELU on lanes [0,A) only; keep value (lane A) untouched.
        inv_a = 1.0 / A
        mean = jnp.sum(y * mumask, axis=-1, keepdims=True) * inv_a
        var = jnp.sum(y * y * mumask, axis=-1, keepdims=True) * inv_a - mean * mean
        z = (y - mean) * jax.lax.rsqrt(var + _LN_EPS) * row(16) + row(17)
        out_ref[...] = jnp.where(mu_keep, elu(z), y).astype(out_ref.dtype)

    return kernel


# ----------------------------------------------------------------------------
# Wrapper
# ----------------------------------------------------------------------------
def _pick_tb(batch, tb):
    """Batch tile: as large as requested, but guarantee >= 2 grid steps when the
    batch allows it, so the ("parallel",) axis can shard across both v7x TCs."""
    tb = max(8, (int(tb) // 8) * 8)
    if batch <= 8:
        return 8
    half = _ceil_to((batch + 1) // 2, 8)
    return max(8, min(tb, half))


def actor_critic_forward(x, w_slab, vec_slab, offs, action_size, tb=2048):
    """Returns (mu, values). `tb` = max batch tile; sweep {1024,2048,4096} for large B."""
    B, S = x.shape
    A = action_size
    SP = _ceil_to(S, _LANES)
    TB = _pick_tb(B, tb)
    Bp = _ceil_to(B, TB)

    # Lane/row padding done once in the wrapper (zero rows are wasted-but-harmless).
    xp = jnp.pad(x.astype(jnp.float32), ((0, Bp - B), (0, SP - S)))

    out = pl.pallas_call(
        make_kernel(A, offs),
        grid=(pl.cdiv(Bp, TB),),
        in_specs=[
            pl.BlockSpec((TB, SP), lambda i: (i, 0)),            # batch-tiled input
            pl.BlockSpec(w_slab.shape, lambda i: (0, 0)),        # resident weight slab
            pl.BlockSpec(vec_slab.shape, lambda i: (0, 0)),      # resident vector slab
        ],
        # Lane-dense output: a full 128-lane vreg per row ([mu | value | zeros]);
        # avoids narrow masked vst.msk stores and strided HBM writeback.
        out_specs=pl.BlockSpec((TB, _LANES), lambda i: (i, 0)),
        out_shape=jax.ShapeDtypeStruct((Bp, _LANES), jnp.float32),
        compiler_params=pltpu.CompilerParams(
            dimension_semantics=("parallel",),                   # megacore on v7x
            # Above v5e's 16 MiB scoped default, below v7x's 64 MiB physical.
            # At TB=4096: 2x2 MiB double-buffered in/out blocks + ~0.8 MiB slabs
            # + a few (TB,128) f32 temporaries stays well inside this budget.
            vmem_limit_bytes=48 * 1024 * 1024,
        ),
    )(xp, w_slab, vec_slab)

    mu = out[:B, :A]
    values = out[:B, A:A + 1]
    return mu, values


# ----------------------------------------------------------------------------
# Pure-JAX reference (unfused, per-layer) for correctness checking
# ----------------------------------------------------------------------------
def actor_critic_reference(x, raw):
    hi = jax.lax.Precision.HIGHEST

    def lin(h, p):
        return jnp.dot(h, p["w"], precision=hi) + p["b"]

    def ln(h, p):
        m = jnp.mean(h, -1, keepdims=True)
        v = jnp.mean(jnp.square(h - m), -1, keepdims=True)
        return (h - m) * jax.lax.rsqrt(v + _LN_EPS) * p["g"] + p["beta"]

    def elu(h):
        return jnp.where(h > 0.0, h, jnp.expm1(h))

    def block(h, p):
        return elu(ln(lin(h, p), p))

    h = block(x, raw["fc1"]); h = block(h, raw["fc2"]); h = block(h, raw["fc3"])
    c = block(h, raw["c1"]); c = block(c, raw["c2"]); values = lin(c, raw["cf"])
    a = block(h, raw["a1"]); a = block(a, raw["a2"]); mu = block(a, raw["af"])
    return mu, values


if __name__ == "__main__":
    key = jax.random.PRNGKey(0)
    state_size, action_size, batch = 32, 8, 200   # batch=200 -> 2 grid steps + row padding

    kx, kp = jax.random.split(key)
    x = jax.random.normal(kx, (batch, state_size), jnp.float32)
    raw = init_raw_params(kp, state_size, action_size)
    w_slab, vec_slab, offs = pack_params(raw, state_size, action_size)

    mu, values = actor_critic_forward(x, w_slab, vec_slab, offs, action_size)
    jax.block_until_ready((mu, values))

    mu_ref, val_ref = actor_critic_reference(x, raw)
    assert mu.shape == (batch, action_size) and values.shape == (batch, 1)
    assert mu.dtype == jnp.float32 and values.dtype == jnp.float32
    mu_err = float(jnp.max(jnp.abs(mu - mu_ref)))
    val_err = float(jnp.max(jnp.abs(values - val_ref)))
    assert jnp.allclose(mu, mu_ref, atol=1e-4, rtol=1e-4), f"mu max abs err {mu_err}"
    assert jnp.allclose(values, val_ref, atol=1e-4, rtol=1e-4), f"value max abs err {val_err}"
    # TODO(synk): self.log_std is a module parameter unused in forward(); not ported.
    print("KERNEL_OK")
</pallas_src>

<mosaic_0001>
module attributes {stable_mosaic.version = 11 : i64} {
  func.func @kernel(%arg0: i32, %arg1: memref<104x128xf32, #tpu.memory_space<vmem>>, %arg2: memref<768x128xf32, #tpu.memory_space<vmem>>, %arg3: memref<24x128xf32, #tpu.memory_space<vmem>>, %arg4: memref<104x128xf32, #tpu.memory_space<vmem>>) attributes {dimension_semantics = [#tpu.dimension_semantics<parallel>], iteration_bounds = array<i64: 2>, scalar_prefetch = 0 : i64, scratch_operands = 0 : i64, tpu.core_type = #tpu.core_type<tc>, window_params = [{transform_indices = @transform_0, window_bounds = array<i64: 104, 128>}, {pipeline_mode = #tpu.pipeline_mode<synchronous>, transform_indices = @transform_1, window_bounds = array<i64: 768, 128>}, {pipeline_mode = #tpu.pipeline_mode<synchronous>, transform_indices = @transform_2, window_bounds = array<i64: 24, 128>}, {transform_indices = @transform_3, window_bounds = array<i64: 104, 128>}]} {
    %c0 = arith.constant 0 : index
    %c0_0 = arith.constant 0 : index
    %0 = vector.load %arg3[%c0, %c0_0] : memref<24x128xf32, #tpu.memory_space<vmem>>, vector<24x128xf32>
    %1 = tpu.iota {dimensions = array<i32: 1>} : vector<1x128xi32>
    %c50_i32 = arith.constant 50 : i32
    %2 = vector.broadcast %c50_i32 : i32 to vector<1x128xi32>
    %3 = arith.cmpi slt, %1, %2 : vector<1x128xi32>
    %4 = arith.extui %3 : vector<1x128xi1> to vector<1x128xi32>
    %5 = arith.sitofp %4 : vector<1x128xi32> to vector<1x128xf32>
    %c50_i32_1 = arith.constant 50 : i32
    %6 = vector.broadcast %c50_i32_1 : i32 to vector<1x128xi32>
    %7 = arith.cmpi sge, %1, %6 : vector<1x128xi32>
    %c100_i32 = arith.constant 100 : i32
    %8 = vector.broadcast %c100_i32 : i32 to vector<1x128xi32>
    %9 = arith.cmpi slt, %1, %8 : vector<1x128xi32>
    %10 = arith.andi %7, %9 : vector<1x128xi1>
    %11 = arith.extui %10 : vector<1x128xi1> to vector<1x128xi32>
    %12 = arith.sitofp %11 : vector<1x128xi32> to vector<1x128xf32>
    %c8_i32 = arith.constant 8 : i32
    %13 = vector.broadcast %c8_i32 : i32 to vector<1x128xi32>
    %14 = arith.cmpi slt, %1, %13 : vector<1x128xi32>
    %15 = arith.extui %14 : vector<1x128xi1> to vector<1x128xi32>
    %16 = arith.sitofp %15 : vector<1x128xi32> to vector<1x128xf32>
    %c0_2 = arith.constant 0 : index
    %c0_3 = arith.constant 0 : index
    %17 = vector.load %arg1[%c0_2, %c0_3] : memref<104x128xf32, #tpu.memory_space<vmem>>, vector<104x128xf32>
    %c0_4 = arith.constant 0 : index
    %c0_5 = arith.constant 0 : index
    %18 = vector.load %arg2[%c0_4, %c0_5] : memref<768x128xf32, #tpu.memory_space<vmem>>, vector<128x128xf32>
    %cst = arith.constant dense<0.000000e+00> : vector<104x128xf32>
    %19 = tpu.matmul %17, %18, %cst {dimension_numbers = #tpu.dot_dimension_numbers<[1], [0], [0], [1], [0, 0, 1, 1], [], []>} : vector<104x128xf32>, vector<128x128xf32>, vector<104x128xf32> -> vector<104x128xf32>
    %20 = vector.extract_strided_slice %0 {offsets = [0, 0], sizes = [1, 128], strides = [1, 1]} : vector<24x128xf32> to vector<1x128xf32>
    %21 = vector.broadcast %20 : vector<1x128xf32> to vector<104x128xf32>
    %22 = arith.addf %19, %21 : vector<104x128xf32>
    %cst_6 = arith.constant dense<0.000000e+00> : vector<104xf32>
    %23 = vector.multi_reduction <add>, %22, %cst_6 [1] : vector<104x128xf32> to vector<104xf32>
    %24 = vector.shape_cast %23 : vector<104xf32> to vector<104x1xf32>
    %cst_7 = arith.constant 7.812500e-03 : f32
    %25 = vector.broadcast %cst_7 : f32 to vector<104x1xf32>
    %26 = arith.mulf %24, %25 : vector<104x1xf32>
    %27 = arith.mulf %22, %22 : vector<104x128xf32>
    %cst_8 = arith.constant dense<0.000000e+00> : vector<104xf32>
    %28 = vector.multi_reduction <add>, %27, %cst_8 [1] : vector<104x128xf32> to vector<104xf32>
    %29 = vector.shape_cast %28 : vector<104xf32> to vector<104x1xf32>
    %cst_9 = arith.constant 7.812500e-03 : f32
    %30 = vector.broadcast %cst_9 : f32 to vector<104x1xf32>
    %31 = arith.mulf %29, %30 : vector<104x1xf32>
    %32 = arith.mulf %26, %26 : vector<104x1xf32>
    %33 = arith.subf %31, %32 : vector<104x1xf32>
    %34 = vector.broadcast %26 : vector<104x1xf32> to vector<104x128xf32>
    %35 = arith.subf %22, %34 : vector<104x128xf32>
    %cst_10 = arith.constant 9.99999974E-6 : f32
    %36 = vector.broadcast %cst_10 : f32 to vector<104x1xf32>
    %37 = arith.addf %33, %36 : vector<104x1xf32>
    %38 = math.rsqrt %37 : vector<104x1xf32>
    %39 = vector.broadcast %38 : vector<104x1xf32> to vector<104x128xf32>
    %40 = arith.mulf %35, %39 : vector<104x128xf32>
    %41 = vector.extract_strided_slice %0 {offsets = [1, 0], sizes = [1, 128], strides = [1, 1]} : vector<24x128xf32> to vector<1x128xf32>
    %42 = vector.broadcast %41 : vector<1x128xf32> to vector<104x128xf32>
    %43 = arith.mulf %40, %42 : vector<104x128xf32>
    %44 = vector.extract_strided_slice %0 {offsets = [2, 0], sizes = [1, 128], strides = [1, 1]} : vector<24x128xf32> to vector<1x128xf32>
    %45 = vector.broadcast %44 : vector<1x128xf32> to vector<104x128xf32>
    %46 = arith.addf %43, %45 : vector<104x128xf32>
    %cst_11 = arith.constant 0.000000e+00 : f32
    %47 = vector.broadcast %cst_11 : f32 to vector<104x128xf32>
    %48 = arith.cmpf ogt, %46, %47 : vector<104x128xf32>
    %49 = math.exp %46 : vector<104x128xf32>
    %cst_12 = arith.constant 1.000000e+00 : f32
    %50 = vector.broadcast %cst_12 : f32 to vector<104x128xf32>
    %51 = arith.subf %49, %50 : vector<104x128xf32>
    %52 = arith.select %48, %46, %51 : vector<104x128xi1>, vector<104x128xf32>
    %c128 = arith.constant 128 : index
    %c0_13 = arith.constant 0 : index
    %53 = vector.load %arg2[%c128, %c0_13] : memref<768x128xf32, #tpu.memory_space<vmem>>, vector<128x128xf32>
    %cst_14 = arith.constant dense<0.000000e+00> : vector<104x128xf32>
    %54 = tpu.matmul %52, %53, %cst_14 {dimension_numbers = #tpu.dot_dimension_numbers<[1], [0], [0], [1], [0, 0, 1, 1], [], []>} : vector<104x128xf32>, vector<128x128xf32>, vector<104x128xf32> -> vector<104x128xf32>
    %55 = vector.extract_strided_slice %0 {offsets = [3, 0], sizes = [1, 128], strides = [1, 1]} : vector<24x128xf32> to vector<1x128xf32>
    %56 = vector.broadcast %55 : vector<1x128xf32> to vector<104x128xf32>
    %57 = arith.addf %54, %56 : vector<104x128xf32>
    %cst_15 = arith.constant dense<0.000000e+00> : vector<104xf32>
    %58 = vector.multi_reduction <add>, %57, %cst_15 [1] : vector<104x128xf32> to vector<104xf32>
    %59 = vector.shape_cast %58 : vector<104xf32> to vector<104x1xf32>
    %cst_16 = arith.constant 7.812500e-03 : f32
    %60 = vector.broadcast %cst_16 : f32 to vector<104x1xf32>
    %61 = arith.mulf %59, %60 : vector<104x1xf32>
    %62 = arith.mulf %57, %57 : vector<104x128xf32>
    %cst_17 = arith.constant dense<0.000000e+00> : vector<104xf32>
    %63 = vector.multi_reduction <add>, %62, %cst_17 [1] : vector<104x128xf32> to vector<104xf32>
    %64 = vector.shape_cast %63 : vector<104xf32> to vector<104x1xf32>
    %cst_18 = arith.constant 7.812500e-03 : f32
    %65 = vector.broadcast %cst_18 : f32 to vector<104x1xf32>
    %66 = arith.mulf %64, %65 : vector<104x1xf32>
    %67 = arith.mulf %61, %61 : vector<104x1xf32>
    %68 = arith.subf %66, %67 : vector<104x1xf32>
    %69 = vector.broadcast %61 : vector<104x1xf32> to vector<104x128xf32>
    %70 = arith.subf %57, %69 : vector<104x128xf32>
    %cst_19 = arith.constant 9.99999974E-6 : f32
    %71 = vector.broadcast %cst_19 : f32 to vector<104x1xf32>
    %72 = arith.addf %68, %71 : vector<104x1xf32>
    %73 = math.rsqrt %72 : vector<104x1xf32>
    %74 = vector.broadcast %73 : vector<104x1xf32> to vector<104x128xf32>
    %75 = arith.mulf %70, %74 : vector<104x128xf32>
    %76 = vector.extract_strided_slice %0 {offsets = [4, 0], sizes = [1, 128], strides = [1, 1]} : vector<24x128xf32> to vector<1x128xf32>
    %77 = vector.broadcast %76 : vector<1x128xf32> to vector<104x128xf32>
    %78 = arith.mulf %75, %77 : vector<104x128xf32>
    %79 = vector.extract_strided_slice %0 {offsets = [5, 0], sizes = [1, 128], strides = [1, 1]} : vector<24x128xf32> to vector<1x128xf32>
    %80 = vector.broadcast %79 : vector<1x128xf32> to vector<104x128xf32>
    %81 = arith.addf %78, %80 : vector<104x128xf32>
    %cst_20 = arith.constant 0.000000e+00 : f32
    %82 = vector.broadcast %cst_20 : f32 to vector<104x128xf32>
    %83 = arith.cmpf ogt, %81, %82 : vector<104x128xf32>
    %84 = math.exp %81 : vector<104x128xf32>
    %cst_21 = arith.constant 1.000000e+00 : f32
    %85 = vector.broadcast %cst_21 : f32 to vector<104x128xf32>
    %86 = arith.subf %84, %85 : vector<104x128xf32>
    %87 = arith.select %83, %81, %86 : vector<104x128xi1>, vector<104x128xf32>
    %c256 = arith.constant 256 : index
    %c0_22 = arith.constant 0 : index
    %88 = vector.load %arg2[%c256, %c0_22] : memref<768x128xf32, #tpu.memory_space<vmem>>, vector<128x128xf32>
    %cst_23 = arith.constant dense<0.000000e+00> : vector<104x128xf32>
    %89 = tpu.matmul %87, %88, %cst_23 {dimension_numbers = #tpu.dot_dimension_numbers<[1], [0], [0], [1], [0, 0, 1, 1], [], []>} : vector<104x128xf32>, vector<128x128xf32>, vector<104x128xf32> -> vector<104x128xf32>
    %90 = vector.extract_strided_slice %0 {offsets = [6, 0], sizes = [1, 128], strides = [1, 1]} : vector<24x128xf32> to vector<1x128xf32>
    %91 = vector.broadcast %90 : vector<1x128xf32> to vector<104x128xf32>
    %92 = arith.addf %89, %91 : vector<104x128xf32>
    %cst_24 = arith.constant dense<0.000000e+00> : vector<104xf32>
    %93 = vector.multi_reduction <add>, %92, %cst_24 [1] : vector<104x128xf32> to vector<104xf32>
    %94 = vector.shape_cast %93 : vector<104xf32> to vector<104x1xf32>
    %cst_25 = arith.constant 2.000000e-02 : f32
    %95 = vector.broadcast %cst_25 : f32 to vector<104x1xf32>
    %96 = arith.mulf %94, %95 : vector<104x1xf32>
    %97 = arith.mulf %92, %92 : vector<104x128xf32>
    %cst_26 = arith.constant dense<0.000000e+00> : vector<104xf32>
    %98 = vector.multi_reduction <add>, %97, %cst_26 [1] : vector<104x128xf32> to vector<104xf32>
    %99 = vector.shape_cast %98 : vector<104xf32> to vector<104x1xf32>
    %cst_27 = arith.constant 2.000000e-02 : f32
    %100 = vector.broadcast %cst_27 : f32 to vector<104x1xf32>
    %101 = arith.mulf %99, %100 : vector<104x1xf32>
    %102 = arith.mulf %96, %96 : vector<104x1xf32>
    %103 = arith.subf %101, %102 : vector<104x1xf32>
    %104 = vector.broadcast %96 : vector<104x1xf32> to vector<104x128xf32>
    %105 = arith.subf %92, %104 : vector<104x128xf32>
    %cst_28 = arith.constant 9.99999974E-6 : f32
    %106 = vector.broadcast %cst_28 : f32 to vector<104x1xf32>
    %107 = arith.addf %103, %106 : vector<104x1xf32>
    %108 = math.rsqrt %107 : vector<104x1xf32>
    %109 = vector.broadcast %108 : vector<104x1xf32> to vector<104x128xf32>
    %110 = arith.mulf %105, %109 : vector<104x128xf32>
    %111 = vector.extract_strided_slice %0 {offsets = [7, 0], sizes = [1, 128], strides = [1, 1]} : vector<24x128xf32> to vector<1x128xf32>
    %112 = vector.broadcast %111 : vector<1x128xf32> to vector<104x128xf32>
    %113 = arith.mulf %110, %112 : vector<104x128xf32>
    %114 = vector.extract_strided_slice %0 {offsets = [8, 0], sizes = [1, 128], strides = [1, 1]} : vector<24x128xf32> to vector<1x128xf32>
    %115 = vector.broadcast %114 : vector<1x128xf32> to vector<104x128xf32>
    %116 = arith.addf %113, %115 : vector<104x128xf32>
    %cst_29 = arith.constant 0.000000e+00 : f32
    %117 = vector.broadcast %cst_29 : f32 to vector<104x128xf32>
    %118 = arith.cmpf ogt, %116, %117 : vector<104x128xf32>
    %119 = math.exp %116 : vector<104x128xf32>
    %cst_30 = arith.constant 1.000000e+00 : f32
    %120 = vector.broadcast %cst_30 : f32 to vector<104x128xf32>
    %121 = arith.subf %119, %120 : vector<104x128xf32>
    %122 = arith.select %118, %116, %121 : vector<104x128xi1>, vector<104x128xf32>
    %c384 = arith.constant 384 : index
    %c0_31 = arith.constant 0 : index
    %123 = vector.load %arg2[%c384, %c0_31] : memref<768x128xf32, #tpu.memory_space<vmem>>, vector<128x128xf32>
    %cst_32 = arith.constant dense<0.000000e+00> : vector<104x128xf32>
    %124 = tpu.matmul %122, %123, %cst_32 {dimension_numbers = #tpu.dot_dimension_numbers<[1], [0], [0], [1], [0, 0, 1, 1], [], []>} : vector<104x128xf32>, vector<128x128xf32>, vector<104x128xf32> -> vector<104x128xf32>
    %125 = vector.extract_strided_slice %0 {offsets = [9, 0], sizes = [1, 128], strides = [1, 1]} : vector<24x128xf32> to vector<1x128xf32>
    %126 = vector.broadcast %125 : vector<1x128xf32> to vector<104x128xf32>
    %127 = arith.addf %124, %126 : vector<104x128xf32>
    %128 = arith.mulf %127, %127 : vector<104x128xf32>
    %129 = vector.broadcast %5 : vector<1x128xf32> to vector<104x128xf32>
    %130 = arith.mulf %127, %129 : vector<104x128xf32>
    %cst_33 = arith.constant dense<0.000000e+00> : vector<104xf32>
    %131 = vector.multi_reduction <add>, %130, %cst_33 [1] : vector<104x128xf32> to vector<104xf32>
    %132 = vector.shape_cast %131 : vector<104xf32> to vector<104x1xf32>
    %133 = vector.broadcast %5 : vector<1x128xf32> to vector<104x128xf32>
    %134 = arith.mulf %128, %133 : vector<104x128xf32>
    %cst_34 = arith.constant dense<0.000000e+00> : vector<104xf32>
    %135 = vector.multi_reduction <add>, %134, %cst_34 [1] : vector<104x128xf32> to vector<104xf32>
    %136 = vector.shape_cast %135 : vector<104xf32> to vector<104x1xf32>
    %137 = vector.broadcast %12 : vector<1x128xf32> to vector<104x128xf32>
    %138 = arith.mulf %127, %137 : vector<104x128xf32>
    %cst_35 = arith.constant dense<0.000000e+00> : vector<104xf32>
    %139 = vector.multi_reduction <add>, %138, %cst_35 [1] : vector<104x128xf32> to vector<104xf32>
    %140 = vector.shape_cast %139 : vector<104xf32> to vector<104x1xf32>
    %141 = vector.broadcast %12 : vector<1x128xf32> to vector<104x128xf32>
    %142 = arith.mulf %128, %141 : vector<104x128xf32>
    %cst_36 = arith.constant dense<0.000000e+00> : vector<104xf32>
    %143 = vector.multi_reduction <add>, %142, %cst_36 [1] : vector<104x128xf32> to vector<104xf32>
    %144 = vector.shape_cast %143 : vector<104xf32> to vector<104x1xf32>
    %cst_37 = arith.constant 2.000000e-02 : f32
    %145 = vector.broadcast %cst_37 : f32 to vector<104x1xf32>
    %146 = arith.mulf %132, %145 : vector<104x1xf32>
    %cst_38 = arith.constant 2.000000e-02 : f32
    %147 = vector.broadcast %cst_38 : f32 to vector<104x1xf32>
    %148 = arith.mulf %140, %147 : vector<104x1xf32>
    %cst_39 = arith.constant 2.000000e-02 : f32
    %149 = vector.broadcast %cst_39 : f32 to vector<104x1xf32>
    %150 = arith.mulf %136, %149 : vector<104x1xf32>
    %151 = arith.mulf %146, %146 : vector<104x1xf32>
    %152 = arith.subf %150, %151 : vector<104x1xf32>
    %cst_40 = arith.constant 9.99999974E-6 : f32
    %153 = vector.broadcast %cst_40 : f32 to vector<104x1xf32>
    %154 = arith.addf %152, %153 : vector<104x1xf32>
    %155 = math.rsqrt %154 : vector<104x1xf32>
    %cst_41 = arith.constant 2.000000e-02 : f32
    %156 = vector.broadcast %cst_41 : f32 to vector<104x1xf32>
    %157 = arith.mulf %144, %156 : vector<104x1xf32>
    %158 = arith.mulf %148, %148 : vector<104x1xf32>
    %159 = arith.subf %157, %158 : vector<104x1xf32>
    %cst_42 = arith.constant 9.99999974E-6 : f32
    %160 = vector.broadcast %cst_42 : f32 to vector<104x1xf32>
    %161 = arith.addf %159, %160 : vector<104x1xf32>
    %162 = math.rsqrt %161 : vector<104x1xf32>
    %163 = vector.broadcast %5 : vector<1x128xf32> to vector<104x128xf32>
    %164 = vector.broadcast %146 : vector<104x1xf32> to vector<104x128xf32>
    %165 = arith.mulf %163, %164 : vector<104x128xf32>
    %166 = vector.broadcast %12 : vector<1x128xf32> to vector<104x128xf32>
    %167 = vector.broadcast %148 : vector<104x1xf32> to vector<104x128xf32>
    %168 = arith.mulf %166, %167 : vector<104x128xf32>
    %169 = arith.addf %165, %168 : vector<104x128xf32>
    %170 = vector.broadcast %5 : vector<1x128xf32> to vector<104x128xf32>
    %171 = vector.broadcast %155 : vector<104x1xf32> to vector<104x128xf32>
    %172 = arith.mulf %170, %171 : vector<104x128xf32>
    %173 = vector.broadcast %12 : vector<1x128xf32> to vector<104x128xf32>
    %174 = vector.broadcast %162 : vector<104x1xf32> to vector<104x128xf32>
    %175 = arith.mulf %173, %174 : vector<104x128xf32>
    %176 = arith.addf %172, %175 : vector<104x128xf32>
    %177 = arith.subf %127, %169 : vector<104x128xf32>
    %178 = arith.mulf %177, %176 : vector<104x128xf32>
    %179 = vector.extract_strided_slice %0 {offsets = [10, 0], sizes = [1, 128], strides = [1, 1]} : vector<24x128xf32> to vector<1x128xf32>
    %180 = vector.broadcast %179 : vector<1x128xf32> to vector<104x128xf32>
    %181 = arith.mulf %178, %180 : vector<104x128xf32>
    %182 = vector.extract_strided_slice %0 {offsets = [11, 0], sizes = [1, 128], strides = [1, 1]} : vector<24x128xf32> to vector<1x128xf32>
    %183 = vector.broadcast %182 : vector<1x128xf32> to vector<104x128xf32>
    %184 = arith.addf %181, %183 : vector<104x128xf32>
    %cst_43 = arith.constant 0.000000e+00 : f32
    %185 = vector.broadcast %cst_43 : f32 to vector<104x128xf32>
    %186 = arith.cmpf ogt, %184, %185 : vector<104x128xf32>
    %187 = math.exp %184 : vector<104x128xf32>
    %cst_44 = arith.constant 1.000000e+00 : f32
    %188 = vector.broadcast %cst_44 : f32 to vector<104x128xf32>
    %189 = arith.subf %187, %188 : vector<104x128xf32>
    %190 = arith.select %186, %184, %189 : vector<104x128xi1>, vector<104x128xf32>
    %c512 = arith.constant 512 : index
    %c0_45 = arith.constant 0 : index
    %191 = vector.load %arg2[%c512, %c0_45] : memref<768x128xf32, #tpu.memory_space<vmem>>, vector<128x128xf32>
    %cst_46 = arith.constant dense<0.000000e+00> : vector<104x128xf32>
    %192 = tpu.matmul %190, %191, %cst_46 {dimension_numbers = #tpu.dot_dimension_numbers<[1], [0], [0], [1], [0, 0, 1, 1], [], []>} : vector<104x128xf32>, vector<128x128xf32>, vector<104x128xf32> -> vector<104x128xf32>
    %193 = vector.extract_strided_slice %0 {offsets = [12, 0], sizes = [1, 128], strides = [1, 1]} : vector<24x128xf32> to vector<1x128xf32>
    %194 = vector.broadcast %193 : vector<1x128xf32> to vector<104x128xf32>
    %195 = arith.addf %192, %194 : vector<104x128xf32>
    %196 = arith.mulf %195, %195 : vector<104x128xf32>
    %197 = vector.broadcast %5 : vector<1x128xf32> to vector<104x128xf32>
    %198 = arith.mulf %195, %197 : vector<104x128xf32>
    %cst_47 = arith.constant dense<0.000000e+00> : vector<104xf32>
    %199 = vector.multi_reduction <add>, %198, %cst_47 [1] : vector<104x128xf32> to vector<104xf32>
    %200 = vector.shape_cast %199 : vector<104xf32> to vector<104x1xf32>
    %201 = vector.broadcast %5 : vector<1x128xf32> to vector<104x128xf32>
    %202 = arith.mulf %196, %201 : vector<104x128xf32>
    %cst_48 = arith.constant dense<0.000000e+00> : vector<104xf32>
    %203 = vector.multi_reduction <add>, %202, %cst_48 [1] : vector<104x128xf32> to vector<104xf32>
    %204 = vector.shape_cast %203 : vector<104xf32> to vector<104x1xf32>
    %205 = vector.broadcast %12 : vector<1x128xf32> to vector<104x128xf32>
    %206 = arith.mulf %195, %205 : vector<104x128xf32>
    %cst_49 = arith.constant dense<0.000000e+00> : vector<104xf32>
    %207 = vector.multi_reduction <add>, %206, %cst_49 [1] : vector<104x128xf32> to vector<104xf32>
    %208 = vector.shape_cast %207 : vector<104xf32> to vector<104x1xf32>
    %209 = vector.broadcast %12 : vector<1x128xf32> to vector<104x128xf32>
    %210 = arith.mulf %196, %209 : vector<104x128xf32>
    %cst_50 = arith.constant dense<0.000000e+00> : vector<104xf32>
    %211 = vector.multi_reduction <add>, %210, %cst_50 [1] : vector<104x128xf32> to vector<104xf32>
    %212 = vector.shape_cast %211 : vector<104xf32> to vector<104x1xf32>
    %cst_51 = arith.constant 2.000000e-02 : f32
    %213 = vector.broadcast %cst_51 : f32 to vector<104x1xf32>
    %214 = arith.mulf %200, %213 : vector<104x1xf32>
    %cst_52 = arith.constant 2.000000e-02 : f32
    %215 = vector.broadcast %cst_52 : f32 to vector<104x1xf32>
    %216 = arith.mulf %208, %215 : vector<104x1xf32>
    %cst_53 = arith.constant 2.000000e-02 : f32
    %217 = vector.broadcast %cst_53 : f32 to vector<104x1xf32>
    %218 = arith.mulf %204, %217 : vector<104x1xf32>
    %219 = arith.mulf %214, %214 : vector<104x1xf32>
    %220 = arith.subf %218, %219 : vector<104x1xf32>
    %cst_54 = arith.constant 9.99999974E-6 : f32
    %221 = vector.broadcast %cst_54 : f32 to vector<104x1xf32>
    %222 = arith.addf %220, %221 : vector<104x1xf32>
    %223 = math.rsqrt %222 : vector<104x1xf32>
    %cst_55 = arith.constant 2.000000e-02 : f32
    %224 = vector.broadcast %cst_55 : f32 to vector<104x1xf32>
    %225 = arith.mulf %212, %224 : vector<104x1xf32>
    %226 = arith.mulf %216, %216 : vector<104x1xf32>
    %227 = arith.subf %225, %226 : vector<104x1xf32>
    %cst_56 = arith.constant 9.99999974E-6 : f32
    %228 = vector.broadcast %cst_56 : f32 to vector<104x1xf32>
    %229 = arith.addf %227, %228 : vector<104x1xf32>
    %230 = math.rsqrt %229 : vector<104x1xf32>
    %231 = vector.broadcast %5 : vector<1x128xf32> to vector<104x128xf32>
    %232 = vector.broadcast %214 : vector<104x1xf32> to vector<104x128xf32>
    %233 = arith.mulf %231, %232 : vector<104x128xf32>
    %234 = vector.broadcast %12 : vector<1x128xf32> to vector<104x128xf32>
    %235 = vector.broadcast %216 : vector<104x1xf32> to vector<104x128xf32>
    %236 = arith.mulf %234, %235 : vector<104x128xf32>
    %237 = arith.addf %233, %236 : vector<104x128xf32>
    %238 = vector.broadcast %5 : vector<1x128xf32> to vector<104x128xf32>
    %239 = vector.broadcast %223 : vector<104x1xf32> to vector<104x128xf32>
    %240 = arith.mulf %238, %239 : vector<104x128xf32>
    %241 = vector.broadcast %12 : vector<1x128xf32> to vector<104x128xf32>
    %242 = vector.broadcast %230 : vector<104x1xf32> to vector<104x128xf32>
    %243 = arith.mulf %241, %242 : vector<104x128xf32>
    %244 = arith.addf %240, %243 : vector<104x128xf32>
    %245 = arith.subf %195, %237 : vector<104x128xf32>
    %246 = arith.mulf %245, %244 : vector<104x128xf32>
    %247 = vector.extract_strided_slice %0 {offsets = [13, 0], sizes = [1, 128], strides = [1, 1]} : vector<24x128xf32> to vector<1x128xf32>
    %248 = vector.broadcast %247 : vector<1x128xf32> to vector<104x128xf32>
    %249 = arith.mulf %246, %248 : vector<104x128xf32>
    %250 = vector.extract_strided_slice %0 {offsets = [14, 0], sizes = [1, 128], strides = [1, 1]} : vector<24x128xf32> to vector<1x128xf32>
    %251 = vector.broadcast %250 : vector<1x128xf32> to vector<104x128xf32>
    %252 = arith.addf %249, %251 : vector<104x128xf32>
    %cst_57 = arith.constant 0.000000e+00 : f32
    %253 = vector.broadcast %cst_57 : f32 to vector<104x128xf32>
    %254 = arith.cmpf ogt, %252, %253 : vector<104x128xf32>
    %255 = math.exp %252 : vector<104x128xf32>
    %cst_58 = arith.constant 1.000000e+00 : f32
    %256 = vector.broadcast %cst_58 : f32 to vector<104x128xf32>
    %257 = arith.subf %255, %256 : vector<104x128xf32>
    %258 = arith.select %254, %252, %257 : vector<104x128xi1>, vector<104x128xf32>
    %c640 = arith.constant 640 : index
    %c0_59 = arith.constant 0 : index
    %259 = vector.load %arg2[%c640, %c0_59] : memref<768x128xf32, #tpu.memory_space<vmem>>, vector<128x128xf32>
    %cst_60 = arith.constant dense<0.000000e+00> : vector<104x128xf32>
    %260 = tpu.matmul %258, %259, %cst_60 {dimension_numbers = #tpu.dot_dimension_numbers<[1], [0], [0], [1], [0, 0, 1, 1], [], []>} : vector<104x128xf32>, vector<128x128xf32>, vector<104x128xf32> -> vector<104x128xf32>
    %261 = vector.extract_strided_slice %0 {offsets = [15, 0], sizes = [1, 128], strides = [1, 1]} : vector<24x128xf32> to vector<1x128xf32>
    %262 = vector.broadcast %261 : vector<1x128xf32> to vector<104x128xf32>
    %263 = arith.addf %260, %262 : vector<104x128xf32>
    %264 = vector.broadcast %16 : vector<1x128xf32> to vector<104x128xf32>
    %265 = arith.mulf %263, %264 : vector<104x128xf32>
    %cst_61 = arith.constant dense<0.000000e+00> : vector<104xf32>
    %266 = vector.multi_reduction <add>, %265, %cst_61 [1] : vector<104x128xf32> to vector<104xf32>
    %267 = vector.shape_cast %266 : vector<104xf32> to vector<104x1xf32>
    %cst_62 = arith.constant 1.250000e-01 : f32
    %268 = vector.broadcast %cst_62 : f32 to vector<104x1xf32>
    %269 = arith.mulf %267, %268 : vector<104x1xf32>
    %270 = arith.mulf %263, %263 : vector<104x128xf32>
    %271 = vector.broadcast %16 : vector<1x128xf32> to vector<104x128xf32>
    %272 = arith.mulf %270, %271 : vector<104x128xf32>
    %cst_63 = arith.constant dense<0.000000e+00> : vector<104xf32>
    %273 = vector.multi_reduction <add>, %272, %cst_63 [1] : vector<104x128xf32> to vector<104xf32>
    %274 = vector.shape_cast %273 : vector<104xf32> to vector<104x1xf32>
    %cst_64 = arith.constant 1.250000e-01 : f32
    %275 = vector.broadcast %cst_64 : f32 to vector<104x1xf32>
    %276 = arith.mulf %274, %275 : vector<104x1xf32>
    %277 = arith.mulf %269, %269 : vector<104x1xf32>
    %278 = arith.subf %276, %277 : vector<104x1xf32>
    %279 = vector.broadcast %269 : vector<104x1xf32> to vector<104x128xf32>
    %280 = arith.subf %263, %279 : vector<104x128xf32>
    %cst_65 = arith.constant 9.99999974E-6 : f32
    %281 = vector.broadcast %cst_65 : f32 to vector<104x1xf32>
    %282 = arith.addf %278, %281 : vector<104x1xf32>
    %283 = math.rsqrt %282 : vector<104x1xf32>
    %284 = vector.broadcast %283 : vector<104x1xf32> to vector<104x128xf32>
    %285 = arith.mulf %280, %284 : vector<104x128xf32>
    %286 = vector.extract_strided_slice %0 {offsets = [16, 0], sizes = [1, 128], strides = [1, 1]} : vector<24x128xf32> to vector<1x128xf32>
    %287 = vector.broadcast %286 : vector<1x128xf32> to vector<104x128xf32>
    %288 = arith.mulf %285, %287 : vector<104x128xf32>
    %289 = vector.extract_strided_slice %0 {offsets = [17, 0], sizes = [1, 128], strides = [1, 1]} : vector<24x128xf32> to vector<1x128xf32>
    %290 = vector.broadcast %289 : vector<1x128xf32> to vector<104x128xf32>
    %291 = arith.addf %288, %290 : vector<104x128xf32>
    %cst_66 = arith.constant 0.000000e+00 : f32
    %292 = vector.broadcast %cst_66 : f32 to vector<104x128xf32>
    %293 = arith.cmpf ogt, %291, %292 : vector<104x128xf32>
    %294 = math.exp %291 : vector<104x128xf32>
    %cst_67 = arith.constant 1.000000e+00 : f32
    %295 = vector.broadcast %cst_67 : f32 to vector<104x128xf32>
    %296 = arith.subf %294, %295 : vector<104x128xf32>
    %297 = arith.select %293, %291, %296 : vector<104x128xi1>, vector<104x128xf32>
    %298 = vector.shape_cast %14 : vector<1x128xi1> to vector<1x128xi1>
    %299 = vector.broadcast %298 : vector<1x128xi1> to vector<104x128xi1>
    %300 = arith.select %299, %297, %263 : vector<104x128xi1>, vector<104x128xf32>
    %c0_68 = arith.constant 0 : index
    %c0_69 = arith.constant 0 : index
    %301 = vector.load %arg4[%c0_68, %c0_69] : memref<104x128xf32, #tpu.memory_space<vmem>>, vector<104x128xf32>
    tpu.vector_store %arg4[%c0_68, %c0_69], %300 {strides = array<i32>} : memref<104x128xf32, #tpu.memory_space<vmem>>, vector<104x128xf32>,
    return
  }
  func.func @transform_0(%arg0: i32) -> (i32, i32) {
    %c0_i32 = arith.constant 0 : i32
    %c0_i32_0 = arith.constant 0 : i32
    return %arg0, %c0_i32 : i32, i32
  }
  func.func @transform_1(%arg0: i32) -> (i32, i32) {
    %c0_i32 = arith.constant 0 : i32
    %c0_i32_0 = arith.constant 0 : i32
    %c0_i32_1 = arith.constant 0 : i32
    return %c0_i32, %c0_i32_0 : i32, i32
  }
  func.func @transform_2(%arg0: i32) -> (i32, i32) {
    %c0_i32 = arith.constant 0 : i32
    %c0_i32_0 = arith.constant 0 : i32
    %c0_i32_1 = arith.constant 0 : i32
    return %c0_i32, %c0_i32_0 : i32, i32
  }
  func.func @transform_3(%arg0: i32) -> (i32, i32) {
    %c0_i32 = arith.constant 0 : i32
    %c0_i32_0 = arith.constant 0 : i32
    return %arg0, %c0_i32 : i32, i32
  }
}

</mosaic_0001>

<bundles_post_ra>
// kernel: tpu_custom_call.1
= control target key start
LH: loop header
LB: loop body
LE: loop exit
PB: predicated region body
PF: predicated region fallthrough
CT: control target
= control target key end

     0   :  { %8 = vsyncpa [#allocation3], 0  ;;  %s6903_s0 = inlined_call_operand.hbm [shape: f32[208,128], index: 0, kind: input, shape index: {}]   ;;  %s6904_s1 = inlined_call_operand.hbm [shape: f32[768,128], index: 1, kind: input, shape index: {}]   ;;  %s6905_s2 = inlined_call_operand.hbm [shape: f32[24,128], index: 2, kind: input, shape index: {}]   ;;  %s6906_s3 = inlined_call_operand.hbm [shape: f32[208,128], index: 3, kind: output, shape index: {}]  }
   0x1   :  { %10 = vsyncpa [#allocation3 + $0x1], 0 }
   0x2   :  { %11 = vsyncpa [#allocation6], 0 }
   0x3   :  { %12 = vsyncpa [#allocation4], 0 }
   0x4   :  { %14 = vsyncpa [#allocation4 + $0x1], 0  ;;  %s4907_s12 = smov 0   ;;  %s4909_s13 = smov 0  }
   0x5   :  { %s4911_s14 = smov 0   ;;  %s4913_s15 = smov 0  }
   0x6 LB: > { %s4928_s16 = sadd.s32 4294967295, %s4874_s15   ;;  %s3436_s17 = sadd.s32 4294967294, %s4874_s15   ;;  %s4874_s15 = sphi %s4913_s15, %s6926_s15   ;;  %s4870_s14 = sphi %s4911_s14, %s6925_s14   ;;  %s4866_s13 = sphi %s4909_s13, %s6924_s13   ;;  %s4862_s12 = sphi %s4907_s12, %s6923_s12  }
   0x7   : > { %p40_p0 = scmp.ne.s32.totalorder %s4866_s13, %s4862_s12  ;;  %p6907_p1 = scmp.eq.s32.totalorder %s4928_s16, 0 }
   0x8   : > { %p112_p3 = scmp.eq.s32.totalorder %s3436_s17, 1  ;;  %p3437_p5 = scmp.ge.s32.totalorder %s4874_s15, 1 }
   0x9   : > { %p4937_p4 = por %p6907_p1, %p40_p0  ;;  %p119_p7 = scmp.lt.s32.totalorder %s4874_s15, 3 }
   0xa   : > { %p4942_p6 = por %p112_p3, %p40_p0  ;;  %s4876_s21 = smov [#allocation5]  }
   0xb   : > { %s6910_s18 = scalar_select %p4937_p4, 1, 0 }
   0xc   : > { %s6911_s19 = scalar_select %p4942_p6, 1, 0 }
   0xd   : > { %p4947_p8 = pnand %p3437_p5, %p119_p7  ;;  %s131_s22 = sshll.u32 %s4876_s21, 4  ;;  %s4951_s22 = int_to_ptr.vmem [resolvable:$true] %s131_s22 }
   0xe   : > { %s4877_s24 = smov [#allocation7]   ;;  %s4718_s28 = scalar_lea.hbm %s6904_s1, 12288 }
   0xf   : > { %p4289_p9 = pneg %p4947_p8  ;;  %s144_s25 = sshll.u32 %s4877_s24, 4  ;;  %s4962_s25 = int_to_ptr.vmem [resolvable:$true] %s144_s25 }
  0x10   : > { %p4719_p12 = scmp.ne.s32.totalorder %s6904_s1, %s4718_s28  ;;  %p4725_p5 = scmp.lt.u32.totalorder %s4718_s28, %s6904_s1 }
  0x11   : > { %p4958_p11 = pnand %p4289_p9, %p6907_p1 }
  0x13   : > { %p4720_p13 = pneg %p4958_p11 }
  0x15   : > { %p4721_p0 = pnand %p4720_p13, %p4719_p12 }
  0x17   : > { %p4722_p3 = pneg %p4721_p0 }
  0x19   : > { %p4727_p7 = pnand %p4725_p5, %p4722_p3 }
  0x1b   : > { %4730 = shalt.err (!%p4727_p7)
}
  0x1c   : > { %s4731_s6 = scalar_lea.vmem %s4951_s22, 12288  ;;  %p4739_p2 = scmp.lt.s32.totalorder %s4951_s22, %s4951_s22 }
  0x1d   : > { %p4732_p9 = scmp.ne.s32.totalorder %s4951_s22, %s4731_s6  ;;  %p4740_p12 = scmp.lt.s32.totalorder %s4731_s6, %s4731_s6 }
  0x1f   : > { %p4734_p10 = pnand %p4732_p9, %p4720_p13  ;;  %p4741_p0 = por %p4740_p12, %p4739_p2 }
  0x21   : > { %p4735_p1 = pneg %p4734_p10 }
  0x23   : > { %p4742_p6 = pnand %p4741_p0, %p4735_p1 }
  0x25   : > { %4745 = shalt.err (!%p4742_p6)
}
  0x26   : > { %s4878_s7 = smov 128   ;;  %s4879_s8 = smov 8  }
  0x27   : > { %4292 = dma.hbm_to_vmem [thread:$0]  (!%p4958_p11), %s6904_s1, 12288, %s4951_s22, [#allocation6], %s4878_s7, %s4878_s7, %s4879_s8  }
  0x28   : > { %s4746_s21 = scalar_lea.hbm %s6905_s2, 384 }
  0x29   : > { %p4747_p1 = scmp.ne.s32.totalorder %s6905_s2, %s4746_s21  ;;  %p4753_p10 = scmp.lt.u32.totalorder %s4746_s21, %s6905_s2 }
  0x2b   : > { %p4749_p2 = pnand %p4747_p1, %p4720_p13 }
  0x2d   : > { %p4750_p6 = pneg %p4749_p2 }
  0x2f   : > { %p4755_p3 = pnand %p4753_p10, %p4750_p6 }
  0x31   : > { %4758 = shalt.err (!%p4755_p3)
}
  0x32   : > { %s4759_s22 = scalar_lea.vmem %s4962_s25, 384  ;;  %p4767_p12 = scmp.lt.s32.totalorder %s4962_s25, %s4962_s25 }
  0x33   : > { %p4760_p5 = scmp.ne.s32.totalorder %s4962_s25, %s4759_s22  ;;  %p4768_p0 = scmp.lt.s32.totalorder %s4759_s22, %s4759_s22 }
  0x35   : > { %p4762_p7 = pnand %p4760_p5, %p4720_p13  ;;  %p4769_p1 = por %p4768_p0, %p4767_p12 }
  0x37   : > { %p4763_p9 = pneg %p4762_p7 }
  0x39   : > { %p4770_p2 = pnand %p4769_p1, %p4763_p9 }
  0x3b   : > { %4773 = shalt.err (!%p4770_p2)
}
  0x3c   : > { %4295 = dma.hbm_to_vmem [thread:$0]  (!%p4958_p11), %s6905_s2, 384, %s4962_s25, [#allocation6], %s4878_s7, %s4878_s7, %s4879_s8  }
  0x3d   : > { %s5023_s23 = sadd.s32 1, %s4874_s15   ;;  %s27_s4 = sadd.s32 1, %s4870_s14 }
  0x3e   : > { %s24_s5 = ssub.s32 %s4874_s15, %s5023_s23  ;;  %p34_p13 = scmp.ne.s32.totalorder %s4870_s14, %s4866_s13 }
  0x3f   : > { %p25_p6 = scmp.eq.s32.totalorder %s24_s5, 0  ;;  %p35_p10 = scmp.eq.s32.totalorder %s4874_s15, 0 }
  0x40   : > { %p6914_p3 = scmp.eq.s32.totalorder %s4928_s16, 1  ;;  %p4306_p7 = scmp.lt.s32.totalorder %s4874_s15, 2 }
  0x41   : > { %s5039_s9 = scalar_select %p25_p6, %s4870_s14, %s27_s4  }
  0x42   : > { %p5033_p5 = por %p6914_p3, %p34_p13  ;;  %p36_p9 = por %p35_p10, %p34_p13 }
  0x43   : > { %s158_s10 = sand.u32 1, %s4870_s14   ;;  %s3529_s25 = smul.u32 1664, %s4874_s15 }
  0x44   : > { %s6915_s6 = scalar_select %p5033_p5, 1, 0 }
  0x45   : > { %s4275_s11 = smul.u32 104, %s158_s10  ;;  %p5043_p11 = pnand %p4306_p7, %p36_p9 }
  0x46   : > { %s5050_s26 = scalar_lea.hbm %s6903_s0, %s3529_s25  ;;  %s5054_s22 = scalar_lea.sflag [#allocation3], %s158_s10 }
  0x47   : > { %s162_s27 = scalar_lea.vmem [#allocation2], %s4275_s11  ;;  %s4774_s29 = scalar_lea.hbm %s5050_s26, 1664 }
  0x48   : > { %s169_s28 = sshll.u32 %s162_s27, 4  ;;  %p4775_p12 = scmp.ne.s32.totalorder %s5050_s26, %s4774_s29  ;;  %s5052_s28 = int_to_ptr.vmem [resolvable:$true] %s169_s28 }
  0x49   : > { %p4776_p0 = pneg %p5043_p11  ;;  %s4779_s5 = scalar_lea.hbm %s6903_s0, 3328 }
  0x4a   : > { %p4780_p13 = scmp.lt.u32.totalorder %s5050_s26, %s6903_s0  ;;  %p4781_p6 = scmp.lt.u32.totalorder %s4779_s5, %s4774_s29 }
  0x4b   : > { %p4777_p1 = pnand %p4776_p0, %p4775_p12  ;;  %p4783_p3 = scmp.lt.u32.totalorder %s4774_s29, %s5050_s26 }
  0x4c   : > { %p4782_p10 = por %p4781_p6, %p4780_p13 }
  0x4d   : > { %p4778_p2 = pneg %p4777_p1 }
  0x4e   : > { %p4784_p7 = por %p4783_p3, %p4782_p10 }
  0x50   : > { %p4785_p9 = pnand %p4784_p7, %p4778_p2 }
  0x52   : > { %4788 = shalt.err (!%p4785_p9)
}
  0x53   : > { %s4789_s10 = scalar_lea.vmem %s5052_s28, 1664  ;;  %s4880_s11 = smov [#allocation2]  }
  0x54   : > { %p4790_p12 = scmp.ne.s32.totalorder %s5052_s28, %s4789_s10  ;;  %s4794_s24 = sshll.u32 %s4880_s11, 4  ;;  %s4795_s24 = int_to_ptr.vmem [resolvable:$false] %s4794_s24 }
  0x55   : > { %s4796_s27 = scalar_lea.vmem %s4795_s24, 3328  ;;  %p4797_p4 = scmp.lt.s32.totalorder %s5052_s28, %s4795_s24 }
  0x56   : > { %p4792_p1 = pnand %p4790_p12, %p4776_p0  ;;  %p4798_p13 = scmp.lt.s32.totalorder %s4796_s27, %s4789_s10 }
  0x58   : > { %p4793_p5 = pneg %p4792_p1  ;;  %p4799_p6 = por %p4798_p13, %p4797_p4 }
  0x5a   : > { %p4800_p10 = pnand %p4799_p6, %p4793_p5 }
  0x5c   : > { %4803 = shalt.err (!%p4800_p10)
}
  0x5d   : > { %4299 = dma.hbm_to_vmem [thread:$0]  (!%p5043_p11), %s5050_s26, 1664, %s5052_s28, %s5054_s22, %s4878_s7, %s4878_s7, %s4879_s8  }
  0x5e   : > { %181 = sbr.rel (%p4947_p8) target bundleno = 2659 (0xa63), region = 32  ;;  %s5088_s29 = sand.u32 (!%p4947_p8), 1, %s4866_s13  }
  0x5f   : > { %s4276_s30 = smul.u32 (!%p4947_p8), 104, %s5088_s29  ;;  %s184_s4 = scalar_lea.sflag (!%p4947_p8), [#allocation3], %s5088_s29 }
  0x60   : > { %p6917_p4 = scmp.ne.s32.totalorder (!%p4947_p8), %s6910_s18, 0 }
  0x61   : > { %s5094_s17 = scalar_lea.vmem (!%p4947_p8), [#allocation2], %s4276_s30 }
  0x65   : > { %4849 = dma.done.wait (%p6917_p4), %s184_s4, 1664  }
  0x66   : > { %4851 = vsyncadd (%p6917_p4), %s184_s4, 4294965632  ;;  %p6918_p5 = scmp.eq.s32.totalorder %s4928_s16, 0 }
  0x68   : > { %4853 = dma.done.wait (%p6918_p5), [#allocation6], 12672   ;;  %p6919_p8 = pmov %p6918_p5 }
  0x69   : > { %v4881_v0 = vmov 0.0|0.0   ;;  %vm4882_vm0 = vmmov 0   ;;  %v4883_v1 = vmov 0.0   ;;  %v249_v2 = vld [vmem:[#allocation5] sm:$0xff]  ;;  %v250_v3 = vld [vmem:[#allocation5 + $0x8] sm:$0xff]  ;;  %v251_v4 = vld [vmem:[#allocation5 + $0x10] sm:$0xff]  ;;  %v223_v39 = vlaneseq }
  0x6a   : > { %4855 = vsyncadd (%p6919_p8), [#allocation6], 4294954624  ;;  %4131 = vmatprep.subr.bf16.mxu0 %v4881_v0  ;;  %3737 = vmatprep.mubr.msk.f32.mxu0 %vm4882_vm0, %v4883_v1  ;;  %v4132_v5 = vpack.c.bf16 %v250_v3, %v249_v2  ;;  %v252_v6 = vld [vmem:[#allocation5 + $0x18] sm:$0xff]  ;;  %v253_v8 = vld [vmem:[#allocation5 + $0x20] sm:$0xff]  ;;  %s6772_s18 = scalar_lea.vmem [#allocation8], %s4276_s30  ;;  %s3530_s20 = smul.u32 1664, %s4928_s16 }
  0x6b   : > { %4155 = vmatprep.subr.bf16.mxu1 %v4881_v0  ;;  %3808 = vmatprep.mubr.msk.f32.mxu1 %vm4882_vm0, %v4883_v1  ;;  %v4135_v7 = vpack.c.bf16 %v252_v6, %v251_v4  ;;  %v254_v9 = vld [vmem:[#allocation5 + $0x28] sm:$0xff]  ;;  %v255_v11 = vld [vmem:[#allocation5 + $0x30] sm:$0xff]  ;;  %v256_v12 = vld [vmem:[#allocation5 + $0x38] sm:$0xff]  ;;  %v5158_v40 = vshrl.u32 %v223_v39, 7  ;;  %s3344_s7 = sshll.u32 %s6772_s18, 4  ;;  %s3331_s16 = scalar_lea.sflag [#allocation4], %s5088_s29  ;;  %s6855_s7 = int_to_ptr.vmem [resolvable:$true] %s3344_s7 }
  0x6c   : > { %4133 = vmatpush3.bf16.msra.mxu0 %v4132_v5  ;;  %v4138_v10 = vpack.c.bf16 %v254_v9, %v253_v8  ;;  %v4141_v13 = vpack.c.bf16 %v256_v12, %v255_v11  ;;  %v257_v14 = vld [vmem:[#allocation5 + $0x40] sm:$0xff]  ;;  %v258_v15 = vld [vmem:[#allocation5 + $0x48] sm:$0xff]  ;;  %v259_v17 = vld [vmem:[#allocation5 + $0x50] sm:$0xff]  ;;  %s6852_s28 = scalar_lea.hbm %s6906_s3, %s3530_s20  ;;  %s4804_s22 = scalar_lea.vmem %s6855_s7, 1664 }
  0x6d   : > { %4134 = vmatprep.subr.bf16.mxu0 %v4881_v0  ;;  %v4144_v16 = vpack.c.bf16 %v258_v15, %v257_v14  ;;  %v260_v18 = vld [vmem:[#allocation5 + $0x58] sm:$0xff]  ;;  %v261_v20 = vld [vmem:[#allocation5 + $0x60] sm:$0xff]  ;;  %v262_v21 = vld [vmem:[#allocation5 + $0x68] sm:$0xff]  ;;  %v5161_v41 = vsub.s32 0, %v5158_v40  ;;  %p4805_p11 = scmp.ne.s32.totalorder %s6855_s7, %s4804_s22  ;;  %p6920_p0 = scmp.ne.s32.totalorder %s6915_s6, 0 }
  0x6e   : > { %v4147_v19 = vpack.c.bf16 %v260_v18, %v259_v17  ;;  %v4150_v22 = vpack.c.bf16 %v262_v21, %v261_v20  ;;  %v263_v23 = vld [vmem:[#allocation5 + $0x70] sm:$0xff]  ;;  %v264_v24 = vld [vmem:[#allocation5 + $0x78] sm:$0xff]  ;;  %v238_v28 = vld [vmem:[%s5094_s17 + $0x10] sm:$0xff]  ;;  %s4884_s5 = smov [#allocation8]  }
  0x6f   : > { %v4153_v25 = vpack.c.bf16 %v264_v24, %v263_v23  ;;  %v236_v26 = vld [vmem:[%s5094_s17] sm:$0xff]  ;;  %v237_v27 = vld [vmem:[%s5094_s17 + $0x8] sm:$0xff]  ;;  %v239_v29 = vld [vmem:[%s5094_s17 + $0x18] sm:$0xff]  ;;  %p4806_p2 = pnand %p4805_p11, %p6920_p0  ;;  %s4808_s25 = sshll.u32 %s4884_s5, 4  ;;  %s4809_s25 = int_to_ptr.vmem [resolvable:$false] %s4808_s25 }
  0x70   : > { %4136 = vmatpush3.bf16.msra.mxu0 %v4135_v7  ;;  %v240_v30 = vld [vmem:[%s5094_s17 + $0x20] sm:$0xff]  ;;  %v241_v31 = vld [vmem:[%s5094_s17 + $0x28] sm:$0xff]  ;;  %v242_v32 = vld [vmem:[%s5094_s17 + $0x30] sm:$0xff]  ;;  %s4810_s21 = scalar_lea.vmem %s4809_s25, 3328  ;;  %p4811_p7 = scmp.lt.s32.totalorder %s6855_s7, %s4809_s25 }
  0x71   : > { %4137 = vmatprep.subr.bf16.mxu0 %v4881_v0  ;;  %v243_v33 = vld [vmem:[%s5094_s17 + $0x38] sm:$0xff]  ;;  %v244_v34 = vld [vmem:[%s5094_s17 + $0x40] sm:$0xff]  ;;  %v245_v35 = vld [vmem:[%s5094_s17 + $0x48] sm:$0xff]  ;;  %p4807_p3 = pneg %p4806_p2  ;;  %p4812_p9 = scmp.lt.s32.totalorder %s4810_s21, %s4804_s22 }
  0x72   : > { %v246_v36 = vld [vmem:[%s5094_s17 + $0x50] sm:$0xff]  ;;  %v247_v37 = vld [vmem:[%s5094_s17 + $0x58] sm:$0xff]  ;;  %v248_v38 = vld [vmem:[%s5094_s17 + $0x60] sm:$0xff] }
  0x73   : > { %v5163_v42 = vld [vmem:[#allocation7] sm:$0xff]  ;;  %v670_v17 = vld [vmem:[#allocation5 + $0x98] sm:$0xff]  ;;  %v672_v24 = vld [vmem:[#allocation5 + $0xa8] sm:$0xff]  ;;  %p4813_p12 = por %p4812_p9, %p4811_p7 }
  0x74   : > { %4139 = vmatpush3.bf16.msra.mxu0 %v4138_v10  ;;  %v5167_v43 = vrot.slane %v5163_v42, %v5161_v41  ;;  %v667_v9 = vld [vmem:[#allocation5 + $0x80] sm:$0xff]  ;;  %v668_v10 = vld [vmem:[#allocation5 + $0x88] sm:$0xff] }
  0x75   : > { %4140 = vmatprep.subr.bf16.mxu0 %v4881_v0  ;;  %v4156_v12 = vpack.c.bf16 %v668_v10, %v667_v9  ;;  %v671_v23 = vld [vmem:[#allocation5 + $0xa0] sm:$0xff]  ;;  %p4814_p1 = pnand %p4813_p12, %p4807_p3 }
  0x77   : > { %4157 = vmatpush3.bf16.msra.mxu1 %v4156_v12 }
  0x78   : > { %4142 = vmatpush3.bf16.msra.mxu0 %v4141_v13  ;;  %4158 = vmatprep.subr.bf16.mxu1 %v4881_v0 }
  0x79   : > { %4143 = vmatprep.subr.bf16.mxu0 %v4881_v0 }
  0x7c   : > { %4145 = vmatpush3.bf16.msra.mxu0 %v4144_v16  ;;  %v669_v16 = vld [vmem:[#allocation5 + $0x90] sm:$0xff] }
  0x7d   : > { %4146 = vmatprep.subr.bf16.mxu0 %v4881_v0 }
  0x80   : > { %4148 = vmatpush3.bf16.msra.mxu0 %v4147_v19  ;;  %v4159_v19 = vpack.c.bf16 %v670_v17, %v669_v16 }
  0x81   : > { %4149 = vmatprep.subr.bf16.mxu0 %v4881_v0 }
  0x82   : > { %4160 = vmatpush3.bf16.msra.mxu1 %v4159_v19 }
  0x83   : > { %4161 = vmatprep.subr.bf16.mxu1 %v4881_v0 }
  0x84   : > { %4151 = vmatpush3.bf16.msra.mxu0 %v4150_v22 }
  0x85   : > { %4152 = vmatprep.subr.bf16.mxu0 %v4881_v0 }
  0x88   : > { %4154 = vmatpush3.bf16.msra.mxu0 %v4153_v25 }
  0x89   : > { %4179 = vmatprep.subr.bf16.mxu0 %v4881_v0 }
  0x8b   : > { %3738 = vmatmul.mubr.f32.vlgmr.msra.gmra.mrb[0].mxu0 %v236_v26  ;;  %v4162_v26 = vpack.c.bf16 %v672_v24, %v671_v23 }
  0x8c   : > { %3740 = vmatprep.mubr.msk.f32.mxu0 %vm4882_vm0, %v4883_v1 }
  0x8d   : > { %4163 = vmatpush3.bf16.msra.mxu1 %v4162_v26 }
  0x8e   : > { %4164 = vmatprep.subr.bf16.mxu1 %v4881_v0 }
  0x8f   : > { %3741 = vmatmul.mubr.f32.gmra.mrb[2].mxu0 %v237_v27 }
  0x90   : > { %3743 = vmatprep.mubr.msk.f32.mxu0 %vm4882_vm0, %v4883_v1 }
  0x93   : > { %3744 = vmatmul.mubr.f32.gmra.mrb[4].mxu0 %v238_v28 }
  0x94   : > { %3746 = vmatprep.mubr.msk.f32.mxu0 %vm4882_vm0, %v4883_v1 }
  0x97   : > { %3747 = vmatmul.mubr.f32.gmra.mrb[6].mxu0 %v239_v29 }
  0x98   : > { %3749 = vmatprep.mubr.msk.f32.mxu0 %vm4882_vm0, %v4883_v1 }
  0x9b   : > { %3750 = vmatmul.mubr.f32.gmra.mrb[8].mxu0 %v240_v30  ;;  %v673_v30 = vld [vmem:[#allocation5 + $0xb0] sm:$0xff] }
  0x9c   : > { %3752 = vmatprep.mubr.msk.f32.mxu0 %vm4882_vm0, %v4883_v1 }
  0x9f   : > { %3753 = vmatmul.mubr.f32.gmra.mrb[10].mxu0 %v241_v31  ;;  %v674_v31 = vld [vmem:[#allocation5 + $0xb8] sm:$0xff] }
  0xa0   : > { %3755 = vmatprep.mubr.msk.f32.mxu0 %vm4882_vm0, %v4883_v1 }
  0xa3   : > { %3756 = vmatmul.mubr.f32.gmra.mrb[12].mxu0 %v242_v32 }
  0xa4   : > { %3758 = vmatprep.mubr.msk.f32.mxu0 %vm4882_vm0, %v4883_v1 }
  0xa7   : > { %3759 = vmatmul.mubr.f32.gmra.mrb[14].mxu0 %v243_v33  ;;  %v4165_v33 = vpack.c.bf16 %v674_v31, %v673_v30 }
  0xa8   : > { %3761 = vmatprep.mubr.msk.f32.mxu0 %vm4882_vm0, %v4883_v1 }
  0xa9   : > { %4166 = vmatpush3.bf16.msra.mxu1 %v4165_v33  ;;  %v5260_v33 = vsub.s32 1, %v5158_v40 }
  0xaa   : > { %4167 = vmatprep.subr.bf16.mxu1 %v4881_v0 }
  0xab   : > { %3762 = vmatmul.mubr.f32.gmra.mrb[16].mxu0 %v244_v34 }
  0xac   : > { %3764 = vmatprep.mubr.msk.f32.mxu0 %vm4882_vm0, %v4883_v1 }
  0xaf   : > { %3765 = vmatmul.mubr.f32.gmra.mrb[18].mxu0 %v245_v35 }
  0xb0   : > { %3767 = vmatprep.mubr.msk.f32.mxu0 %vm4882_vm0, %v4883_v1 }
  0xb3   : > { %3768 = vmatmul.mubr.f32.gmra.mrb[20].mxu0 %v246_v36 }
  0xb4   : > { %3770 = vmatprep.mubr.msk.f32.mxu0 %vm4882_vm0, %v4883_v1 }
  0xb7   : > { %3771 = vmatmul.mubr.f32.gmra.mrb[22].mxu0 %v247_v37  ;;  %v675_v37 = vld [vmem:[#allocation5 + $0xc0] sm:$0xff] }
  0xb8   : > { %3773 = vmatprep.mubr.msk.f32.mxu0 %vm4882_vm0, %v4883_v1 }
  0xbb   : > { %3774 = vmatmul.mubr.f32.gmra.mrb[24].mxu0 %v248_v38  ;;  %v676_v38 = vld [vmem:[#allocation5 + $0xc8] sm:$0xff] }
  0xbc   : > { %3879 = vmatprep.mubr.msk.f32.mxu0 %vm4882_vm0, %v4883_v1 }
 0x15e   : > { %v335_v44 = vpop.f32.mrb[0].mxu0 }
 0x15f   : > { %v5170_v45 = vadd.f32 %v335_v44, %v5167_v43  ;;  %v3739_v46 = vpop.f32.mrb[1].mxu0 }
 0x160   : > { %v4168_v46 = vpack.c.bf16 %v676_v38, %v675_v37 }
 0x161   : > { %399 = vadd.xlane.f32.xlu0 %v5170_v45  ;;  %v438_v50 = vmul.f32 %v5170_v45, %v5170_v45 }
 0x162   : > { %v340_v47 = vpop.f32.mrb[2].mxu0  ;;  %4169 = vmatpush3.bf16.msra.mxu1 %v4168_v46  ;;  %v587_v46 = vsub.s32 2, %v5158_v40 }
 0x163   : > { %v5174_v48 = vadd.f32 %v340_v47, %v5167_v43  ;;  %v3742_v49 = vpop.f32.mrb[3].mxu0  ;;  %4170 = vmatprep.subr.bf16.mxu1 %v4881_v0 }
 0x165   : > { %401 = vadd.xlane.f32.xlu1 %v5174_v48  ;;  %451 = vadd.xlane.f32.xlu0 %v438_v50  ;;  %v439_v51 = vmul.f32 %v5174_v48, %v5174_v48 }
 0x166   : > { %v345_v52 = vpop.f32.mrb[4].mxu0 }
 0x167   : > { %v5182_v53 = vadd.f32 %v345_v52, %v5167_v43  ;;  %v3745_v54 = vpop.f32.mrb[5].mxu0  ;;  %v678_v52 = vld [vmem:[#allocation5 + $0xd8] sm:$0xff] }
 0x169   : > { %453 = vadd.xlane.f32.xlu1 %v439_v51  ;;  %403 = vadd.xlane.f32.xlu0 %v5182_v53  ;;  %v440_v55 = vmul.f32 %v5182_v53, %v5182_v53  ;;  %v677_v51 = vld [vmem:[#allocation5 + $0xd0] sm:$0xff] }
 0x16a   : > { %v350_v56 = vpop.f32.mrb[6].mxu0 }
 0x16b   : > { %v5188_v57 = vadd.f32 %v350_v56, %v5167_v43  ;;  %v3748_v58 = vpop.f32.mrb[7].mxu0 }
 0x16d   : > { %455 = vadd.xlane.f32.xlu1 %v440_v55  ;;  %405 = vadd.xlane.f32.xlu0 %v5188_v57  ;;  %v441_v59 = vmul.f32 %v5188_v57, %v5188_v57  ;;  %v4171_v55 = vpack.c.bf16 %v678_v52, %v677_v51 }
 0x16e   : > { %v355_v60 = vpop.f32.mrb[8].mxu0 }
 0x16f   : > { %v5194_v61 = vadd.f32 %v355_v60, %v5167_v43  ;;  %v3751_v62 = vpop.f32.mrb[9].mxu0  ;;  %4172 = vmatpush3.bf16.msra.mxu1 %v4171_v55  ;;  %v679_v60 = vld [vmem:[#allocation5 + $0xe0] sm:$0xff]  ;;  %v5270_v55 = vrot.slane %v5163_v42, %v5260_v33 }
 0x170   : > { %4173 = vmatprep.subr.bf16.mxu1 %v4881_v0  ;;  %v680_v62 = vld [vmem:[#allocation5 + $0xe8] sm:$0xff] }
 0x171   : > { %457 = vadd.xlane.f32.xlu1 %v441_v59  ;;  %407 = vadd.xlane.f32.xlu0 %v5194_v61  ;;  %v442_v63 = vmul.f32 %v5194_v61, %v5194_v61 }
 0x172   : > { %v360_v2 = vpop.f32.mrb[10].mxu0 }
 0x173   : > { %v5200_v3 = vadd.f32 %v360_v2, %v5167_v43  ;;  %v3754_v4 = vpop.f32.mrb[11].mxu0  ;;  %v4174_v2 = vpack.c.bf16 %v680_v62, %v679_v60 }
 0x174   : > { %v681_v4 = vld [vmem:[#allocation5 + $0xf0] sm:$0xff] }
 0x175   : > { %459 = vadd.xlane.f32.xlu1 %v442_v63  ;;  %409 = vadd.xlane.f32.xlu0 %v5200_v3  ;;  %v443_v5 = vmul.f32 %v5200_v3, %v5200_v3 }
 0x176   : > { %v365_v6 = vpop.f32.mrb[12].mxu0  ;;  %4175 = vmatpush3.bf16.msra.mxu1 %v4174_v2  ;;  %v5277_v2 = vrot.slane %v5163_v42, %v587_v46 }
 0x177   : > { %v5206_v7 = vadd.f32 %v365_v6, %v5167_v43  ;;  %v3757_v8 = vpop.f32.mrb[13].mxu0  ;;  %4176 = vmatprep.subr.bf16.mxu1 %v4881_v0 }
 0x179   : > { %461 = vadd.xlane.f32.xlu1 %v443_v5  ;;  %411 = vadd.xlane.f32.xlu0 %v5206_v7  ;;  %v444_v11 = vmul.f32 %v5206_v7, %v5206_v7  ;;  %v682_v5 = vld [vmem:[#allocation5 + $0xf8] sm:$0xff] }
 0x17a   : > { %v370_v13 = vpop.f32.mrb[14].mxu0 }
 0x17b   : > { %v5212_v14 = vadd.f32 %v370_v13, %v5167_v43  ;;  %v3760_v15 = vpop.f32.mrb[15].mxu0 }
 0x17d   : > { %463 = vadd.xlane.f32.xlu1 %v444_v11  ;;  %413 = vadd.xlane.f32.xlu0 %v5212_v14  ;;  %v445_v18 = vmul.f32 %v5212_v14, %v5212_v14 }
 0x17e   : > { %v375_v20 = vpop.f32.mrb[16].mxu0 }
 0x17f   : > { %v5219_v21 = vadd.f32 %v375_v20, %v5167_v43  ;;  %v3763_v22 = vpop.f32.mrb[17].mxu0 }
 0x181   : > { %465 = vadd.xlane.f32.xlu1 %v445_v18  ;;  %415 = vadd.xlane.f32.xlu0 %v5219_v21  ;;  %v446_v25 = vmul.f32 %v5219_v21, %v5219_v21 }
 0x182   : > { %v380_v27 = vpop.f32.mrb[18].mxu0 }
 0x183   : > { %v5226_v28 = vadd.f32 %v380_v27, %v5167_v43  ;;  %v3766_v29 = vpop.f32.mrb[19].mxu0 }
 0x185   : > { %467 = vadd.xlane.f32.xlu1 %v446_v25  ;;  %417 = vadd.xlane.f32.xlu0 %v5226_v28  ;;  %v447_v32 = vmul.f32 %v5226_v28, %v5226_v28 }
 0x186   : > { %v385_v34 = vpop.f32.mrb[20].mxu0 }
 0x187   : > { %v5233_v35 = vadd.f32 %v385_v34, %v5167_v43  ;;  %v3769_v36 = vpop.f32.mrb[21].mxu0 }
 0x189   : > { %469 = vadd.xlane.f32.xlu1 %v447_v32  ;;  %419 = vadd.xlane.f32.xlu0 %v5233_v35  ;;  %v448_v44 = vmul.f32 %v5233_v35, %v5233_v35 }
 0x18a   : > { %v390_v47 = vpop.f32.mrb[22].mxu0 }
 0x18b   : > { %v5240_v49 = vadd.f32 %v390_v47, %v5167_v43  ;;  %v3772_v50 = vpop.f32.mrb[23].mxu0 }
 0x18d   : > { %471 = vadd.xlane.f32.xlu1 %v448_v44  ;;  %421 = vadd.xlane.f32.xlu0 %v5240_v49  ;;  %v449_v54 = vmul.f32 %v5240_v49, %v5240_v49 }
 0x18e   : > { %v395_v56 = vpop.f32.mrb[24].mxu0 }
 0x18f   : > { %v5247_v58 = vadd.f32 %v395_v56, %v5167_v43  ;;  %v3775_v59 = vpop.f32.mrb[25].mxu0  ;;  %v4177_v43 = vpack.c.bf16 %v682_v5, %v681_v4 }
 0x191   : > { %473 = vadd.xlane.f32.xlu1 %v449_v54  ;;  %423 = vadd.xlane.f32.xlu0 %v5247_v58  ;;  %v450_v63 = vmul.f32 %v5247_v58, %v5247_v58 }
 0x192   : > { %4178 = vmatpush3.bf16.msra.mxu1 %v4177_v43 }
 0x193   : > { %4203 = vmatprep.subr.bf16.mxu1 %v4881_v0 }
 0x195   : > { %475 = vadd.xlane.f32.xlu1 %v450_v63 }
 0x1ee   : > { %v400_v6 = vpop.xlane.xlu0 %399 }
 0x1ef   : > { %v425_v8 = vmul.f32 0.0078125, %v400_v6 }
 0x1f1   : > { %v490_v11 = vmul.f32 %v425_v8, %v425_v8  ;;  %v516_v51 = vsub.f32 %v5170_v45, %v425_v8 }
 0x1f2   : > { %v402_v9 = vpop.xlane.xlu1 %401  ;;  %v452_v10 = vpop.xlane.xlu0 %451 }
 0x1f3   : > { %v426_v12 = vmul.f32 0.0078125, %v402_v9  ;;  %v477_v13 = vmul.f32 0.0078125, %v452_v10 }
 0x1f5   : > { %v491_v15 = vmul.f32 %v426_v12, %v426_v12  ;;  %v503_v16 = vsub.f32 %v477_v13, %v490_v11  ;;  %v517_v5 = vsub.f32 %v5174_v48, %v426_v12 }
 0x1f6   : > { %v454_v17 = vpop.xlane.xlu1 %453  ;;  %v404_v18 = vpop.xlane.xlu0 %403 }
 0x1f7   : > { %v529_v19 = vadd.f32 1e-05, %v503_v16  ;;  %v478_v20 = vmul.f32 0.0078125, %v454_v17  ;;  %v427_v22 = vmul.f32 0.0078125, %v404_v18 }
 0x1f9   : > { %4351 = vrsqrt.f32 %v529_v19  ;;  %v504_v23 = vsub.f32 %v478_v20, %v491_v15  ;;  %v492_v24 = vmul.f32 %v427_v22, %v427_v22  ;;  %v518_v48 = vsub.f32 %v5182_v53, %v427_v22 }
 0x1fa   : > { %v456_v25 = vpop.xlane.xlu1 %455  ;;  %v406_v26 = vpop.xlane.xlu0 %405 }
 0x1fb   : > { %v530_v27 = vadd.f32 1e-05, %v504_v23  ;;  %v479_v29 = vmul.f32 0.0078125, %v456_v25  ;;  %v5255_v30 = vmul.f32 0.0078125, %v406_v26 }
 0x1fd   : > { %4353 = vrsqrt.f32 %v530_v27  ;;  %v505_v31 = vsub.f32 %v479_v29, %v492_v24  ;;  %v493_v32 = vmul.f32 %v5255_v30, %v5255_v30  ;;  %v519_v22 = vsub.f32 %v5188_v57, %v5255_v30 }
 0x1fe   : > { %v458_v34 = vpop.xlane.xlu1 %457  ;;  %v408_v36 = vpop.xlane.xlu0 %407 }
 0x1ff   : > { %v531_v37 = vadd.f32 1e-05, %v505_v31  ;;  %v480_v38 = vmul.f32 0.0078125, %v458_v34  ;;  %v5262_v44 = vmul.f32 0.0078125, %v408_v36 }
 0x201   : > { %4355 = vrsqrt.f32 %v531_v37  ;;  %v506_v47 = vsub.f32 %v480_v38, %v493_v32  ;;  %v494_v50 = vmul.f32 %v5262_v44, %v5262_v44  ;;  %v520_v30 = vsub.f32 %v5194_v61, %v5262_v44 }
 0x202   : > { %v460_v52 = vpop.xlane.xlu1 %459  ;;  %v410_v54 = vpop.xlane.xlu0 %409 }
 0x203   : > { %v4352_v56 = vpop.eup %4351  ;;  %v532_v59 = vadd.f32 1e-05, %v506_v47  ;;  %v481_v60 = vmul.f32 0.0078125, %v460_v52  ;;  %v5272_v62 = vmul.f32 0.0078125, %v410_v54 }
 0x204   : > { %v555_v63 = vmul.f32 %v4352_v56, %v516_v51 }
 0x205   : > { %4357 = vrsqrt.f32 %v532_v59  ;;  %v507_v4 = vsub.f32 %v481_v60, %v494_v50  ;;  %v495_v45 = vmul.f32 %v5272_v62, %v5272_v62 }
 0x206   : > { %v462_v43 = vpop.xlane.xlu1 %461  ;;  %v412_v6 = vpop.xlane.xlu0 %411  ;;  %v572_v8 = vmul.f32 %v5270_v55, %v555_v63 }
 0x207   : > { %v4354_v9 = vpop.eup %4353  ;;  %v533_v10 = vadd.f32 1e-05, %v507_v4  ;;  %v482_v11 = vmul.f32 0.0078125, %v462_v43  ;;  %v5283_v13 = vmul.f32 0.0078125, %v412_v6 }
 0x208   : > { %v5286_v15 = vadd.f32 %v5277_v2, %v572_v8  ;;  %v556_v16 = vmul.f32 %v4354_v9, %v517_v5 }
 0x209   : > { %4359 = vrsqrt.f32 %v533_v10  ;;  %v508_v17 = vsub.f32 %v482_v11, %v495_v45  ;;  %v496_v18 = vmul.f32 %v5283_v13, %v5283_v13 }
 0x20a   : > { %v464_v12 = vpop.xlane.xlu1 %463  ;;  %v414_v19 = vpop.xlane.xlu0 %413  ;;  %v615_v20 = vmul.f32 1.442695, %v5286_v15  ;;  %v573_v23 = vmul.f32 %v5270_v55, %v556_v16  ;;  %v521_v16 = vsub.f32 %v5200_v3, %v5272_v62  ;;  %vm602_vm1 = vcmp.gt.f32.partialorder %v5286_v15, 0.0 }
 0x20b   : > { %v4356_v24 = vpop.eup %4355  ;;  %v534_v25 = vadd.f32 1e-05, %v508_v17  ;;  %v483_v26 = vmul.f32 0.0078125, %v464_v12  ;;  %v5293_v27 = vmul.f32 0.0078125, %v414_v19 }
 0x20c   : > { %4361 = vpow2.f32 %v615_v20  ;;  %v5296_v29 = vadd.f32 %v5277_v2, %v573_v23  ;;  %v557_v31 = vmul.f32 %v4356_v24, %v518_v48 }
 0x20d   : > { %4363 = vrsqrt.f32 %v534_v25  ;;  %v509_v32 = vsub.f32 %v483_v26, %v496_v18  ;;  %v497_v53 = vmul.f32 %v5293_v27, %v5293_v27 }
 0x20e   : > { %v466_v34 = vpop.xlane.xlu1 %465  ;;  %v416_v36 = vpop.xlane.xlu0 %415  ;;  %v617_v37 = vmul.f32 1.442695, %v5296_v29  ;;  %v574_v38 = vmul.f32 %v5270_v55, %v557_v31  ;;  %vm603_vm2 = vcmp.gt.f32.partialorder %v5296_v29, 0.0 }
 0x20f   : > { %v4358_v47 = vpop.eup %4357  ;;  %v535_v50 = vadd.f32 1e-05, %v509_v32  ;;  %v484_v51 = vmul.f32 0.0078125, %v466_v34  ;;  %v5304_v52 = vmul.f32 0.0078125, %v416_v36 }
 0x210   : > { %4365 = vpow2.f32 %v617_v37  ;;  %v5307_v54 = vadd.f32 %v5277_v2, %v574_v38  ;;  %v558_v56 = vmul.f32 %v4358_v47, %v519_v22 }
 0x211   : > { %4367 = vrsqrt.f32 %v535_v50  ;;  %v510_v59 = vsub.f32 %v484_v51, %v497_v53  ;;  %v498_v57 = vmul.f32 %v5304_v52, %v5304_v52  ;;  %v522_v53 = vsub.f32 %v5206_v7, %v5283_v13 }
 0x212   : > { %v468_v60 = vpop.xlane.xlu1 %467  ;;  %v418_v63 = vpop.xlane.xlu0 %417  ;;  %v619_v4 = vmul.f32 1.442695, %v5307_v54  ;;  %v575_v45 = vmul.f32 %v5270_v55, %v558_v56  ;;  %vm604_vm3 = vcmp.gt.f32.partialorder %v5307_v54, 0.0 }
 0x213   : > { %v4360_v5 = vpop.eup %4359  ;;  %v536_v43 = vadd.f32 1e-05, %v510_v59  ;;  %v485_v6 = vmul.f32 0.0078125, %v468_v60  ;;  %v5315_v8 = vmul.f32 0.0078125, %v418_v63  ;;  %v523_v60 = vsub.f32 %v5212_v14, %v5293_v27 }
 0x214   : > { %4369 = vpow2.f32 %v619_v4  ;;  %v5318_v9 = vadd.f32 %v5277_v2, %v575_v45  ;;  %v559_v10 = vmul.f32 %v4360_v5, %v520_v30 }
 0x215   : > { %4371 = vrsqrt.f32 %v536_v43  ;;  %v511_v11 = vsub.f32 %v485_v6, %v498_v57  ;;  %v499_v61 = vmul.f32 %v5315_v8, %v5315_v8 }
 0x216   : > { %v4362_v44 = vpop.eup %4361  ;;  %v470_v17 = vpop.xlane.xlu1 %469  ;;  %v621_v48 = vmul.f32 1.442695, %v5318_v9  ;;  %v576_v12 = vmul.f32 %v5270_v55, %v559_v10  ;;  %vm605_vm4 = vcmp.gt.f32.partialorder %v5318_v9, 0.0 }
 0x217   : > { %v420_v18 = vpop.xlane.xlu0 %419  ;;  %v4364_v19 = vpop.eup %4363  ;;  %v537_v20 = vadd.f32 1e-05, %v511_v11  ;;  %v486_v23 = vmul.f32 0.0078125, %v470_v17  ;;  %v3448_v25 = vadd.f32 -1.0, %v4362_v44 }
 0x218   : > { %v5326_v24 = vmul.f32 0.0078125, %v420_v18  ;;  %4373 = vpow2.f32 %v621_v48  ;;  %v5329_v26 = vadd.f32 %v5277_v2, %v576_v12  ;;  %v560_v31 = vmul.f32 %v4364_v19, %v521_v16 }
 0x219   : > { %4375 = vrsqrt.f32 %v537_v20  ;;  %v512_v32 = vsub.f32 %v486_v23, %v499_v61  ;;  %v654_v34 = vsel %vm602_vm1, %v5286_v15, %v3448_v25  ;;  %v524_v18 = vsub.f32 %v5219_v21, %v5304_v52 }
 0x21a   : > { %v500_v3 = vmul.f32 %v5326_v24, %v5326_v24  ;;  %v4366_v62 = vpop.eup %4365  ;;  %v472_v22 = vpop.xlane.xlu1 %471  ;;  %v623_v37 = vmul.f32 1.442695, %v5329_v26  ;;  %v577_v38 = vmul.f32 %v5270_v55, %v560_v31  ;;  %3809 = vmatmul.mubr.f32.vlgmr.msra.gmra.mrb[0].mxu1 %v654_v34  ;;  %vm606_vm5 = vcmp.gt.f32.partialorder %v5329_v26, 0.0 }
 0x21b   : > { %v422_v36 = vpop.xlane.xlu0 %421  ;;  %v4368_v47 = vpop.eup %4367  ;;  %v538_v50 = vadd.f32 1e-05, %v512_v32  ;;  %v487_v51 = vmul.f32 0.0078125, %v472_v22  ;;  %v3449_v59 = vadd.f32 -1.0, %v4366_v62  ;;  %3811 = vmatprep.mubr.msk.f32.mxu1 %vm4882_vm0, %v4883_v1 }
 0x21c   : > { %v5339_v56 = vmul.f32 0.0078125, %v422_v36  ;;  %4377 = vpow2.f32 %v623_v37  ;;  %v5344_v7 = vadd.f32 %v5277_v2, %v577_v38  ;;  %v561_v13 = vmul.f32 %v4368_v47, %v522_v53 }
 0x21d   : > { %4379 = vrsqrt.f32 %v538_v50  ;;  %v513_v15 = vsub.f32 %v487_v51, %v500_v3  ;;  %v655_v4 = vsel %vm603_vm2, %v5296_v29, %v3449_v59  ;;  %v525_v53 = vsub.f32 %v5226_v28, %v5315_v8 }
 0x21e   : > { %v501_v57 = vmul.f32 %v5339_v56, %v5339_v56  ;;  %v4370_v30 = vpop.eup %4369  ;;  %v474_v63 = vpop.xlane.xlu1 %473  ;;  %v625_v5 = vmul.f32 1.442695, %v5344_v7  ;;  %v578_v43 = vmul.f32 %v5270_v55, %v561_v13  ;;  %3812 = vmatmul.mubr.f32.gmra.mrb[2].mxu1 %v655_v4  ;;  %v526_v8 = vsub.f32 %v5233_v35, %v5326_v24 }
 0x21f   : > { %v424_v45 = vpop.xlane.xlu0 %423  ;;  %v4372_v6 = vpop.eup %4371  ;;  %v539_v10 = vadd.f32 1e-05, %v513_v15  ;;  %v488_v11 = vmul.f32 0.0078125, %v474_v63  ;;  %v3450_v44 = vadd.f32 -1.0, %v4370_v30  ;;  %3814 = vmatprep.mubr.msk.f32.mxu1 %vm4882_vm0, %v4883_v1  ;;  %vm607_vm6 = vcmp.gt.f32.partialorder %v5344_v7, 0.0 }
 0x220   : > { %v5354_v61 = vmul.f32 0.0078125, %v424_v45  ;;  %4381 = vpow2.f32 %v625_v5  ;;  %v5359_v14 = vadd.f32 %v5277_v2, %v578_v43  ;;  %v562_v27 = vmul.f32 %v4372_v6, %v523_v60 }
 0x221   : > { %4383 = vrsqrt.f32 %v539_v10  ;;  %v514_v29 = vsub.f32 %v488_v11, %v501_v57  ;;  %v656_v12 = vsel %vm604_vm3, %v5307_v54, %v3450_v44  ;;  %v527_v35 = vsub.f32 %v5240_v49, %v5339_v56 }
 0x222   : > { %v502_v16 = vmul.f32 %v5354_v61, %v5354_v61  ;;  %v4374_v17 = vpop.eup %4373  ;;  %v476_v48 = vpop.xlane.xlu1 %475  ;;  %v627_v19 = vmul.f32 1.442695, %v5359_v14  ;;  %v579_v20 = vmul.f32 %v5270_v55, %v562_v27  ;;  %3815 = vmatmul.mubr.f32.gmra.mrb[4].mxu1 %v656_v12  ;;  %vm608_vm7 = vcmp.gt.f32.partialorder %v5359_v14, 0.0 }
 0x223   : > { %v4376_v23 = vpop.eup %4375  ;;  %v540_v25 = vadd.f32 1e-05, %v514_v29  ;;  %v489_v31 = vmul.f32 0.0078125, %v476_v48  ;;  %v3451_v32 = vadd.f32 -1.0, %v4374_v17  ;;  %3817 = vmatprep.mubr.msk.f32.mxu1 %vm4882_vm0, %v4883_v1  ;;  %v528_v49 = vsub.f32 %v5247_v58, %v5354_v61 }
 0x224   : > { %4385 = vpow2.f32 %v627_v19  ;;  %v596_v21 = vadd.f32 %v5277_v2, %v579_v20  ;;  %v563_v52 = vmul.f32 %v4376_v23, %v524_v18 }
 0x225   : > { %4387 = vrsqrt.f32 %v540_v25  ;;  %v515_v54 = vsub.f32 %v489_v31, %v502_v16  ;;  %v657_v3 = vsel %vm605_vm4, %v5318_v9, %v3451_v32 }
 0x226   : > { %v4378_v62 = vpop.eup %4377  ;;  %v629_v22 = vmul.f32 1.442695, %v596_v21  ;;  %v580_v34 = vmul.f32 %v5270_v55, %v563_v52  ;;  %3818 = vmatmul.mubr.f32.gmra.mrb[6].mxu1 %v657_v3  ;;  %vm609_vm8 = vcmp.gt.f32.partialorder %v596_v21, 0.0 }
 0x227   : > { %v4380_v36 = vpop.eup %4379  ;;  %v541_v37 = vadd.f32 1e-05, %v515_v54  ;;  %v3452_v38 = vadd.f32 -1.0, %v4378_v62  ;;  %3820 = vmatprep.mubr.msk.f32.mxu1 %vm4882_vm0, %v4883_v1  ;;  %v1085_v62 = vld [vmem:[#allocation5 + $0x100] sm:$0xff] }
 0x228   : > { %4389 = vpow2.f32 %v629_v22  ;;  %v597_v47 = vadd.f32 %v5277_v2, %v580_v34  ;;  %v564_v9 = vmul.f32 %v4380_v36, %v525_v53  ;;  %v1086_v53 = vld [vmem:[#allocation5 + $0x108] sm:$0xff]  ;;  %v1087_v22 = vld [vmem:[#allocation5 + $0x110] sm:$0xff]  ;;  %v1088_v36 = vld [vmem:[#allocation5 + $0x118] sm:$0xff] }
 0x229   : > { %4391 = vrsqrt.f32 %v541_v37  ;;  %v658_v50 = vsel %vm606_vm5, %v5329_v26, %v3452_v38  ;;  %v4180_v34 = vpack.c.bf16 %v1086_v53, %v1085_v62  ;;  %v4183_v37 = vpack.c.bf16 %v1088_v36, %v1087_v22 }
 0x22a   : > { %v4382_v28 = vpop.eup %4381  ;;  %v631_v51 = vmul.f32 1.442695, %v597_v47  ;;  %v581_v59 = vmul.f32 %v5270_v55, %v564_v9  ;;  %3821 = vmatmul.mubr.f32.gmra.mrb[8].mxu1 %v658_v50  ;;  %vm610_vm9 = vcmp.gt.f32.partialorder %v597_v47, 0.0  ;;  %v685_v38 = vsub.s32 3, %v5158_v40 }
 0x22b   : > { %v4384_v13 = vpop.eup %4383  ;;  %v3453_v15 = vadd.f32 -1.0, %v4382_v28  ;;  %3823 = vmatprep.mubr.msk.f32.mxu1 %vm4882_vm0, %v4883_v1  ;;  %4181 = vmatpush3.bf16.msra.mxu0 %v4180_v34 }
 0x22c   : > { %4393 = vpow2.f32 %v631_v51  ;;  %v598_v57 = vadd.f32 %v5277_v2, %v581_v59  ;;  %v565_v30 = vmul.f32 %v4384_v13, %v526_v8  ;;  %4182 = vmatprep.subr.bf16.mxu0 %v4881_v0 }
 0x22d   : > { %v659_v26 = vsel %vm607_vm6, %v5344_v7, %v3453_v15 }
 0x22e   : > { %v4386_v60 = vpop.eup %4385  ;;  %v633_v24 = vmul.f32 1.442695, %v598_v57  ;;  %v582_v63 = vmul.f32 %v5270_v55, %v565_v30  ;;  %3824 = vmatmul.mubr.f32.gmra.mrb[10].mxu1 %v659_v26  ;;  %vm611_vm10 = vcmp.gt.f32.partialorder %v598_v57, 0.0 }
 0x22f   : > { %v4388_v4 = vpop.eup %4387  ;;  %v3454_v45 = vadd.f32 -1.0, %v4386_v60  ;;  %3826 = vmatprep.mubr.msk.f32.mxu1 %vm4882_vm0, %v4883_v1  ;;  %4184 = vmatpush3.bf16.msra.mxu0 %v4183_v37  ;;  %v1095_v37 = vld [vmem:[#allocation5 + $0x150] sm:$0xff] }
 0x230   : > { %4395 = vpow2.f32 %v633_v24  ;;  %v599_v5 = vadd.f32 %v5277_v2, %v582_v63  ;;  %v566_v43 = vmul.f32 %v4388_v4, %v527_v35  ;;  %4185 = vmatprep.subr.bf16.mxu0 %v4881_v0 }
 0x231   : > { %v660_v7 = vsel %vm608_vm7, %v5359_v14, %v3454_v45 }
 0x232   : > { %v4390_v6 = vpop.eup %4389  ;;  %v635_v56 = vmul.f32 1.442695, %v599_v5  ;;  %v583_v10 = vmul.f32 %v5270_v55, %v566_v43  ;;  %3827 = vmatmul.mubr.f32.gmra.mrb[12].mxu1 %v660_v7  ;;  %vm612_vm11 = vcmp.gt.f32.partialorder %v599_v5, 0.0 }
 0x233   : > { %v4392_v11 = vpop.eup %4391  ;;  %v3455_v44 = vadd.f32 -1.0, %v4390_v6  ;;  %3829 = vmatprep.mubr.msk.f32.mxu1 %vm4882_vm0, %v4883_v1 }
 0x234   : > { %4397 = vpow2.f32 %v635_v56  ;;  %v600_v27 = vadd.f32 %v5277_v2, %v583_v10  ;;  %v567_v29 = vmul.f32 %v4392_v11, %v528_v49 }
 0x235   : > { %v661_v16 = vsel %vm609_vm8, %v596_v21, %v3455_v44 }
 0x236   : > { %v4394_v14 = vpop.eup %4393  ;;  %v637_v17 = vmul.f32 1.442695, %v600_v27  ;;  %v584_v18 = vmul.f32 %v5270_v55, %v567_v29  ;;  %3830 = vmatmul.mubr.f32.gmra.mrb[14].mxu1 %v661_v16  ;;  %vm613_vm12 = vcmp.gt.f32.partialorder %v600_v27, 0.0  ;;  %v1090_v29 = vld [vmem:[#allocation5 + $0x128] sm:$0xff] }
 0x237   : > { %v3456_v58 = vadd.f32 -1.0, %v4394_v14  ;;  %3832 = vmatprep.mubr.msk.f32.mxu1 %vm4882_vm0, %v4883_v1 }
 0x238   : > { %4399 = vpow2.f32 %v637_v17  ;;  %v601_v61 = vadd.f32 %v5277_v2, %v584_v18 }
 0x239   : > { %v662_v48 = vsel %vm610_vm9, %v597_v47, %v3456_v58  ;;  %v5424_v47 = vrot.slane %v5163_v42, %v685_v38 }
 0x23a   : > { %v4396_v12 = vpop.eup %4395  ;;  %v639_v19 = vmul.f32 1.442695, %v601_v61  ;;  %3833 = vmatmul.mubr.f32.gmra.mrb[16].mxu1 %v662_v48  ;;  %vm614_vm13 = vcmp.gt.f32.partialorder %v601_v61, 0.0  ;;  %v1092_v48 = vld [vmem:[#allocation5 + $0x138] sm:$0xff] }
 0x23b   : > { %v3457_v20 = vadd.f32 -1.0, %v4396_v12  ;;  %3835 = vmatprep.mubr.msk.f32.mxu1 %vm4882_vm0, %v4883_v1 }
 0x23c   : > { %4401 = vpow2.f32 %v639_v19 }
 0x23d   : > { %v663_v55 = vsel %vm611_vm10, %v598_v57, %v3457_v20 }
 0x23e   : > { %v4398_v23 = vpop.eup %4397  ;;  %3836 = vmatmul.mubr.f32.gmra.mrb[18].mxu1 %v663_v55 }
 0x23f   : > { %v3458_v25 = vadd.f32 -1.0, %v4398_v23  ;;  %3838 = vmatprep.mubr.msk.f32.mxu1 %vm4882_vm0, %v4883_v1 }
 0x241   : > { %v664_v31 = vsel %vm612_vm11, %v599_v5, %v3458_v25 }
 0x242   : > { %v4400_v2 = vpop.eup %4399  ;;  %3839 = vmatmul.mubr.f32.gmra.mrb[20].mxu1 %v664_v31 }
 0x243   : > { %v3459_v32 = vadd.f32 -1.0, %v4400_v2  ;;  %3841 = vmatprep.mubr.msk.f32.mxu1 %vm4882_vm0, %v4883_v1 }
 0x245   : > { %v665_v21 = vsel %vm613_vm12, %v600_v27, %v3459_v32  ;;  %v1089_v27 = vld [vmem:[#allocation5 + $0x120] sm:$0xff] }
 0x246   : > { %v4402_v52 = vpop.eup %4401  ;;  %3842 = vmatmul.mubr.f32.gmra.mrb[22].mxu1 %v665_v21  ;;  %v4186_v16 = vpack.c.bf16 %v1090_v29, %v1089_v27  ;;  %v1093_v21 = vld [vmem:[#allocation5 + $0x140] sm:$0xff] }
 0x247   : > { %v3460_v54 = vadd.f32 -1.0, %v4402_v52  ;;  %3844 = vmatprep.mubr.msk.f32.mxu1 %vm4882_vm0, %v4883_v1  ;;  %v1094_v52 = vld [vmem:[#allocation5 + $0x148] sm:$0xff] }
 0x248   : > { %4187 = vmatpush3.bf16.msra.mxu0 %v4186_v16 }
 0x249   : > { %v666_v3 = vsel %vm614_vm13, %v601_v61, %v3460_v54  ;;  %4188 = vmatprep.subr.bf16.mxu0 %v4881_v0  ;;  %v1091_v61 = vld [vmem:[#allocation5 + $0x130] sm:$0xff]  ;;  %v4192_v54 = vpack.c.bf16 %v1094_v52, %v1093_v21 }
 0x24a   : > { %3845 = vmatmul.mubr.f32.gmra.mrb[24].mxu1 %v666_v3  ;;  %v4189_v12 = vpack.c.bf16 %v1092_v48, %v1091_v61 }
 0x24b   : > { %3950 = vmatprep.mubr.msk.f32.mxu1 %vm4882_vm0, %v4883_v1 }
 0x24c   : > { %4190 = vmatpush3.bf16.msra.mxu0 %v4189_v12 }
 0x24d   : > { %4191 = vmatprep.subr.bf16.mxu0 %v4881_v0 }
 0x250   : > { %4193 = vmatpush3.bf16.msra.mxu0 %v4192_v54  ;;  %v988_v54 = vsub.s32 4, %v5158_v40 }
 0x251   : > { %4194 = vmatprep.subr.bf16.mxu0 %v4881_v0 }
 0x2ed   : > { %v753_v9 = vpop.f32.mrb[0].mxu1 }
 0x2ee   : > { %v5427_v50 = vadd.f32 %v753_v9, %v5424_v47  ;;  %v3810_v28 = vpop.f32.mrb[1].mxu1  ;;  %v1096_v9 = vld [vmem:[#allocation5 + $0x158] sm:$0xff] }
 0x2f0   : > { %817 = vadd.xlane.f32.xlu0 %v5427_v50  ;;  %v856_v8 = vmul.f32 %v5427_v50, %v5427_v50 }
 0x2f1   : > { %v758_v51 = vpop.f32.mrb[2].mxu1 }
 0x2f2   : > { %v5433_v59 = vadd.f32 %v758_v51, %v5424_v47  ;;  %869 = vadd.xlane.f32.xlu1 %v856_v8  ;;  %v3813_v13 = vpop.f32.mrb[3].mxu1  ;;  %v4195_v51 = vpack.c.bf16 %v1096_v9, %v1095_v37 }
 0x2f4   : > { %819 = vadd.xlane.f32.xlu0 %v5433_v59  ;;  %v857_v42 = vmul.f32 %v5433_v59, %v5433_v59  ;;  %4196 = vmatpush3.bf16.msra.mxu0 %v4195_v51 }
 0x2f5   : > { %v763_v15 = vpop.f32.mrb[4].mxu1  ;;  %4197 = vmatprep.subr.bf16.mxu0 %v4881_v0 }
 0x2f6   : > { %v5439_v57 = vadd.f32 %v763_v15, %v5424_v47  ;;  %871 = vadd.xlane.f32.xlu1 %v857_v42  ;;  %v3816_v30 = vpop.f32.mrb[5].mxu1  ;;  %v1097_v15 = vld [vmem:[#allocation5 + $0x160] sm:$0xff] }
 0x2f7   : > { %v1098_v30 = vld [vmem:[#allocation5 + $0x168] sm:$0xff] }
 0x2f8   : > { %821 = vadd.xlane.f32.xlu0 %v5439_v57  ;;  %v858_v26 = vmul.f32 %v5439_v57, %v5439_v57 }
 0x2f9   : > { %v768_v60 = vpop.f32.mrb[6].mxu1 }
 0x2fa   : > { %v5445_v35 = vadd.f32 %v768_v60, %v5424_v47  ;;  %873 = vadd.xlane.f32.xlu1 %v858_v26  ;;  %v3819_v24 = vpop.f32.mrb[7].mxu1 }
 0x2fb   : > { %v4198_v24 = vpack.c.bf16 %v1098_v30, %v1097_v15 }
 0x2fc   : > { %823 = vadd.xlane.f32.xlu0 %v5445_v35  ;;  %v859_v63 = vmul.f32 %v5445_v35, %v5445_v35 }
 0x2fd   : > { %v773_v4 = vpop.f32.mrb[8].mxu1  ;;  %4199 = vmatpush3.bf16.msra.mxu0 %v4198_v24 }
 0x2fe   : > { %v5451_v45 = vadd.f32 %v773_v4, %v5424_v47  ;;  %875 = vadd.xlane.f32.xlu1 %v859_v63  ;;  %v3822_v5 = vpop.f32.mrb[9].mxu1  ;;  %4200 = vmatprep.subr.bf16.mxu0 %v4881_v0  ;;  %v1099_v4 = vld [vmem:[#allocation5 + $0x170] sm:$0xff] }
 0x2ff   : > { %v1100_v5 = vld [vmem:[#allocation5 + $0x178] sm:$0xff] }
 0x300   : > { %825 = vadd.xlane.f32.xlu0 %v5451_v45  ;;  %v860_v43 = vmul.f32 %v5451_v45, %v5451_v45 }
 0x301   : > { %v778_v7 = vpop.f32.mrb[10].mxu1 }
 0x302   : > { %v5457_v6 = vadd.f32 %v778_v7, %v5424_v47  ;;  %877 = vadd.xlane.f32.xlu1 %v860_v43  ;;  %v3825_v49 = vpop.f32.mrb[11].mxu1  ;;  %v4201_v43 = vpack.c.bf16 %v1100_v5, %v1099_v4 }
 0x304   : > { %827 = vadd.xlane.f32.xlu0 %v5457_v6  ;;  %v861_v56 = vmul.f32 %v5457_v6, %v5457_v6  ;;  %4202 = vmatpush3.bf16.msra.mxu0 %v4201_v43 }
 0x305   : > { %v783_v10 = vpop.f32.mrb[12].mxu1  ;;  %4227 = vmatprep.subr.bf16.mxu0 %v4881_v0 }
 0x306   : > { %v5463_v11 = vadd.f32 %v783_v10, %v5424_v47  ;;  %879 = vadd.xlane.f32.xlu1 %v861_v56  ;;  %v3828_v44 = vpop.f32.mrb[13].mxu1 }
 0x308   : > { %829 = vadd.xlane.f32.xlu0 %v5463_v11  ;;  %v862_v14 = vmul.f32 %v5463_v11, %v5463_v11 }
 0x309   : > { %v788_v17 = vpop.f32.mrb[14].mxu1 }
 0x30a   : > { %v5469_v18 = vadd.f32 %v788_v17, %v5424_v47  ;;  %881 = vadd.xlane.f32.xlu1 %v862_v14  ;;  %v3831_v58 = vpop.f32.mrb[15].mxu1 }
 0x30c   : > { %831 = vadd.xlane.f32.xlu0 %v5469_v18  ;;  %v863_v19 = vmul.f32 %v5469_v18, %v5469_v18 }
 0x30d   : > { %v793_v20 = vpop.f32.mrb[16].mxu1 }
 0x30e   : > { %v5476_v55 = vadd.f32 %v793_v20, %v5424_v47  ;;  %883 = vadd.xlane.f32.xlu1 %v863_v19  ;;  %v3834_v23 = vpop.f32.mrb[17].mxu1 }
 0x310   : > { %833 = vadd.xlane.f32.xlu0 %v5476_v55  ;;  %v864_v25 = vmul.f32 %v5476_v55, %v5476_v55 }
 0x311   : > { %v798_v31 = vpop.f32.mrb[18].mxu1 }
 0x312   : > { %v5483_v2 = vadd.f32 %v798_v31, %v5424_v47  ;;  %885 = vadd.xlane.f32.xlu1 %v864_v25  ;;  %v3837_v32 = vpop.f32.mrb[19].mxu1 }
 0x314   : > { %835 = vadd.xlane.f32.xlu0 %v5483_v2  ;;  %v865_v3 = vmul.f32 %v5483_v2, %v5483_v2 }
 0x315   : > { %v803_v62 = vpop.f32.mrb[20].mxu1 }
 0x316   : > { %v5489_v53 = vadd.f32 %v803_v62, %v5424_v47  ;;  %887 = vadd.xlane.f32.xlu1 %v865_v3  ;;  %v3840_v22 = vpop.f32.mrb[21].mxu1 }
 0x318   : > { %837 = vadd.xlane.f32.xlu0 %v5489_v53  ;;  %v866_v34 = vmul.f32 %v5489_v53, %v5489_v53 }
 0x319   : > { %v808_v36 = vpop.f32.mrb[22].mxu1 }
 0x31a   : > { %v5496_v28 = vadd.f32 %v808_v36, %v5424_v47  ;;  %889 = vadd.xlane.f32.xlu1 %v866_v34  ;;  %v3843_v8 = vpop.f32.mrb[23].mxu1  ;;  %v1005_v36 = vsub.s32 5, %v5158_v40 }
 0x31c   : > { %839 = vadd.xlane.f32.xlu0 %v5496_v28  ;;  %v867_v13 = vmul.f32 %v5496_v28, %v5496_v28 }
 0x31d   : > { %v813_v42 = vpop.f32.mrb[24].mxu1 }
 0x31e   : > { %v5503_v26 = vadd.f32 %v813_v42, %v5424_v47  ;;  %891 = vadd.xlane.f32.xlu1 %v867_v13  ;;  %v3846_v60 = vpop.f32.mrb[25].mxu1  ;;  %v5519_v13 = vld [vmem:[#allocation7] sm:$0xff] }
 0x31f   : > { %v5524_v42 = vrot.slane %v5519_v13, %v988_v54 }
 0x320   : > { %841 = vadd.xlane.f32.xlu0 %v5503_v26  ;;  %v868_v63 = vmul.f32 %v5503_v26, %v5503_v26 }
 0x322   : > { %893 = vadd.xlane.f32.xlu1 %v868_v63 }
 0x37d   : > { %v818_v47 = vpop.xlane.xlu0 %817 }
 0x37e   : > { %v843_v7 = vmul.f32 0.0078125, %v818_v47 }
 0x37f   : > { %v870_v49 = vpop.xlane.xlu1 %869 }
 0x380   : > { %v908_v56 = vmul.f32 %v843_v7, %v843_v7  ;;  %v895_v10 = vmul.f32 0.0078125, %v870_v49  ;;  %v934_v8 = vsub.f32 %v5427_v50, %v843_v7  ;;  %v5531_v50 = vrot.slane %v5519_v13, %v1005_v36 }
 0x381   : > { %v820_v44 = vpop.xlane.xlu0 %819 }
 0x382   : > { %v921_v27 = vsub.f32 %v895_v10, %v908_v56  ;;  %v844_v29 = vmul.f32 0.0078125, %v820_v44 }
 0x383   : > { %v872_v16 = vpop.xlane.xlu1 %871 }
 0x384   : > { %v947_v14 = vadd.f32 1e-05, %v921_v27  ;;  %v909_v17 = vmul.f32 %v844_v29, %v844_v29  ;;  %v896_v58 = vmul.f32 0.0078125, %v872_v16  ;;  %v935_v47 = vsub.f32 %v5433_v59, %v844_v29 }
 0x385   : > { %v822_v61 = vpop.xlane.xlu0 %821 }
 0x386   : > { %4403 = vrsqrt.f32 %v947_v14  ;;  %v922_v48 = vsub.f32 %v896_v58, %v909_v17  ;;  %v845_v12 = vmul.f32 0.0078125, %v822_v61 }
 0x387   : > { %v874_v19 = vpop.xlane.xlu1 %873 }
 0x388   : > { %v948_v20 = vadd.f32 1e-05, %v922_v48  ;;  %v910_v23 = vmul.f32 %v845_v12, %v845_v12  ;;  %v897_v25 = vmul.f32 0.0078125, %v874_v19  ;;  %v936_v59 = vsub.f32 %v5439_v57, %v845_v12 }
 0x389   : > { %v824_v31 = vpop.xlane.xlu0 %823 }
 0x38a   : > { %4405 = vrsqrt.f32 %v948_v20  ;;  %v923_v32 = vsub.f32 %v897_v25, %v910_v23  ;;  %v5510_v21 = vmul.f32 0.0078125, %v824_v31 }
 0x38b   : > { %v876_v52 = vpop.xlane.xlu1 %875 }
 0x38c   : > { %v949_v3 = vadd.f32 1e-05, %v923_v32  ;;  %v911_v62 = vmul.f32 %v5510_v21, %v5510_v21  ;;  %v898_v22 = vmul.f32 0.0078125, %v876_v52  ;;  %v937_v12 = vsub.f32 %v5445_v35, %v5510_v21 }
 0x38d   : > { %v826_v34 = vpop.xlane.xlu0 %825 }
 0x38e   : > { %4407 = vrsqrt.f32 %v949_v3  ;;  %v924_v37 = vsub.f32 %v898_v22, %v911_v62  ;;  %v5516_v9 = vmul.f32 0.0078125, %v826_v34 }
 0x38f   : > { %v878_v51 = vpop.xlane.xlu1 %877 }
 0x390   : > { %v4404_v15 = vpop.eup %4403  ;;  %v950_v30 = vadd.f32 1e-05, %v924_v37  ;;  %v912_v60 = vmul.f32 %v5516_v9, %v5516_v9  ;;  %v899_v24 = vmul.f32 0.0078125, %v878_v51  ;;  %v938_v21 = vsub.f32 %v5451_v45, %v5516_v9 }
 0x391   : > { %v828_v63 = vpop.xlane.xlu0 %827  ;;  %v973_v4 = vmul.f32 %v4404_v15, %v934_v8 }
 0x392   : > { %4409 = vrsqrt.f32 %v950_v30  ;;  %v925_v5 = vsub.f32 %v899_v24, %v912_v60  ;;  %v5533_v43 = vmul.f32 0.0078125, %v828_v63 }
 0x393   : > { %v880_v7 = vpop.xlane.xlu1 %879  ;;  %v990_v49 = vmul.f32 %v5524_v42, %v973_v4 }
 0x394   : > { %v4406_v56 = vpop.eup %4405  ;;  %v951_v10 = vadd.f32 1e-05, %v925_v5  ;;  %v913_v44 = vmul.f32 %v5533_v43, %v5533_v43  ;;  %v900_v27 = vmul.f32 0.0078125, %v880_v7 }
 0x395   : > { %v830_v16 = vpop.xlane.xlu0 %829  ;;  %v5540_v14 = vadd.f32 %v5531_v50, %v990_v49  ;;  %v974_v17 = vmul.f32 %v4406_v56, %v935_v47 }
 0x396   : > { %4411 = vrsqrt.f32 %v951_v10  ;;  %v926_v58 = vsub.f32 %v900_v27, %v913_v44  ;;  %v5542_v61 = vmul.f32 0.0078125, %v830_v16 }
 0x397   : > { %v882_v29 = vpop.xlane.xlu1 %881  ;;  %v1033_v48 = vmul.f32 1.442695, %v5540_v14  ;;  %v991_v19 = vmul.f32 %v5524_v42, %v974_v17  ;;  %vm1020_vm14 = vcmp.gt.f32.partialorder %v5540_v14, 0.0 }
 0x398   : > { %v4408_v20 = vpop.eup %4407  ;;  %v952_v23 = vadd.f32 1e-05, %v926_v58  ;;  %v914_v25 = vmul.f32 %v5542_v61, %v5542_v61  ;;  %v901_v31 = vmul.f32 0.0078125, %v882_v29 }
 0x399   : > { %v832_v32 = vpop.xlane.xlu0 %831  ;;  %4413 = vpow2.f32 %v1033_v48  ;;  %v5550_v52 = vadd.f32 %v5531_v50, %v991_v19  ;;  %v975_v3 = vmul.f32 %v4408_v20, %v936_v59  ;;  %v939_v59 = vsub.f32 %v5457_v6, %v5533_v43 }
 0x39a   : > { %4415 = vrsqrt.f32 %v952_v23  ;;  %v927_v62 = vsub.f32 %v901_v31, %v914_v25  ;;  %v5552_v57 = vmul.f32 0.0078125, %v832_v32 }
 0x39b   : > { %v884_v22 = vpop.xlane.xlu1 %883  ;;  %v1035_v34 = vmul.f32 1.442695, %v5550_v52  ;;  %v992_v37 = vmul.f32 %v5524_v42, %v975_v3  ;;  %vm1021_vm15 = vcmp.gt.f32.partialorder %v5550_v52, 0.0 }
 0x39c   : > { %v4410_v8 = vpop.eup %4409  ;;  %v953_v51 = vadd.f32 1e-05, %v927_v62  ;;  %v915_v15 = vmul.f32 %v5552_v57, %v5552_v57  ;;  %v902_v30 = vmul.f32 0.0078125, %v884_v22 }
 0x39d   : > { %v834_v60 = vpop.xlane.xlu0 %833  ;;  %4417 = vpow2.f32 %v1035_v34  ;;  %v5561_v24 = vadd.f32 %v5531_v50, %v992_v37  ;;  %v976_v63 = vmul.f32 %v4410_v8, %v937_v12  ;;  %v940_v34 = vsub.f32 %v5463_v11, %v5542_v61 }
 0x39e   : > { %4419 = vrsqrt.f32 %v953_v51  ;;  %v928_v4 = vsub.f32 %v902_v30, %v915_v15  ;;  %v5563_v35 = vmul.f32 0.0078125, %v834_v60 }
 0x39f   : > { %v886_v5 = vpop.xlane.xlu1 %885  ;;  %v1037_v47 = vmul.f32 1.442695, %v5561_v24  ;;  %v993_v7 = vmul.f32 %v5524_v42, %v976_v63  ;;  %vm1022_vm1 = vcmp.gt.f32.partialorder %v5561_v24, 0.0 }
 0x3a0   : > { %v4412_v49 = vpop.eup %4411  ;;  %v954_v56 = vadd.f32 1e-05, %v928_v4  ;;  %v916_v10 = vmul.f32 %v5563_v35, %v5563_v35  ;;  %v903_v44 = vmul.f32 0.0078125, %v886_v5 }
 0x3a1   : > { %v836_v27 = vpop.xlane.xlu0 %835  ;;  %4421 = vpow2.f32 %v1037_v47  ;;  %v5572_v16 = vadd.f32 %v5531_v50, %v993_v7  ;;  %v977_v17 = vmul.f32 %v4412_v49, %v938_v21  ;;  %v941_v49 = vsub.f32 %v5469_v18, %v5552_v57 }
 0x3a2   : > { %4423 = vrsqrt.f32 %v954_v56  ;;  %v929_v58 = vsub.f32 %v903_v44, %v916_v10  ;;  %v5574_v45 = vmul.f32 0.0078125, %v836_v27 }
 0x3a3   : > { %v4414_v9 = vpop.eup %4413  ;;  %v888_v29 = vpop.xlane.xlu1 %887  ;;  %v1039_v48 = vmul.f32 1.442695, %v5572_v16  ;;  %v994_v19 = vmul.f32 %v5524_v42, %v977_v17  ;;  %vm1023_vm2 = vcmp.gt.f32.partialorder %v5572_v16, 0.0 }
 0x3a4   : > { %v4416_v20 = vpop.eup %4415  ;;  %v955_v23 = vadd.f32 1e-05, %v929_v58  ;;  %v917_v25 = vmul.f32 %v5574_v45, %v5574_v45  ;;  %v904_v31 = vmul.f32 0.0078125, %v888_v29  ;;  %v3461_v3 = vadd.f32 -1.0, %v4414_v9 }
 0x3a5   : > { %v838_v32 = vpop.xlane.xlu0 %837  ;;  %4425 = vpow2.f32 %v1039_v48  ;;  %v5583_v62 = vadd.f32 %v5531_v50, %v994_v19  ;;  %v978_v12 = vmul.f32 %v4416_v20, %v939_v59 }
 0x3a6   : > { %4427 = vrsqrt.f32 %v955_v23  ;;  %v930_v6 = vsub.f32 %v904_v31, %v917_v25  ;;  %v5585_v43 = vmul.f32 0.0078125, %v838_v32  ;;  %v1072_v8 = vsel %vm1020_vm14, %v5540_v14, %v3461_v3 }
 0x3a7   : > { %v4418_v22 = vpop.eup %4417  ;;  %v890_v37 = vpop.xlane.xlu1 %889  ;;  %v1041_v51 = vmul.f32 1.442695, %v5583_v62  ;;  %v995_v15 = vmul.f32 %v5524_v42, %v978_v12  ;;  %3880 = vmatmul.mubr.f32.vlgmr.msra.gmra.mrb[26].mxu0 %v1072_v8  ;;  %v942_v23 = vsub.f32 %v5476_v55, %v5563_v35  ;;  %vm1024_vm3 = vcmp.gt.f32.partialorder %v5583_v62, 0.0 }
 0x3a8   : > { %v4420_v30 = vpop.eup %4419  ;;  %v956_v60 = vadd.f32 1e-05, %v930_v6  ;;  %v918_v63 = vmul.f32 %v5585_v43, %v5585_v43  ;;  %v905_v4 = vmul.f32 0.0078125, %v890_v37  ;;  %3882 = vmatprep.mubr.msk.f32.mxu0 %vm4882_vm0, %v4883_v1  ;;  %v3462_v5 = vadd.f32 -1.0, %v4418_v22 }
 0x3a9   : > { %v840_v21 = vpop.xlane.xlu0 %839  ;;  %4429 = vpow2.f32 %v1041_v51  ;;  %v5598_v11 = vadd.f32 %v5531_v50, %v995_v15  ;;  %v979_v14 = vmul.f32 %v4420_v30, %v940_v34  ;;  %v943_v51 = vsub.f32 %v5483_v2, %v5574_v45 }
 0x3aa   : > { %4431 = vrsqrt.f32 %v956_v60  ;;  %v931_v61 = vsub.f32 %v905_v4, %v918_v63  ;;  %v5600_v47 = vmul.f32 0.0078125, %v840_v21  ;;  %v1073_v10 = vsel %vm1021_vm15, %v5550_v52, %v3462_v5 }
 0x3ab   : > { %v4422_v7 = vpop.eup %4421  ;;  %v892_v56 = vpop.xlane.xlu1 %891  ;;  %v1043_v44 = vmul.f32 1.442695, %v5598_v11  ;;  %v996_v27 = vmul.f32 %v5524_v42, %v979_v14  ;;  %3883 = vmatmul.mubr.f32.gmra.mrb[28].mxu0 %v1073_v10  ;;  %v944_v45 = vsub.f32 %v5489_v53, %v5585_v43  ;;  %vm1025_vm4 = vcmp.gt.f32.partialorder %v5598_v11, 0.0 }
 0x3ac   : > { %v4424_v17 = vpop.eup %4423  ;;  %v957_v58 = vadd.f32 1e-05, %v931_v61  ;;  %v919_v9 = vmul.f32 %v5600_v47, %v5600_v47  ;;  %v906_v59 = vmul.f32 0.0078125, %v892_v56  ;;  %3885 = vmatprep.mubr.msk.f32.mxu0 %vm4882_vm0, %v4883_v1  ;;  %v3463_v48 = vadd.f32 -1.0, %v4422_v7 }
 0x3ad   : > { %v842_v29 = vpop.xlane.xlu0 %841  ;;  %4433 = vpow2.f32 %v1043_v44  ;;  %v5613_v18 = vadd.f32 %v5531_v50, %v996_v27  ;;  %v980_v52 = vmul.f32 %v4424_v17, %v941_v49  ;;  %v945_v53 = vsub.f32 %v5496_v28, %v5600_v47 }
 0x3ae   : > { %4435 = vrsqrt.f32 %v957_v58  ;;  %v932_v57 = vsub.f32 %v906_v59, %v919_v9  ;;  %v5615_v19 = vmul.f32 0.0078125, %v842_v29  ;;  %v1074_v31 = vsel %vm1022_vm1, %v5561_v24, %v3463_v48 }
 0x3af   : > { %v4426_v20 = vpop.eup %4425  ;;  %v894_v25 = vpop.xlane.xlu1 %893  ;;  %v1045_v32 = vmul.f32 1.442695, %v5613_v18  ;;  %v997_v3 = vmul.f32 %v5524_v42, %v980_v52  ;;  %3886 = vmatmul.mubr.f32.gmra.mrb[30].mxu0 %v1074_v31  ;;  %vm1026_vm5 = vcmp.gt.f32.partialorder %v5613_v18, 0.0 }
 0x3b0   : > { %v4428_v12 = vpop.eup %4427  ;;  %v958_v6 = vadd.f32 1e-05, %v932_v57  ;;  %v920_v22 = vmul.f32 %v5615_v19, %v5615_v19  ;;  %v907_v34 = vmul.f32 0.0078125, %v894_v25  ;;  %3888 = vmatprep.mubr.msk.f32.mxu0 %vm4882_vm0, %v4883_v1  ;;  %v3464_v37 = vadd.f32 -1.0, %v4426_v20 }
 0x3b1   : > { %4437 = vpow2.f32 %v1045_v32  ;;  %v1014_v55 = vadd.f32 %v5531_v50, %v997_v3  ;;  %v981_v35 = vmul.f32 %v4428_v12, %v942_v23  ;;  %v946_v28 = vsub.f32 %v5503_v26, %v5615_v19 }
 0x3b2   : > { %4439 = vrsqrt.f32 %v958_v6  ;;  %v933_v24 = vsub.f32 %v907_v34, %v920_v22  ;;  %v1075_v15 = vsel %vm1023_vm2, %v5572_v16, %v3464_v37 }
 0x3b3   : > { %v4430_v8 = vpop.eup %4429  ;;  %v1047_v30 = vmul.f32 1.442695, %v1014_v55  ;;  %v998_v60 = vmul.f32 %v5524_v42, %v981_v35  ;;  %3889 = vmatmul.mubr.f32.gmra.mrb[32].mxu0 %v1075_v15  ;;  %vm1027_vm6 = vcmp.gt.f32.partialorder %v1014_v55, 0.0 }
 0x3b4   : > { %v4432_v63 = vpop.eup %4431  ;;  %v959_v4 = vadd.f32 1e-05, %v933_v24  ;;  %v3465_v21 = vadd.f32 -1.0, %v4430_v8  ;;  %3891 = vmatprep.mubr.msk.f32.mxu0 %vm4882_vm0, %v4883_v1 }
 0x3b5   : > { %4441 = vpow2.f32 %v1047_v30  ;;  %v1015_v5 = vadd.f32 %v5531_v50, %v998_v60  ;;  %v982_v14 = vmul.f32 %v4432_v63, %v943_v51  ;;  %v1503_v60 = vld [vmem:[#allocation5 + $0x180] sm:$0xff]  ;;  %v1504_v63 = vld [vmem:[#allocation5 + $0x188] sm:$0xff] }
 0x3b6   : > { %4443 = vrsqrt.f32 %v959_v4  ;;  %v1076_v2 = vsel %vm1024_vm3, %v5583_v62, %v3465_v21  ;;  %v1505_v4 = vld [vmem:[#allocation5 + $0x190] sm:$0xff]  ;;  %v4204_v21 = vpack.c.bf16 %v1504_v63, %v1503_v60  ;;  %v1511_v60 = vld [vmem:[#allocation5 + $0x1c0] sm:$0xff]  ;;  %v1512_v63 = vld [vmem:[#allocation5 + $0x1c8] sm:$0xff] }
 0x3b7   : > { %v4434_v16 = vpop.eup %4433  ;;  %v1049_v61 = vmul.f32 1.442695, %v1015_v5  ;;  %v999_v7 = vmul.f32 %v5524_v42, %v982_v14  ;;  %3892 = vmatmul.mubr.f32.gmra.mrb[34].mxu0 %v1076_v2  ;;  %vm1028_vm7 = vcmp.gt.f32.partialorder %v1015_v5, 0.0  ;;  %v1103_v2 = vsub.s32 6, %v5158_v40 }
 0x3b8   : > { %v4436_v49 = vpop.eup %4435  ;;  %v3466_v56 = vadd.f32 -1.0, %v4434_v16  ;;  %3894 = vmatprep.mubr.msk.f32.mxu0 %vm4882_vm0, %v4883_v1  ;;  %4205 = vmatpush3.bf16.msra.mxu1 %v4204_v21 }
 0x3b9   : > { %4445 = vpow2.f32 %v1049_v61  ;;  %v1016_v10 = vadd.f32 %v5531_v50, %v999_v7  ;;  %v983_v44 = vmul.f32 %v4436_v49, %v944_v45  ;;  %4206 = vmatprep.subr.bf16.mxu1 %v4881_v0  ;;  %v5680_v16 = vrot.slane %v5519_v13, %v1103_v2 }
 0x3ba   : > { %v1077_v62 = vsel %vm1025_vm4, %v5598_v11, %v3466_v56 }
 0x3bb   : > { %v4438_v27 = vpop.eup %4437  ;;  %v1051_v43 = vmul.f32 1.442695, %v1016_v10  ;;  %v1000_v17 = vmul.f32 %v5524_v42, %v983_v44  ;;  %3895 = vmatmul.mubr.f32.gmra.mrb[36].mxu0 %v1077_v62  ;;  %vm1029_vm8 = vcmp.gt.f32.partialorder %v1016_v10, 0.0 }
 0x3bc   : > { %v4440_v58 = vpop.eup %4439  ;;  %v3467_v9 = vadd.f32 -1.0, %v4438_v27  ;;  %3897 = vmatprep.mubr.msk.f32.mxu0 %vm4882_vm0, %v4883_v1 }
 0x3bd   : > { %4447 = vpow2.f32 %v1051_v43  ;;  %v1017_v59 = vadd.f32 %v5531_v50, %v1000_v17  ;;  %v984_v29 = vmul.f32 %v4440_v58, %v945_v53 }
 0x3be   : > { %v1078_v11 = vsel %vm1026_vm5, %v5613_v18, %v3467_v9 }
 0x3bf   : > { %v4442_v48 = vpop.eup %4441  ;;  %v1053_v47 = vmul.f32 1.442695, %v1017_v59  ;;  %v1001_v52 = vmul.f32 %v5524_v42, %v984_v29  ;;  %3898 = vmatmul.mubr.f32.gmra.mrb[38].mxu0 %v1078_v11  ;;  %vm1030_vm9 = vcmp.gt.f32.partialorder %v1017_v59, 0.0 }
 0x3c0   : > { %v4444_v57 = vpop.eup %4443  ;;  %v3468_v20 = vadd.f32 -1.0, %v4442_v48  ;;  %3900 = vmatprep.mubr.msk.f32.mxu0 %vm4882_vm0, %v4883_v1 }
 0x3c1   : > { %4449 = vpow2.f32 %v1053_v47  ;;  %v1018_v23 = vadd.f32 %v5531_v50, %v1001_v52  ;;  %v985_v25 = vmul.f32 %v4444_v57, %v946_v28 }
 0x3c2   : > { %v1079_v31 = vsel %vm1027_vm6, %v1014_v55, %v3468_v20 }
 0x3c3   : > { %v4446_v18 = vpop.eup %4445  ;;  %v1055_v32 = vmul.f32 1.442695, %v1018_v23  ;;  %v1002_v3 = vmul.f32 %v5524_v42, %v985_v25  ;;  %3901 = vmatmul.mubr.f32.gmra.mrb[40].mxu0 %v1079_v31  ;;  %vm1031_vm10 = vcmp.gt.f32.partialorder %v1018_v23, 0.0 }
 0x3c4   : > { %v3469_v26 = vadd.f32 -1.0, %v4446_v18  ;;  %3903 = vmatprep.mubr.msk.f32.mxu0 %vm4882_vm0, %v4883_v1 }
 0x3c5   : > { %4451 = vpow2.f32 %v1055_v32  ;;  %v1019_v19 = vadd.f32 %v5531_v50, %v1002_v3  ;;  %v1507_v32 = vld [vmem:[#allocation5 + $0x1a0] sm:$0xff]  ;;  %v1508_v3 = vld [vmem:[#allocation5 + $0x1a8] sm:$0xff] }
 0x3c6   : > { %v1080_v12 = vsel %vm1028_vm7, %v1015_v5, %v3469_v26  ;;  %v1506_v5 = vld [vmem:[#allocation5 + $0x198] sm:$0xff]  ;;  %v4210_v26 = vpack.c.bf16 %v1508_v3, %v1507_v32 }
 0x3c7   : > { %v4448_v6 = vpop.eup %4447  ;;  %v1057_v22 = vmul.f32 1.442695, %v1019_v19  ;;  %3904 = vmatmul.mubr.f32.gmra.mrb[42].mxu0 %v1080_v12  ;;  %vm1032_vm11 = vcmp.gt.f32.partialorder %v1019_v19, 0.0  ;;  %v4207_v14 = vpack.c.bf16 %v1506_v5, %v1505_v4  ;;  %v4216_v4 = vpack.c.bf16 %v1512_v63, %v1511_v60 }
 0x3c8   : > { %v3470_v34 = vadd.f32 -1.0, %v4448_v6  ;;  %3906 = vmatprep.mubr.msk.f32.mxu0 %vm4882_vm0, %v4883_v1 }
 0x3c9   : > { %4453 = vpow2.f32 %v1057_v22  ;;  %4208 = vmatpush3.bf16.msra.mxu1 %v4207_v14 }
 0x3ca   : > { %v1081_v42 = vsel %vm1029_vm8, %v1016_v10, %v3470_v34  ;;  %4209 = vmatprep.subr.bf16.mxu1 %v4881_v0  ;;  %v1509_v34 = vld [vmem:[#allocation5 + $0x1b0] sm:$0xff] }
 0x3cb   : > { %v4450_v37 = vpop.eup %4449  ;;  %3907 = vmatmul.mubr.f32.gmra.mrb[44].mxu0 %v1081_v42  ;;  %v1510_v42 = vld [vmem:[#allocation5 + $0x1b8] sm:$0xff] }
 0x3cc   : > { %v3471_v55 = vadd.f32 -1.0, %v4450_v37  ;;  %3909 = vmatprep.mubr.msk.f32.mxu0 %vm4882_vm0, %v4883_v1  ;;  %v4213_v37 = vpack.c.bf16 %v1510_v42, %v1509_v34 }
 0x3cd   : > { %4211 = vmatpush3.bf16.msra.mxu1 %v4210_v26 }
 0x3ce   : > { %v1082_v35 = vsel %vm1030_vm9, %v1017_v59, %v3471_v55  ;;  %4212 = vmatprep.subr.bf16.mxu1 %v4881_v0 }
 0x3cf   : > { %v4452_v50 = vpop.eup %4451  ;;  %3910 = vmatmul.mubr.f32.gmra.mrb[46].mxu0 %v1082_v35 }
 0x3d0   : > { %v3472_v24 = vadd.f32 -1.0, %v4452_v50  ;;  %3912 = vmatprep.mubr.msk.f32.mxu0 %vm4882_vm0, %v4883_v1 }
 0x3d1   : > { %4214 = vmatpush3.bf16.msra.mxu1 %v4213_v37 }
 0x3d2   : > { %v1083_v8 = vsel %vm1031_vm10, %v1018_v23, %v3472_v24  ;;  %4215 = vmatprep.subr.bf16.mxu1 %v4881_v0 }
 0x3d3   : > { %v4454_v51 = vpop.eup %4453  ;;  %3913 = vmatmul.mubr.f32.gmra.mrb[48].mxu0 %v1083_v8 }
 0x3d4   : > { %v3473_v15 = vadd.f32 -1.0, %v4454_v51  ;;  %3915 = vmatprep.mubr.msk.f32.mxu0 %vm4882_vm0, %v4883_v1 }
 0x3d5   : > { %4217 = vmatpush3.bf16.msra.mxu1 %v4216_v4 }
 0x3d6   : > { %v1084_v30 = vsel %vm1032_vm11, %v1019_v19, %v3473_v15  ;;  %4218 = vmatprep.subr.bf16.mxu1 %v4881_v0 }
 0x3d7   : > { %3916 = vmatmul.mubr.f32.gmra.mrb[50].mxu0 %v1084_v30 }
 0x3d8   : > { %4021 = vmatprep.mubr.msk.f32.mxu0 %vm4882_vm0, %v4883_v1 }
 0x47a   : > { %v1171_v45 = vpop.f32.mrb[26].mxu0 }
 0x47b   : > { %v5683_v61 = vadd.f32 %v1171_v45, %v5680_v16  ;;  %v3881_v7 = vpop.f32.mrb[27].mxu0 }
 0x47d   : > { %1235 = vadd.xlane.f32.xlu0 %v5683_v61  ;;  %v1274_v49 = vmul.f32 %v5683_v61, %v5683_v61 }
 0x47e   : > { %v1176_v56 = vpop.f32.mrb[28].mxu0 }
 0x47f   : > { %v5689_v10 = vadd.f32 %v1176_v56, %v5680_v16  ;;  %1287 = vadd.xlane.f32.xlu1 %v1274_v49  ;;  %v3884_v44 = vpop.f32.mrb[29].mxu0  ;;  %v1513_v56 = vld [vmem:[#allocation5 + $0x1d0] sm:$0xff] }
 0x480   : > { %v1514_v44 = vld [vmem:[#allocation5 + $0x1d8] sm:$0xff] }
 0x481   : > { %1237 = vadd.xlane.f32.xlu0 %v5689_v10  ;;  %v1275_v62 = vmul.f32 %v5689_v10, %v5689_v10 }
 0x482   : > { %v1181_v27 = vpop.f32.mrb[30].mxu0 }
 0x483   : > { %v5695_v53 = vadd.f32 %v1181_v27, %v5680_v16  ;;  %1289 = vadd.xlane.f32.xlu1 %v1275_v62  ;;  %v3887_v43 = vpop.f32.mrb[31].mxu0 }
 0x484   : > { %v4219_v43 = vpack.c.bf16 %v1514_v44, %v1513_v56 }
 0x485   : > { %1239 = vadd.xlane.f32.xlu0 %v5695_v53  ;;  %v1276_v17 = vmul.f32 %v5695_v53, %v5695_v53 }
 0x486   : > { %v1186_v58 = vpop.f32.mrb[32].mxu0  ;;  %4220 = vmatpush3.bf16.msra.mxu1 %v4219_v43  ;;  %v5771_v43 = vld [vmem:[#allocation7 + $0x8] sm:$0xff] }
 0x487   : > { %v5701_v9 = vadd.f32 %v1186_v58, %v5680_v16  ;;  %1291 = vadd.xlane.f32.xlu1 %v1276_v17  ;;  %v3890_v59 = vpop.f32.mrb[33].mxu0  ;;  %4221 = vmatprep.subr.bf16.mxu1 %v4881_v0 }
 0x488   : > { %v1515_v59 = vld [vmem:[#allocation5 + $0x1e0] sm:$0xff] }
 0x489   : > { %1241 = vadd.xlane.f32.xlu0 %v5701_v9  ;;  %v1277_v29 = vmul.f32 %v5701_v9, %v5701_v9 }
 0x48a   : > { %v1191_v11 = vpop.f32.mrb[34].mxu0 }
 0x48b   : > { %v5707_v48 = vadd.f32 %v1191_v11, %v5680_v16  ;;  %1293 = vadd.xlane.f32.xlu1 %v1277_v29  ;;  %v3893_v28 = vpop.f32.mrb[35].mxu0  ;;  %v1516_v29 = vld [vmem:[#allocation5 + $0x1e8] sm:$0xff] }
 0x48d   : > { %1243 = vadd.xlane.f32.xlu0 %v5707_v48  ;;  %v1278_v47 = vmul.f32 %v5707_v48, %v5707_v48 }
 0x48e   : > { %v1196_v52 = vpop.f32.mrb[36].mxu0 }
 0x48f   : > { %v5713_v57 = vadd.f32 %v1196_v52, %v5680_v16  ;;  %1295 = vadd.xlane.f32.xlu1 %v1278_v47  ;;  %v3896_v20 = vpop.f32.mrb[37].mxu0  ;;  %v4222_v47 = vpack.c.bf16 %v1516_v29, %v1515_v59 }
 0x490   : > { %v1517_v20 = vld [vmem:[#allocation5 + $0x1f0] sm:$0xff] }
 0x491   : > { %1245 = vadd.xlane.f32.xlu0 %v5713_v57  ;;  %v1279_v23 = vmul.f32 %v5713_v57, %v5713_v57  ;;  %4223 = vmatpush3.bf16.msra.mxu1 %v4222_v47 }
 0x492   : > { %v1201_v25 = vpop.f32.mrb[38].mxu0  ;;  %4224 = vmatprep.subr.bf16.mxu1 %v4881_v0 }
 0x493   : > { %v5719_v31 = vadd.f32 %v1201_v25, %v5680_v16  ;;  %1297 = vadd.xlane.f32.xlu1 %v1279_v23  ;;  %v3899_v18 = vpop.f32.mrb[39].mxu0  ;;  %v1518_v23 = vld [vmem:[#allocation5 + $0x1f8] sm:$0xff] }
 0x494   : > { %v4225_v25 = vpack.c.bf16 %v1518_v23, %v1517_v20 }
 0x495   : > { %1247 = vadd.xlane.f32.xlu0 %v5719_v31  ;;  %v1280_v19 = vmul.f32 %v5719_v31, %v5719_v31 }
 0x496   : > { %v1206_v12 = vpop.f32.mrb[40].mxu0  ;;  %4226 = vmatpush3.bf16.msra.mxu1 %v4225_v25  ;;  %v5785_v25 = vrot.slane %v5771_v43, %v5161_v41 }
 0x497   : > { %v5725_v6 = vadd.f32 %v1206_v12, %v5680_v16  ;;  %1299 = vadd.xlane.f32.xlu1 %v1280_v19  ;;  %v3902_v22 = vpop.f32.mrb[41].mxu0  ;;  %4251 = vmatprep.subr.bf16.mxu1 %v4881_v0 }
 0x499   : > { %1249 = vadd.xlane.f32.xlu0 %v5725_v6  ;;  %v1281_v55 = vmul.f32 %v5725_v6, %v5725_v6 }
 0x49a   : > { %v1211_v35 = vpop.f32.mrb[42].mxu0 }
 0x49b   : > { %v5732_v50 = vadd.f32 %v1211_v35, %v5680_v16  ;;  %1301 = vadd.xlane.f32.xlu1 %v1281_v55  ;;  %v3905_v24 = vpop.f32.mrb[43].mxu0 }
 0x49d   : > { %1251 = vadd.xlane.f32.xlu0 %v5732_v50  ;;  %v1282_v8 = vmul.f32 %v5732_v50, %v5732_v50 }
 0x49e   : > { %v1216_v51 = vpop.f32.mrb[44].mxu0 }
 0x49f   : > { %v5739_v15 = vadd.f32 %v1216_v51, %v5680_v16  ;;  %1303 = vadd.xlane.f32.xlu1 %v1282_v8  ;;  %v3908_v30 = vpop.f32.mrb[45].mxu0 }
 0x4a1   : > { %1253 = vadd.xlane.f32.xlu0 %v5739_v15  ;;  %v1283_v21 = vmul.f32 %v5739_v15, %v5739_v15 }
 0x4a2   : > { %v1221_v5 = vpop.f32.mrb[46].mxu0 }
 0x4a3   : > { %v5745_v14 = vadd.f32 %v1221_v5, %v5680_v16  ;;  %1305 = vadd.xlane.f32.xlu1 %v1283_v21  ;;  %v3911_v45 = vpop.f32.mrb[47].mxu0 }
 0x4a5   : > { %1255 = vadd.xlane.f32.xlu0 %v5745_v14  ;;  %v1284_v7 = vmul.f32 %v5745_v14, %v5745_v14 }
 0x4a6   : > { %v1226_v49 = vpop.f32.mrb[48].mxu0 }
 0x4a7   : > { %v5752_v62 = vadd.f32 %v1226_v49, %v5680_v16  ;;  %1307 = vadd.xlane.f32.xlu1 %v1284_v7  ;;  %v3914_v27 = vpop.f32.mrb[49].mxu0  ;;  %v1406_v7 = vsub.s32 7, %v5158_v40 }
 0x4a9   : > { %1257 = vadd.xlane.f32.xlu0 %v5752_v62  ;;  %v1285_v17 = vmul.f32 %v5752_v62, %v5752_v62 }
 0x4aa   : > { %v1231_v58 = vpop.f32.mrb[50].mxu0 }
 0x4ab   : > { %v5759_v11 = vadd.f32 %v1231_v58, %v5680_v16  ;;  %1309 = vadd.xlane.f32.xlu1 %v1285_v17  ;;  %v3917_v28 = vpop.f32.mrb[51].mxu0 }
 0x4ac   : > { %v5779_v28 = vrot.slane %v5519_v13, %v1406_v7 }
 0x4ad   : > { %1259 = vadd.xlane.f32.xlu0 %v5759_v11  ;;  %v1286_v52 = vmul.f32 %v5759_v11, %v5759_v11 }
 0x4af   : > { %1311 = vadd.xlane.f32.xlu1 %v1286_v52 }
 0x50a   : > { %v1236_v16 = vpop.xlane.xlu0 %1235 }
 0x50b   : > { %v1261_v18 = vmul.f32 0.02, %v1236_v16 }
 0x50c   : > { %v1288_v32 = vpop.xlane.xlu1 %1287 }
 0x50d   : > { %v1326_v3 = vmul.f32 %v1261_v18, %v1261_v18  ;;  %v1313_v26 = vmul.f32 0.02, %v1288_v32  ;;  %v1352_v59 = vsub.f32 %v5683_v61, %v1261_v18 }
 0x50e   : > { %v1238_v19 = vpop.xlane.xlu0 %1237 }
 0x50f   : > { %v1339_v12 = vsub.f32 %v1313_v26, %v1326_v3  ;;  %v1262_v22 = vmul.f32 0.02, %v1238_v19 }
 0x510   : > { %v1290_v34 = vpop.xlane.xlu1 %1289 }
 0x511   : > { %v1365_v42 = vadd.f32 1e-05, %v1339_v12  ;;  %v1327_v37 = vmul.f32 %v1262_v22, %v1262_v22  ;;  %v1314_v55 = vmul.f32 0.02, %v1290_v34  ;;  %v1353_v3 = vsub.f32 %v5689_v10, %v1262_v22 }
 0x512   : > { %v1240_v35 = vpop.xlane.xlu0 %1239 }
 0x513   : > { %4455 = vrsqrt.f32 %v1365_v42  ;;  %v1340_v24 = vsub.f32 %v1314_v55, %v1327_v37  ;;  %v1263_v8 = vmul.f32 0.02, %v1240_v35 }
 0x514   : > { %v1292_v51 = vpop.xlane.xlu1 %1291 }
 0x515   : > { %v1366_v30 = vadd.f32 1e-05, %v1340_v24  ;;  %v1328_v60 = vmul.f32 %v1263_v8, %v1263_v8  ;;  %v1315_v63 = vmul.f32 0.02, %v1292_v51  ;;  %v1354_v10 = vsub.f32 %v5695_v53, %v1263_v8 }
 0x516   : > { %v1242_v4 = vpop.xlane.xlu0 %1241 }
 0x517   : > { %4457 = vrsqrt.f32 %v1366_v30  ;;  %v1341_v21 = vsub.f32 %v1315_v63, %v1328_v60  ;;  %v5766_v5 = vmul.f32 0.02, %v1242_v4 }
 0x518   : > { %v1294_v45 = vpop.xlane.xlu1 %1293 }
 0x519   : > { %v1367_v49 = vadd.f32 1e-05, %v1341_v21  ;;  %v1329_v56 = vmul.f32 %v5766_v5, %v5766_v5  ;;  %v1316_v44 = vmul.f32 0.02, %v1294_v45  ;;  %v1355_v8 = vsub.f32 %v5701_v9, %v5766_v5 }
 0x51a   : > { %v1244_v27 = vpop.xlane.xlu0 %1243 }
 0x51b   : > { %4459 = vrsqrt.f32 %v1367_v49  ;;  %v1342_v17 = vsub.f32 %v1316_v44, %v1329_v56  ;;  %v5773_v58 = vmul.f32 0.02, %v1244_v27 }
 0x51c   : > { %v1296_v29 = vpop.xlane.xlu1 %1295 }
 0x51d   : > { %v4456_v47 = vpop.eup %4455  ;;  %v1368_v52 = vadd.f32 1e-05, %v1342_v17  ;;  %v1330_v20 = vmul.f32 %v5773_v58, %v5773_v58  ;;  %v1317_v23 = vmul.f32 0.02, %v1296_v29  ;;  %v1356_v5 = vsub.f32 %v5707_v48, %v5773_v58 }
 0x51e   : > { %v1246_v16 = vpop.xlane.xlu0 %1245  ;;  %v1391_v32 = vmul.f32 %v4456_v47, %v1352_v59 }
 0x51f   : > { %4461 = vrsqrt.f32 %v1368_v52  ;;  %v1343_v61 = vsub.f32 %v1317_v23, %v1330_v20  ;;  %v5787_v18 = vmul.f32 0.02, %v1246_v16 }
 0x520   : > { %v1298_v13 = vpop.xlane.xlu1 %1297  ;;  %v1408_v26 = vmul.f32 %v5779_v28, %v1391_v32 }
 0x521   : > { %v4458_v19 = vpop.eup %4457  ;;  %v1369_v12 = vadd.f32 1e-05, %v1343_v61  ;;  %v1331_v34 = vmul.f32 %v5787_v18, %v5787_v18  ;;  %v1318_v42 = vmul.f32 0.02, %v1298_v13 }
 0x522   : > { %v1248_v37 = vpop.xlane.xlu0 %1247  ;;  %v5794_v55 = vadd.f32 %v5785_v25, %v1408_v26  ;;  %v1392_v35 = vmul.f32 %v4458_v19, %v1353_v3 }
 0x523   : > { %4463 = vrsqrt.f32 %v1369_v12  ;;  %v1344_v24 = vsub.f32 %v1318_v42, %v1331_v34  ;;  %v5796_v51 = vmul.f32 0.02, %v1248_v37 }
 0x524   : > { %v1300_v22 = vpop.xlane.xlu1 %1299  ;;  %v1451_v30 = vmul.f32 1.442695, %v5794_v55  ;;  %v1409_v60 = vmul.f32 %v5779_v28, %v1392_v35  ;;  %vm1438_vm12 = vcmp.gt.f32.partialorder %v5794_v55, 0.0 }
 0x525   : > { %v4460_v63 = vpop.eup %4459  ;;  %v1370_v4 = vadd.f32 1e-05, %v1344_v24  ;;  %v1332_v21 = vmul.f32 %v5796_v51, %v5796_v51  ;;  %v1319_v45 = vmul.f32 0.02, %v1300_v22 }
 0x526   : > { %v1250_v49 = vpop.xlane.xlu0 %1249  ;;  %4465 = vpow2.f32 %v1451_v30  ;;  %v5804_v56 = vadd.f32 %v5785_v25, %v1409_v60  ;;  %v1393_v44 = vmul.f32 %v4460_v63, %v1354_v10  ;;  %v1357_v30 = vsub.f32 %v5713_v57, %v5787_v18 }
 0x527   : > { %4467 = vrsqrt.f32 %v1370_v4  ;;  %v1345_v27 = vsub.f32 %v1319_v45, %v1332_v21  ;;  %v5806_v53 = vmul.f32 0.02, %v1250_v49 }
 0x528   : > { %v1302_v17 = vpop.xlane.xlu1 %1301  ;;  %v1453_v59 = vmul.f32 1.442695, %v5804_v56  ;;  %v1410_v29 = vmul.f32 %v5779_v28, %v1393_v44  ;;  %vm1439_vm13 = vcmp.gt.f32.partialorder %v5804_v56, 0.0 }
 0x529   : > { %v4462_v47 = vpop.eup %4461  ;;  %v1371_v52 = vadd.f32 1e-05, %v1345_v27  ;;  %v1333_v20 = vmul.f32 %v5806_v53, %v5806_v53  ;;  %v1320_v23 = vmul.f32 0.02, %v1302_v17 }
 0x52a   : > { %v1252_v16 = vpop.xlane.xlu0 %1251  ;;  %4469 = vpow2.f32 %v1453_v59  ;;  %v5815_v32 = vadd.f32 %v5785_v25, %v1410_v29  ;;  %v1394_v61 = vmul.f32 %v4462_v47, %v1355_v8  ;;  %v1358_v47 = vsub.f32 %v5719_v31, %v5796_v51 }
 0x52b   : > { %4471 = vrsqrt.f32 %v1371_v52  ;;  %v1346_v3 = vsub.f32 %v1320_v23, %v1333_v20  ;;  %v5817_v9 = vmul.f32 0.02, %v1252_v16 }
 0x52c   : > { %v1304_v13 = vpop.xlane.xlu1 %1303  ;;  %v1455_v26 = vmul.f32 1.442695, %v5815_v32  ;;  %v1411_v19 = vmul.f32 %v5779_v28, %v1394_v61  ;;  %vm1440_vm14 = vcmp.gt.f32.partialorder %v5815_v32, 0.0 }
 0x52d   : > { %v4464_v12 = vpop.eup %4463  ;;  %v1372_v34 = vadd.f32 1e-05, %v1346_v3  ;;  %v1334_v42 = vmul.f32 %v5817_v9, %v5817_v9  ;;  %v1321_v37 = vmul.f32 0.02, %v1304_v13 }
 0x52e   : > { %v1254_v35 = vpop.xlane.xlu0 %1253  ;;  %4473 = vpow2.f32 %v1455_v26  ;;  %v5826_v24 = vadd.f32 %v5785_v25, %v1411_v19  ;;  %v1395_v10 = vmul.f32 %v4464_v12, %v1356_v5 }
 0x52f   : > { %4475 = vrsqrt.f32 %v1372_v34  ;;  %v1347_v22 = vsub.f32 %v1321_v37, %v1334_v42  ;;  %v5828_v48 = vmul.f32 0.02, %v1254_v35  ;;  %v1359_v42 = vsub.f32 %v5725_v6, %v5806_v53 }
 0x530   : > { %v4466_v58 = vpop.eup %4465  ;;  %v1306_v60 = vpop.xlane.xlu1 %1305  ;;  %v1457_v63 = vmul.f32 1.442695, %v5826_v24  ;;  %v1412_v4 = vmul.f32 %v5779_v28, %v1395_v10  ;;  %vm1441_vm15 = vcmp.gt.f32.partialorder %v5826_v24, 0.0 }
 0x531   : > { %v4468_v21 = vpop.eup %4467  ;;  %v1373_v45 = vadd.f32 1e-05, %v1347_v22  ;;  %v1335_v49 = vmul.f32 %v5828_v48, %v5828_v48  ;;  %v1322_v44 = vmul.f32 0.02, %v1306_v60  ;;  %v3474_v8 = vadd.f32 -1.0, %v4466_v58 }
 0x532   : > { %v1256_v27 = vpop.xlane.xlu0 %1255  ;;  %4477 = vpow2.f32 %v1457_v63  ;;  %v5837_v17 = vadd.f32 %v5785_v25, %v1412_v4  ;;  %v1396_v59 = vmul.f32 %v4468_v21, %v1357_v30 }
 0x533   : > { %4479 = vrsqrt.f32 %v1373_v45  ;;  %v1348_v57 = vsub.f32 %v1322_v44, %v1335_v49  ;;  %v5839_v18 = vmul.f32 0.02, %v1256_v27  ;;  %v1490_v20 = vsel %vm1438_vm12, %v5794_v55, %v3474_v8 }
 0x534   : > { %v4470_v29 = vpop.eup %4469  ;;  %v1308_v52 = vpop.xlane.xlu1 %1307  ;;  %v1459_v23 = vmul.f32 1.442695, %v5837_v17  ;;  %v1413_v16 = vmul.f32 %v5779_v28, %v1396_v59  ;;  %3951 = vmatmul.mubr.f32.vlgmr.msra.gmra.mrb[26].mxu1 %v1490_v20  ;;  %v1360_v44 = vsub.f32 %v5732_v50, %v5817_v9  ;;  %vm1442_vm1 = vcmp.gt.f32.partialorder %v5837_v17, 0.0 }
 0x535   : > { %v4472_v61 = vpop.eup %4471  ;;  %v1374_v3 = vadd.f32 1e-05, %v1348_v57  ;;  %v1336_v5 = vmul.f32 %v5839_v18, %v5839_v18  ;;  %v1323_v13 = vmul.f32 0.02, %v1308_v52  ;;  %3953 = vmatprep.mubr.msk.f32.mxu1 %vm4882_vm0, %v4883_v1  ;;  %v3475_v19 = vadd.f32 -1.0, %v4470_v29 }
 0x536   : > { %v1258_v26 = vpop.xlane.xlu0 %1257  ;;  %4481 = vpow2.f32 %v1459_v23  ;;  %v5852_v31 = vadd.f32 %v5785_v25, %v1413_v16  ;;  %v1397_v55 = vmul.f32 %v4472_v61, %v1358_v47  ;;  %v1361_v61 = vsub.f32 %v5739_v15, %v5828_v48 }
 0x537   : > { %4483 = vrsqrt.f32 %v1374_v3  ;;  %v1349_v51 = vsub.f32 %v1323_v13, %v1336_v5  ;;  %v5854_v12 = vmul.f32 0.02, %v1258_v26  ;;  %v1491_v35 = vsel %vm1439_vm13, %v5804_v56, %v3475_v19 }
 0x538   : > { %v4474_v34 = vpop.eup %4473  ;;  %v1310_v37 = vpop.xlane.xlu1 %1309  ;;  %v1461_v10 = vmul.f32 1.442695, %v5852_v31  ;;  %v1414_v22 = vmul.f32 %v5779_v28, %v1397_v55  ;;  %3954 = vmatmul.mubr.f32.gmra.mrb[28].mxu1 %v1491_v35  ;;  %v1362_v48 = vsub.f32 %v5745_v14, %v5839_v18  ;;  %vm1443_vm2 = vcmp.gt.f32.partialorder %v5852_v31, 0.0 }
 0x539   : > { %v4476_v58 = vpop.eup %4475  ;;  %v1375_v30 = vadd.f32 1e-05, %v1349_v51  ;;  %v1337_v60 = vmul.f32 %v5854_v12, %v5854_v12  ;;  %v1324_v63 = vmul.f32 0.02, %v1310_v37  ;;  %3956 = vmatprep.mubr.msk.f32.mxu1 %vm4882_vm0, %v4883_v1  ;;  %v3476_v21 = vadd.f32 -1.0, %v4474_v34 }
 0x53a   : > { %v1260_v4 = vpop.xlane.xlu0 %1259  ;;  %4485 = vpow2.f32 %v1461_v10  ;;  %v5867_v6 = vadd.f32 %v5785_v25, %v1414_v22  ;;  %v1398_v56 = vmul.f32 %v4476_v58, %v1359_v42  ;;  %v1363_v14 = vsub.f32 %v5752_v62, %v5854_v12 }
 0x53b   : > { %4487 = vrsqrt.f32 %v1375_v30  ;;  %v1350_v53 = vsub.f32 %v1324_v63, %v1337_v60  ;;  %v5869_v45 = vmul.f32 0.02, %v1260_v4  ;;  %v1492_v8 = vsel %vm1440_vm14, %v5815_v32, %v3476_v21 }
 0x53c   : > { %v4478_v49 = vpop.eup %4477  ;;  %v1312_v27 = vpop.xlane.xlu1 %1311  ;;  %v1463_v59 = vmul.f32 1.442695, %v5867_v6  ;;  %v1415_v57 = vmul.f32 %v5779_v28, %v1398_v56  ;;  %3957 = vmatmul.mubr.f32.gmra.mrb[30].mxu1 %v1492_v8  ;;  %vm1444_vm3 = vcmp.gt.f32.partialorder %v5867_v6, 0.0 }
 0x53d   : > { %v4480_v29 = vpop.eup %4479  ;;  %v1376_v47 = vadd.f32 1e-05, %v1350_v53  ;;  %v1338_v52 = vmul.f32 %v5869_v45, %v5869_v45  ;;  %v1325_v20 = vmul.f32 0.02, %v1312_v27  ;;  %3959 = vmatprep.mubr.msk.f32.mxu1 %vm4882_vm0, %v4883_v1  ;;  %v3477_v23 = vadd.f32 -1.0, %v4478_v49 }
 0x53e   : > { %4489 = vpow2.f32 %v1463_v59  ;;  %v1432_v50 = vadd.f32 %v5785_v25, %v1415_v57  ;;  %v1399_v9 = vmul.f32 %v4480_v29, %v1360_v44  ;;  %v1364_v62 = vsub.f32 %v5759_v11, %v5869_v45 }
 0x53f   : > { %4491 = vrsqrt.f32 %v1376_v47  ;;  %v1351_v32 = vsub.f32 %v1325_v20, %v1338_v52  ;;  %v1493_v3 = vsel %vm1441_vm15, %v5826_v24, %v3477_v23 }
 0x540   : > { %v4482_v16 = vpop.eup %4481  ;;  %v1465_v5 = vmul.f32 1.442695, %v1432_v50  ;;  %v1416_v13 = vmul.f32 %v5779_v28, %v1399_v9  ;;  %3960 = vmatmul.mubr.f32.gmra.mrb[32].mxu1 %v1493_v3  ;;  %vm1445_vm4 = vcmp.gt.f32.partialorder %v1432_v50, 0.0 }
 0x541   : > { %v4484_v26 = vpop.eup %4483  ;;  %v1377_v19 = vadd.f32 1e-05, %v1351_v32  ;;  %v3478_v55 = vadd.f32 -1.0, %v4482_v16  ;;  %3962 = vmatprep.mubr.msk.f32.mxu1 %vm4882_vm0, %v4883_v1 }
 0x542   : > { %4493 = vpow2.f32 %v1465_v5  ;;  %v1433_v51 = vadd.f32 %v5785_v25, %v1416_v13  ;;  %v1400_v34 = vmul.f32 %v4484_v26, %v1361_v61 }
 0x543   : > { %4495 = vrsqrt.f32 %v1377_v19  ;;  %v1494_v15 = vsel %vm1442_vm1, %v5837_v17, %v3478_v55  ;;  %v2181_v19 = vld [vmem:[#allocation5 + $0x200] sm:$0xff]  ;;  %v2182_v55 = vld [vmem:[#allocation5 + $0x208] sm:$0xff] }
 0x544   : > { %v4486_v24 = vpop.eup %4485  ;;  %v1467_v42 = vmul.f32 1.442695, %v1433_v51  ;;  %v1417_v37 = vmul.f32 %v5779_v28, %v1400_v34  ;;  %3963 = vmatmul.mubr.f32.gmra.mrb[34].mxu1 %v1494_v15  ;;  %vm1446_vm5 = vcmp.gt.f32.partialorder %v1433_v51, 0.0  ;;  %v5930_v34 = vand.u32 127, %v223_v39 }
 0x545   : > { %v4488_v35 = vpop.eup %4487  ;;  %v3479_v10 = vadd.f32 -1.0, %v4486_v24  ;;  %3965 = vmatprep.mubr.msk.f32.mxu1 %vm4882_vm0, %v4883_v1  ;;  %v5937_v15 = vrot.slane %v5771_v43, %v5260_v33 }
 0x546   : > { %4497 = vpow2.f32 %v1467_v42  ;;  %v1434_v22 = vadd.f32 %v5785_v25, %v1417_v37  ;;  %v1401_v58 = vmul.f32 %v4488_v35, %v1362_v48  ;;  %vm228_vm10 = vcmp.ge.s32.totalorder %v5930_v34, 50 }
 0x547   : > { %v1495_v17 = vsel %vm1443_vm2, %v5852_v31, %v3479_v10  ;;  %vm229_vm11 = vcmp.lt.s32.totalorder %v5930_v34, 100  ;;  %vm225_vm12 = vcmp.lt.s32.totalorder %v5930_v34, 50 }
 0x548   : > { %v4490_v30 = vpop.eup %4489  ;;  %v1469_v18 = vmul.f32 1.442695, %v1434_v22  ;;  %v1418_v60 = vmul.f32 %v5779_v28, %v1401_v58  ;;  %3966 = vmatmul.mubr.f32.gmra.mrb[36].mxu1 %v1495_v17  ;;  %vm1447_vm6 = vcmp.gt.f32.partialorder %v1434_v22, 0.0  ;;  %vm230_vm13 = vmand %vm228_vm10, %vm229_vm11  ;;  %v5940_v24 = vsel %vm225_vm12, 1.0, %v4883_v1 }
 0x549   : > { %v4492_v63 = vpop.eup %4491  ;;  %v3480_v4 = vadd.f32 -1.0, %v4490_v30  ;;  %3968 = vmatprep.mubr.msk.f32.mxu1 %vm4882_vm0, %v4883_v1  ;;  %v5943_v48 = vsel %vm230_vm13, 1.0, %v4883_v1 }
 0x54a   : > { %4499 = vpow2.f32 %v1469_v18  ;;  %v1435_v21 = vadd.f32 %v5785_v25, %v1418_v60  ;;  %v1402_v56 = vmul.f32 %v4492_v63, %v1363_v14 }
 0x54b   : > { %v1496_v31 = vsel %vm1444_vm3, %v5867_v6, %v3480_v4 }
 0x54c   : > { %v4494_v53 = vpop.eup %4493  ;;  %v1471_v12 = vmul.f32 1.442695, %v1435_v21  ;;  %v1419_v49 = vmul.f32 %v5779_v28, %v1402_v56  ;;  %3969 = vmatmul.mubr.f32.gmra.mrb[38].mxu1 %v1496_v31  ;;  %vm1448_vm7 = vcmp.gt.f32.partialorder %v1435_v21, 0.0 }
 0x54d   : > { %v4496_v44 = vpop.eup %4495  ;;  %v3481_v27 = vadd.f32 -1.0, %v4494_v53  ;;  %3971 = vmatprep.mubr.msk.f32.mxu1 %vm4882_vm0, %v4883_v1 }
 0x54e   : > { %4501 = vpow2.f32 %v1471_v12  ;;  %v1436_v8 = vadd.f32 %v5785_v25, %v1419_v49  ;;  %v1403_v59 = vmul.f32 %v4496_v44, %v1364_v62 }
 0x54f   : > { %v1497_v57 = vsel %vm1445_vm4, %v1432_v50, %v3481_v27 }
 0x550   : > { %v4498_v6 = vpop.eup %4497  ;;  %v1473_v29 = vmul.f32 1.442695, %v1436_v8  ;;  %v1420_v47 = vmul.f32 %v5779_v28, %v1403_v59  ;;  %3972 = vmatmul.mubr.f32.gmra.mrb[40].mxu1 %v1497_v57  ;;  %vm1449_vm8 = vcmp.gt.f32.partialorder %v1436_v8, 0.0 }
 0x551   : > { %v3482_v11 = vadd.f32 -1.0, %v4498_v6  ;;  %3974 = vmatprep.mubr.msk.f32.mxu1 %vm4882_vm0, %v4883_v1 }
 0x552   : > { %4503 = vpow2.f32 %v1473_v29  ;;  %v1437_v45 = vadd.f32 %v5785_v25, %v1420_v47 }
 0x553   : > { %v1498_v52 = vsel %vm1446_vm5, %v1433_v51, %v3482_v11  ;;  %v4228_v51 = vpack.c.bf16 %v2182_v55, %v2181_v19 }
 0x554   : > { %v4500_v20 = vpop.eup %4499  ;;  %v1475_v23 = vmul.f32 1.442695, %v1437_v45  ;;  %3975 = vmatmul.mubr.f32.gmra.mrb[42].mxu1 %v1498_v52  ;;  %vm1450_vm9 = vcmp.gt.f32.partialorder %v1437_v45, 0.0 }
 0x555   : > { %v3483_v9 = vadd.f32 -1.0, %v4500_v20  ;;  %3977 = vmatprep.mubr.msk.f32.mxu1 %vm4882_vm0, %v4883_v1  ;;  %4229 = vmatpush3.bf16.msra.mxu0 %v4228_v51 }
 0x556   : > { %4505 = vpow2.f32 %v1475_v23  ;;  %4230 = vmatprep.subr.bf16.mxu0 %v4881_v0  ;;  %v2183_v23 = vld [vmem:[#allocation5 + $0x210] sm:$0xff] }
 0x557   : > { %v1499_v28 = vsel %vm1447_vm6, %v1434_v22, %v3483_v9  ;;  %v2184_v9 = vld [vmem:[#allocation5 + $0x218] sm:$0xff] }
 0x558   : > { %v4502_v50 = vpop.eup %4501  ;;  %3978 = vmatmul.mubr.f32.gmra.mrb[44].mxu1 %v1499_v28  ;;  %v4231_v28 = vpack.c.bf16 %v2184_v9, %v2183_v23 }
 0x559   : > { %v3484_v32 = vadd.f32 -1.0, %v4502_v50  ;;  %3980 = vmatprep.mubr.msk.f32.mxu1 %vm4882_vm0, %v4883_v1 }
 0x55a   : > { %4232 = vmatpush3.bf16.msra.mxu0 %v4231_v28 }
 0x55b   : > { %v1500_v16 = vsel %vm1448_vm7, %v1435_v21, %v3484_v32  ;;  %4233 = vmatprep.subr.bf16.mxu0 %v4881_v0 }
 0x55c   : > { %v4504_v25 = vpop.eup %4503  ;;  %3981 = vmatmul.mubr.f32.gmra.mrb[46].mxu1 %v1500_v16 }
 0x55d   : > { %v3485_v61 = vadd.f32 -1.0, %v4504_v25  ;;  %3983 = vmatprep.mubr.msk.f32.mxu1 %vm4882_vm0, %v4883_v1 }
 0x55f   : > { %v1501_v3 = vsel %vm1449_vm8, %v1436_v8, %v3485_v61 }
 0x560   : > { %v4506_v5 = vpop.eup %4505  ;;  %3984 = vmatmul.mubr.f32.gmra.mrb[48].mxu1 %v1501_v3 }
 0x561   : > { %v3486_v13 = vadd.f32 -1.0, %v4506_v5  ;;  %3986 = vmatprep.mubr.msk.f32.mxu1 %vm4882_vm0, %v4883_v1 }
 0x563   : > { %v1502_v26 = vsel %vm1450_vm9, %v1437_v45, %v3486_v13 }
 0x564   : > { %3987 = vmatmul.mubr.f32.gmra.mrb[50].mxu1 %v1502_v26 }
 0x565   : > { %4092 = vmatprep.mubr.msk.f32.mxu1 %vm4882_vm0, %v4883_v1 }
 0x607   : > { %v1589_v42 = vpop.f32.mrb[26].mxu1 }
 0x608   : > { %v5946_v39 = vadd.f32 %v1589_v42, %v5937_v15  ;;  %v3952_v37 = vpop.f32.mrb[27].mxu1 }
 0x60a   : > { %v1744_v35 = vmul.f32 %v5943_v48, %v5946_v39  ;;  %v1666_v10 = vmul.f32 %v5940_v24, %v5946_v39  ;;  %v1653_v22 = vmul.f32 %v5946_v39, %v5946_v39 }
 0x60b   : > { %v1594_v58 = vpop.f32.mrb[28].mxu1 }
 0x60c   : > { %1757 = vadd.xlane.f32.xlu1 %v1744_v35  ;;  %1679 = vadd.xlane.f32.xlu0 %v1666_v10  ;;  %v3955_v17 = vpop.f32.mrb[29].mxu1  ;;  %v5955_v30 = vadd.f32 %v1594_v58, %v5937_v15  ;;  %v1783_v14 = vmul.f32 %v5943_v48, %v1653_v22  ;;  %v1705_v18 = vmul.f32 %v5940_v24, %v1653_v22 }
 0x60e   : > { %v1745_v4 = vmul.f32 %v5943_v48, %v5955_v30  ;;  %v1667_v21 = vmul.f32 %v5940_v24, %v5955_v30  ;;  %v1654_v56 = vmul.f32 %v5955_v30, %v5955_v30 }
 0x60f   : > { %v1599_v60 = vpop.f32.mrb[30].mxu1 }
 0x610   : > { %1796 = vadd.xlane.f32.xlu1 %v1783_v14  ;;  %1718 = vadd.xlane.f32.xlu0 %v1705_v18  ;;  %v3958_v63 = vpop.f32.mrb[31].mxu1  ;;  %v5966_v62 = vadd.f32 %v1599_v60, %v5937_v15  ;;  %v1784_v12 = vmul.f32 %v5943_v48, %v1654_v56  ;;  %v1706_v49 = vmul.f32 %v5940_v24, %v1654_v56  ;;  %v2187_v56 = vld [vmem:[#allocation5 + $0x230] sm:$0xff] }
 0x612   : > { %v1746_v8 = vmul.f32 %v5943_v48, %v5966_v62  ;;  %v1668_v59 = vmul.f32 %v5940_v24, %v5966_v62  ;;  %v1655_v57 = vmul.f32 %v5966_v62, %v5966_v62 }
 0x613   : > { %v1604_v31 = vpop.f32.mrb[32].mxu1 }
 0x614   : > { %1759 = vadd.xlane.f32.xlu1 %v1745_v4  ;;  %1681 = vadd.xlane.f32.xlu0 %v1667_v21  ;;  %v3961_v53 = vpop.f32.mrb[33].mxu1  ;;  %v5977_v47 = vadd.f32 %v1604_v31, %v5937_v15  ;;  %v1785_v11 = vmul.f32 %v5943_v48, %v1655_v57  ;;  %v1707_v45 = vmul.f32 %v5940_v24, %v1655_v57  ;;  %v2185_v4 = vld [vmem:[#allocation5 + $0x220] sm:$0xff]  ;;  %v2186_v21 = vld [vmem:[#allocation5 + $0x228] sm:$0xff] }
 0x615   : > { %v4234_v31 = vpack.c.bf16 %v2186_v21, %v2185_v4  ;;  %v2188_v53 = vld [vmem:[#allocation5 + $0x238] sm:$0xff] }
 0x616   : > { %v1747_v50 = vmul.f32 %v5943_v48, %v5977_v47  ;;  %v1669_v32 = vmul.f32 %v5940_v24, %v5977_v47  ;;  %v1656_v16 = vmul.f32 %v5977_v47, %v5977_v47 }
 0x617   : > { %v1609_v44 = vpop.f32.mrb[34].mxu1  ;;  %4235 = vmatpush3.bf16.msra.mxu0 %v4234_v31 }
 0x618   : > { %1798 = vadd.xlane.f32.xlu1 %v1784_v12  ;;  %1720 = vadd.xlane.f32.xlu0 %v1706_v49  ;;  %v3964_v27 = vpop.f32.mrb[35].mxu1  ;;  %v5991_v3 = vadd.f32 %v1609_v44, %v5937_v15  ;;  %v1786_v5 = vmul.f32 %v5943_v48, %v1656_v16  ;;  %v1708_v13 = vmul.f32 %v5940_v24, %v1656_v16 }
 0x619   : > { %4236 = vmatprep.subr.bf16.mxu0 %v4881_v0 }
 0x61a   : > { %v1748_v51 = vmul.f32 %v5943_v48, %v5991_v3  ;;  %v1670_v42 = vmul.f32 %v5940_v24, %v5991_v3  ;;  %v1657_v37 = vmul.f32 %v5991_v3, %v5991_v3 }
 0x61b   : > { %v1614_v6 = vpop.f32.mrb[36].mxu1 }
 0x61c   : > { %1761 = vadd.xlane.f32.xlu1 %v1746_v8  ;;  %1683 = vadd.xlane.f32.xlu0 %v1668_v59  ;;  %v3967_v29 = vpop.f32.mrb[37].mxu1  ;;  %v6008_v58 = vadd.f32 %v1614_v6, %v5937_v15  ;;  %v1787_v17 = vmul.f32 %v5943_v48, %v1657_v37  ;;  %v1709_v14 = vmul.f32 %v5940_v24, %v1657_v37  ;;  %v2189_v6 = vld [vmem:[#allocation5 + $0x240] sm:$0xff]  ;;  %v2194_v37 = vld [vmem:[#allocation5 + $0x268] sm:$0xff] }
 0x61d   : > { %v4237_v8 = vpack.c.bf16 %v2188_v53, %v2187_v56  ;;  %v2190_v29 = vld [vmem:[#allocation5 + $0x248] sm:$0xff] }
 0x61e   : > { %v1749_v12 = vmul.f32 %v5943_v48, %v6008_v58  ;;  %v1671_v49 = vmul.f32 %v5940_v24, %v6008_v58  ;;  %v1658_v44 = vmul.f32 %v6008_v58, %v6008_v58  ;;  %v4240_v9 = vpack.c.bf16 %v2190_v29, %v2189_v6 }
 0x61f   : > { %v1619_v52 = vpop.f32.mrb[38].mxu1  ;;  %4238 = vmatpush3.bf16.msra.mxu0 %v4237_v8 }
 0x620   : > { %1800 = vadd.xlane.f32.xlu1 %v1785_v11  ;;  %1722 = vadd.xlane.f32.xlu0 %v1707_v45  ;;  %v3970_v20 = vpop.f32.mrb[39].mxu1  ;;  %v6026_v11 = vadd.f32 %v1619_v52, %v5937_v15  ;;  %v1788_v45 = vmul.f32 %v5943_v48, %v1658_v44 }
 0x621   : > { %v1710_v20 = vmul.f32 %v5940_v24, %v1658_v44  ;;  %4239 = vmatprep.subr.bf16.mxu0 %v4881_v0 }
 0x622   : > { %v1672_v52 = vmul.f32 %v5940_v24, %v6026_v11  ;;  %v1659_v16 = vmul.f32 %v6026_v11, %v6026_v11 }
 0x623   : > { %v5987_v25 = vpop.f32.mrb[40].mxu1  ;;  %4241 = vmatpush3.bf16.msra.mxu0 %v4240_v9 }
 0x624   : > { %1763 = vadd.xlane.f32.xlu1 %v1747_v50  ;;  %1685 = vadd.xlane.f32.xlu0 %v1669_v32  ;;  %v3973_v61 = vpop.f32.mrb[41].mxu1  ;;  %v1750_v32 = vmul.f32 %v5943_v48, %v6026_v11 }
 0x625   : > { %v2191_v61 = vld [vmem:[#allocation5 + $0x250] sm:$0xff]  ;;  %4242 = vmatprep.subr.bf16.mxu0 %v4881_v0 }
 0x627   : > { %v1629_v26 = vpop.f32.mrb[42].mxu1 }
 0x628   : > { %v5996_v19 = vadd.f32 %v1629_v26, %v5937_v15  ;;  %1802 = vadd.xlane.f32.xlu1 %v1786_v5  ;;  %1724 = vadd.xlane.f32.xlu0 %v1708_v13  ;;  %v3976_v55 = vpop.f32.mrb[43].mxu1  ;;  %v2192_v5 = vld [vmem:[#allocation5 + $0x258] sm:$0xff]  ;;  %v6043_v26 = vadd.f32 %v5987_v25, %v5937_v15  ;;  %v2195_v25 = vld [vmem:[#allocation5 + $0x270] sm:$0xff] }
 0x629   : > { %v4243_v13 = vpack.c.bf16 %v2192_v5, %v2191_v61  ;;  %v1789_v55 = vmul.f32 %v5943_v48, %v1659_v16 }
 0x62a   : > { %v1752_v21 = vmul.f32 %v5943_v48, %v5996_v19  ;;  %v1674_v56 = vmul.f32 %v5940_v24, %v5996_v19  ;;  %v1661_v31 = vmul.f32 %v5996_v19, %v5996_v19 }
 0x62b   : > { %v1634_v35 = vpop.f32.mrb[44].mxu1  ;;  %4244 = vmatpush3.bf16.msra.mxu0 %v4243_v13 }
 0x62c   : > { %v6005_v10 = vadd.f32 %v1634_v35, %v5937_v15  ;;  %1765 = vadd.xlane.f32.xlu1 %v1748_v51  ;;  %1687 = vadd.xlane.f32.xlu0 %v1670_v42  ;;  %v3979_v22 = vpop.f32.mrb[45].mxu1  ;;  %v1711_v51 = vmul.f32 %v5940_v24, %v1659_v16  ;;  %v2193_v42 = vld [vmem:[#allocation5 + $0x260] sm:$0xff]  ;;  %v1791_v53 = vmul.f32 %v5943_v48, %v1661_v31 }
 0x62d   : > { %4245 = vmatprep.subr.bf16.mxu0 %v4881_v0  ;;  %v4246_v35 = vpack.c.bf16 %v2194_v37, %v2193_v42  ;;  %v1751_v22 = vmul.f32 %v5943_v48, %v6043_v26 }
 0x62e   : > { %v1675_v44 = vmul.f32 %v5940_v24, %v6005_v10 }
 0x62f   : > { %v1639_v18 = vpop.f32.mrb[46].mxu1  ;;  %4247 = vmatpush3.bf16.msra.mxu0 %v4246_v35 }
 0x630   : > { %v6013_v60 = vadd.f32 %v1639_v18, %v5937_v15  ;;  %1804 = vadd.xlane.f32.xlu1 %v1787_v17  ;;  %1726 = vadd.xlane.f32.xlu0 %v1709_v14  ;;  %v3982_v63 = vpop.f32.mrb[47].mxu1  ;;  %v1673_v17 = vmul.f32 %v5940_v24, %v6043_v26  ;;  %v2196_v14 = vld [vmem:[#allocation5 + $0x278] sm:$0xff] }
 0x631   : > { %4248 = vmatprep.subr.bf16.mxu0 %v4881_v0  ;;  %v4249_v18 = vpack.c.bf16 %v2196_v14, %v2195_v25 }
 0x632   : > { %v1754_v6 = vmul.f32 %v5943_v48, %v6013_v60  ;;  %v1676_v29 = vmul.f32 %v5940_v24, %v6013_v60 }
 0x633   : > { %v1644_v27 = vpop.f32.mrb[48].mxu1  ;;  %4250 = vmatpush3.bf16.msra.mxu0 %v4249_v18 }
 0x634   : > { %v6022_v59 = vadd.f32 %v1644_v27, %v5937_v15  ;;  %1767 = vadd.xlane.f32.xlu1 %v1749_v12  ;;  %1689 = vadd.xlane.f32.xlu0 %v1671_v49  ;;  %v3985_v57 = vpop.f32.mrb[49].mxu1  ;;  %v1713_v12 = vmul.f32 %v5940_v24, %v1661_v31  ;;  %v1753_v49 = vmul.f32 %v5943_v48, %v6005_v10 }
 0x635   : > { %v1662_v27 = vmul.f32 %v6005_v10, %v6005_v10 }
 0x636   : > { %v1755_v9 = vmul.f32 %v5943_v48, %v6022_v59 }
 0x637   : > { %v1649_v23 = vpop.f32.mrb[50].mxu1  ;;  %v1792_v8 = vmul.f32 %v5943_v48, %v1662_v27  ;;  %v1714_v57 = vmul.f32 %v5940_v24, %v1662_v27 }
 0x638   : > { %v6031_v28 = vadd.f32 %v1649_v23, %v5937_v15  ;;  %1806 = vadd.xlane.f32.xlu1 %v1788_v45  ;;  %1728 = vadd.xlane.f32.xlu0 %v1710_v20  ;;  %v3988_v50 = vpop.f32.mrb[51].mxu1  ;;  %v1660_v15 = vmul.f32 %v6043_v26, %v6043_v26  ;;  %v1663_v45 = vmul.f32 %v6013_v60, %v6013_v60 }
 0x639   : > { %v1677_v50 = vmul.f32 %v5940_v24, %v6022_v59 }
 0x63a   : > { %v1790_v63 = vmul.f32 %v5943_v48, %v1660_v15  ;;  %v1712_v4 = vmul.f32 %v5940_v24, %v1660_v15  ;;  %v1793_v20 = vmul.f32 %v5943_v48, %v1663_v45  ;;  %v1715_v23 = vmul.f32 %v5940_v24, %v1663_v45 }
 0x63b   : > { %v1756_v61 = vmul.f32 %v5943_v48, %v6031_v28  ;;  %v1678_v5 = vmul.f32 %v5940_v24, %v6031_v28  ;;  %v1665_v13 = vmul.f32 %v6031_v28, %v6031_v28 }
 0x63c   : > { %1769 = vadd.xlane.f32.xlu1 %v1750_v32  ;;  %1691 = vadd.xlane.f32.xlu0 %v1672_v52  ;;  %v1664_v32 = vmul.f32 %v6022_v59, %v6022_v59 }
 0x63e   : > { %v1794_v52 = vmul.f32 %v5943_v48, %v1664_v32  ;;  %v1716_v16 = vmul.f32 %v5940_v24, %v1664_v32 }
 0x640   : > { %1808 = vadd.xlane.f32.xlu1 %v1789_v55  ;;  %1730 = vadd.xlane.f32.xlu0 %v1711_v51  ;;  %v1795_v55 = vmul.f32 %v5943_v48, %v1665_v13  ;;  %v1717_v51 = vmul.f32 %v5940_v24, %v1665_v13 }
 0x644   : > { %1771 = vadd.xlane.f32.xlu1 %v1751_v22  ;;  %1693 = vadd.xlane.f32.xlu0 %v1673_v17 }
 0x648   : > { %1810 = vadd.xlane.f32.xlu1 %v1790_v63  ;;  %1732 = vadd.xlane.f32.xlu0 %v1712_v4 }
 0x64c   : > { %1773 = vadd.xlane.f32.xlu1 %v1752_v21  ;;  %1695 = vadd.xlane.f32.xlu0 %v1674_v56 }
 0x650   : > { %1812 = vadd.xlane.f32.xlu1 %v1791_v53  ;;  %1734 = vadd.xlane.f32.xlu0 %v1713_v12 }
 0x654   : > { %1775 = vadd.xlane.f32.xlu1 %v1753_v49  ;;  %1697 = vadd.xlane.f32.xlu0 %v1675_v44 }
 0x658   : > { %1814 = vadd.xlane.f32.xlu1 %v1792_v8  ;;  %1736 = vadd.xlane.f32.xlu0 %v1714_v57 }
 0x65c   : > { %1777 = vadd.xlane.f32.xlu1 %v1754_v6  ;;  %1699 = vadd.xlane.f32.xlu0 %v1676_v29 }
 0x660   : > { %1816 = vadd.xlane.f32.xlu1 %v1793_v20  ;;  %1738 = vadd.xlane.f32.xlu0 %v1715_v23 }
 0x664   : > { %1779 = vadd.xlane.f32.xlu1 %v1755_v9  ;;  %1701 = vadd.xlane.f32.xlu0 %v1677_v50 }
 0x668   : > { %1818 = vadd.xlane.f32.xlu1 %v1794_v52  ;;  %1740 = vadd.xlane.f32.xlu0 %v1716_v16 }
 0x66c   : > { %1781 = vadd.xlane.f32.xlu1 %v1756_v61  ;;  %1703 = vadd.xlane.f32.xlu0 %v1678_v5 }
 0x670   : > { %1820 = vadd.xlane.f32.xlu1 %v1795_v55  ;;  %1742 = vadd.xlane.f32.xlu0 %v1717_v51 }
 0x699   : > { %v1758_v42 = vpop.xlane.xlu1 %1757  ;;  %v1680_v37 = vpop.xlane.xlu0 %1679 }
 0x69a   : > { %v1835_v35 = vmul.f32 0.02, %v1758_v42  ;;  %v1822_v22 = vmul.f32 0.02, %v1680_v37 }
 0x69c   : > { %v1926_v25 = vmul.f32 %v1835_v35, %v1835_v35  ;;  %v1861_v14 = vmul.f32 %v1822_v22, %v1822_v22  ;;  %v1991_v9 = vmul.f32 %v5943_v48, %v1835_v35  ;;  %v1978_v50 = vmul.f32 %v5940_v24, %v1822_v22 }
 0x69d   : > { %v1797_v17 = vpop.xlane.xlu1 %1796  ;;  %v1719_v15 = vpop.xlane.xlu0 %1718 }
 0x69e   : > { %v1913_v18 = vmul.f32 0.02, %v1797_v17  ;;  %v1848_v63 = vmul.f32 0.02, %v1719_v15  ;;  %v2004_v55 = vadd.f32 %v1991_v9, %v1978_v50 }
 0x6a0   : > { %v1939_v4 = vsub.f32 %v1913_v18, %v1926_v25  ;;  %v1874_v21 = vsub.f32 %v1848_v63, %v1861_v14 }
 0x6a1   : > { %v1760_v56 = vpop.xlane.xlu1 %1759  ;;  %v1682_v31 = vpop.xlane.xlu0 %1681 }
 0x6a2   : > { %v1952_v53 = vadd.f32 1e-05, %v1939_v4  ;;  %v1887_v12 = vadd.f32 1e-05, %v1874_v21  ;;  %v1836_v49 = vmul.f32 0.02, %v1760_v56  ;;  %v6104_v21 = vrot.slane %v5771_v43, %v587_v46 }
 0x6a3   : > { %v1823_v44 = vmul.f32 0.02, %v1682_v31  ;;  %v2056_v56 = vsub.f32 %v5946_v39, %v2004_v55 }
 0x6a4   : > { %4507 = vrsqrt.f32 %v1952_v53  ;;  %v1927_v57 = vmul.f32 %v1836_v49, %v1836_v49  ;;  %v1992_v31 = vmul.f32 %v5943_v48, %v1836_v49 }
 0x6a5   : > { %4509 = vrsqrt.f32 %v1887_v12  ;;  %v1799_v27 = vpop.xlane.xlu1 %1798  ;;  %v1721_v8 = vpop.xlane.xlu0 %1720  ;;  %v1862_v6 = vmul.f32 %v1823_v44, %v1823_v44  ;;  %v1979_v53 = vmul.f32 %v5940_v24, %v1823_v44 }
 0x6a6   : > { %v1914_v29 = vmul.f32 0.02, %v1799_v27  ;;  %v1849_v45 = vmul.f32 0.02, %v1721_v8 }
 0x6a7   : > { %v2005_v39 = vadd.f32 %v1992_v31, %v1979_v53 }
 0x6a8   : > { %v1940_v20 = vsub.f32 %v1914_v29, %v1927_v57  ;;  %v1875_v23 = vsub.f32 %v1849_v45, %v1862_v6 }
 0x6a9   : > { %v1762_v32 = vpop.xlane.xlu1 %1761  ;;  %v1684_v52 = vpop.xlane.xlu0 %1683 }
 0x6aa   : > { %v1953_v16 = vadd.f32 1e-05, %v1940_v20  ;;  %v1888_v61 = vadd.f32 1e-05, %v1875_v23  ;;  %v1837_v5 = vmul.f32 0.02, %v1762_v32 }
 0x6ab   : > { %v1824_v13 = vmul.f32 0.02, %v1684_v52  ;;  %v6109_v20 = vld [vmem:[#allocation7 + $0x8] sm:$0xff] }
 0x6ac   : > { %4511 = vrsqrt.f32 %v1953_v16  ;;  %v1928_v17 = vmul.f32 %v1837_v5, %v1837_v5  ;;  %v6114_v46 = vrot.slane %v6109_v20, %v685_v38 }
 0x6ad   : > { %4513 = vrsqrt.f32 %v1888_v61  ;;  %v1801_v51 = vpop.xlane.xlu1 %1800  ;;  %v1723_v42 = vpop.xlane.xlu0 %1722  ;;  %v1863_v15 = vmul.f32 %v1824_v13, %v1824_v13 }
 0x6ae   : > { %v4508_v37 = vpop.eup %4507  ;;  %v1915_v25 = vmul.f32 0.02, %v1801_v51  ;;  %v1850_v14 = vmul.f32 0.02, %v1723_v42 }
 0x6af   : > { %v4510_v18 = vpop.eup %4509  ;;  %v2030_v35 = vmul.f32 %v4508_v37, %v5943_v48 }
 0x6b0   : > { %v2017_v22 = vmul.f32 %v4510_v18, %v5940_v24  ;;  %v1941_v63 = vsub.f32 %v1915_v25, %v1928_v17  ;;  %v1876_v4 = vsub.f32 %v1850_v14, %v1863_v15  ;;  %v2057_v17 = vsub.f32 %v5955_v30, %v2005_v39 }
 0x6b1   : > { %v1764_v12 = vpop.xlane.xlu1 %1763  ;;  %v1686_v27 = vpop.xlane.xlu0 %1685  ;;  %v1993_v15 = vmul.f32 %v5943_v48, %v1837_v5  ;;  %v1980_v25 = vmul.f32 %v5940_v24, %v1824_v13 }
 0x6b2   : > { %v1954_v8 = vadd.f32 1e-05, %v1941_v63  ;;  %v1889_v57 = vadd.f32 1e-05, %v1876_v4  ;;  %v1838_v6 = vmul.f32 0.02, %v1764_v12  ;;  %v2043_v29 = vadd.f32 %v2030_v35, %v2017_v22 }
 0x6b3   : > { %v1825_v45 = vmul.f32 0.02, %v1686_v27  ;;  %v2006_v12 = vadd.f32 %v1993_v15, %v1980_v25 }
 0x6b4   : > { %4515 = vrsqrt.f32 %v1954_v8  ;;  %v2069_v43 = vmul.f32 %v2056_v56, %v2043_v29  ;;  %v1929_v49 = vmul.f32 %v1838_v6, %v1838_v6 }
 0x6b5   : > { %4517 = vrsqrt.f32 %v1889_v57  ;;  %v1803_v44 = vpop.xlane.xlu1 %1802  ;;  %v1725_v23 = vpop.xlane.xlu0 %1724  ;;  %v1864_v50 = vmul.f32 %v1825_v45, %v1825_v45 }
 0x6b6   : > { %v4512_v9 = vpop.eup %4511  ;;  %v1916_v32 = vmul.f32 0.02, %v1803_v44  ;;  %v1851_v52 = vmul.f32 0.02, %v1725_v23  ;;  %v2086_v16 = vmul.f32 %v6104_v21, %v2069_v43  ;;  %v1981_v44 = vmul.f32 %v5940_v24, %v1825_v45 }
 0x6b7   : > { %v4514_v61 = vpop.eup %4513  ;;  %v2031_v55 = vmul.f32 %v4512_v9, %v5943_v48 }
 0x6b8   : > { %v1942_v51 = vsub.f32 %v1916_v32, %v1929_v49  ;;  %v1877_v42 = vsub.f32 %v1851_v52, %v1864_v50  ;;  %v6119_v38 = vadd.f32 %v6114_v46, %v2086_v16  ;;  %v2018_v37 = vmul.f32 %v4514_v61, %v5940_v24 }
 0x6b9   : > { %v1766_v14 = vpop.xlane.xlu1 %1765  ;;  %v1688_v18 = vpop.xlane.xlu0 %1687  ;;  %v1994_v49 = vmul.f32 %v5943_v48, %v1838_v6  ;;  %v2058_v16 = vsub.f32 %v5966_v62, %v2006_v12 }
 0x6ba   : > { %v1955_v35 = vadd.f32 1e-05, %v1942_v51  ;;  %v1890_v22 = vadd.f32 1e-05, %v1877_v42  ;;  %v1839_v63 = vmul.f32 0.02, %v1766_v14  ;;  %v2044_v4 = vadd.f32 %v2031_v55, %v2018_v37 }
 0x6bb   : > { %v1826_v56 = vmul.f32 0.02, %v1688_v18  ;;  %v2129_v31 = vmul.f32 1.442695, %v6119_v38  ;;  %v2007_v6 = vadd.f32 %v1994_v49, %v1981_v44  ;;  %vm2116_vm14 = vcmp.gt.f32.partialorder %v6119_v38, 0.0 }
 0x6bc   : > { %4519 = vrsqrt.f32 %v1955_v35  ;;  %v2070_v53 = vmul.f32 %v2057_v17, %v2044_v4  ;;  %v1930_v27 = vmul.f32 %v1839_v63, %v1839_v63 }
 0x6bd   : > { %4521 = vrsqrt.f32 %v1890_v22  ;;  %v1865_v8 = vmul.f32 %v1826_v56, %v1826_v56  ;;  %v1805_v30 = vpop.xlane.xlu1 %1804  ;;  %v1727_v57 = vpop.xlane.xlu0 %1726 }
 0x6be   : > { %v4516_v5 = vpop.eup %4515  ;;  %v1917_v29 = vmul.f32 0.02, %v1805_v30  ;;  %v1852_v13 = vmul.f32 0.02, %v1727_v57  ;;  %4523 = vpow2.f32 %v2129_v31  ;;  %v2087_v43 = vmul.f32 %v6104_v21, %v2070_v53 }
 0x6bf   : > { %v4518_v39 = vpop.eup %4517  ;;  %v2032_v23 = vmul.f32 %v4516_v5, %v5943_v48 }
 0x6c0   : > { %v1943_v9 = vsub.f32 %v1917_v29, %v1930_v27  ;;  %v1878_v50 = vsub.f32 %v1852_v13, %v1865_v8  ;;  %v6131_v32 = vadd.f32 %v6114_v46, %v2087_v43  ;;  %v2019_v52 = vmul.f32 %v4518_v39, %v5940_v24 }
 0x6c1   : > { %v1768_v61 = vpop.xlane.xlu1 %1767  ;;  %v1690_v55 = vpop.xlane.xlu0 %1689  ;;  %v2059_v27 = vsub.f32 %v5977_v47, %v2007_v6  ;;  %v1995_v43 = vmul.f32 %v5943_v48, %v1839_v63  ;;  %v1982_v39 = vmul.f32 %v5940_v24, %v1826_v56 }
 0x6c2   : > { %v1956_v51 = vadd.f32 1e-05, %v1943_v9  ;;  %v1891_v42 = vadd.f32 1e-05, %v1878_v50  ;;  %v1840_v37 = vmul.f32 0.02, %v1768_v61  ;;  %v2045_v17 = vadd.f32 %v2032_v23, %v2019_v52 }
 0x6c3   : > { %v1827_v15 = vmul.f32 0.02, %v1690_v55  ;;  %v2131_v45 = vmul.f32 1.442695, %v6131_v32  ;;  %vm2117_vm15 = vcmp.gt.f32.partialorder %v6131_v32, 0.0 }
 0x6c4   : > { %4525 = vrsqrt.f32 %v1956_v51  ;;  %v2071_v25 = vmul.f32 %v2058_v16, %v2045_v17  ;;  %v1931_v14 = vmul.f32 %v1840_v37, %v1840_v37  ;;  %v2008_v51 = vadd.f32 %v1995_v43, %v1982_v39 }
 0x6c5   : > { %4527 = vrsqrt.f32 %v1891_v42  ;;  %v1866_v18 = vmul.f32 %v1827_v15, %v1827_v15  ;;  %v1807_v35 = vpop.xlane.xlu1 %1806  ;;  %v1729_v22 = vpop.xlane.xlu0 %1728 }
 0x6c6   : > { %v4520_v4 = vpop.eup %4519  ;;  %v1918_v31 = vmul.f32 0.02, %v1807_v35  ;;  %v1853_v62 = vmul.f32 0.02, %v1729_v22  ;;  %4529 = vpow2.f32 %v2131_v45  ;;  %v2088_v53 = vmul.f32 %v6104_v21, %v2071_v25 }
 0x6c7   : > { %v4522_v12 = vpop.eup %4521  ;;  %v2033_v8 = vmul.f32 %v4520_v4, %v5943_v48  ;;  %v1996_v35 = vmul.f32 %v5943_v48, %v1840_v37  ;;  %v1983_v22 = vmul.f32 %v5940_v24, %v1827_v15 }
 0x6c8   : > { %v4524_v30 = vpop.eup %4523  ;;  %v1944_v57 = vsub.f32 %v1918_v31, %v1931_v14  ;;  %v1879_v5 = vsub.f32 %v1853_v62, %v1866_v18  ;;  %v6140_v29 = vadd.f32 %v6114_v46, %v2088_v53  ;;  %v2020_v13 = vmul.f32 %v4522_v12, %v5940_v24 }
 0x6c9   : > { %v1770_v49 = vpop.xlane.xlu1 %1769  ;;  %v3487_v44 = vadd.f32 -1.0, %v4524_v30  ;;  %v1692_v23 = vpop.xlane.xlu0 %1691  ;;  %v2009_v39 = vadd.f32 %v1996_v35, %v1983_v22 }
 0x6ca   : > { %v1957_v47 = vadd.f32 1e-05, %v1944_v57  ;;  %v1892_v9 = vadd.f32 1e-05, %v1879_v5  ;;  %v6146_v50 = vmul.f32 0.02, %v1770_v49  ;;  %v2046_v52 = vadd.f32 %v2033_v8, %v2020_v13 }
 0x6cb   : > { %v2168_v16 = vsel %vm2116_vm14, %v6119_v38, %v3487_v44  ;;  %v1828_v61 = vmul.f32 0.02, %v1692_v23  ;;  %v2133_v55 = vmul.f32 1.442695, %v6140_v29  ;;  %v2060_v8 = vsub.f32 %v5991_v3, %v2008_v51 }
 0x6cc   : > { %4531 = vrsqrt.f32 %v1957_v47  ;;  %4022 = vmatmul.mubr.f32.vlgmr.msra.gmra.mrb[52].mxu0 %v2168_v16  ;;  %v2072_v63 = vmul.f32 %v2059_v27, %v2046_v52  ;;  %v1932_v56 = vmul.f32 %v6146_v50, %v6146_v50  ;;  %vm2118_vm1 = vcmp.gt.f32.partialorder %v6140_v29, 0.0 }
 0x6cd   : > { %4533 = vrsqrt.f32 %v1892_v9  ;;  %v1867_v42 = vmul.f32 %v1828_v61, %v1828_v61  ;;  %v1809_v17 = vpop.xlane.xlu1 %1808  ;;  %v1731_v6 = vpop.xlane.xlu0 %1730  ;;  %4024 = vmatprep.mubr.msk.f32.mxu0 %vm4882_vm0, %v4883_v1  ;;  %v1984_v35 = vmul.f32 %v5940_v24, %v1828_v61 }
 0x6ce   : > { %v4526_v45 = vpop.eup %4525  ;;  %v1919_v25 = vmul.f32 0.02, %v1809_v17  ;;  %v1854_v38 = vmul.f32 0.02, %v1731_v6  ;;  %4535 = vpow2.f32 %v2133_v55  ;;  %v2089_v14 = vmul.f32 %v6104_v21, %v2072_v63 }
 0x6cf   : > { %v4528_v18 = vpop.eup %4527  ;;  %v2034_v4 = vmul.f32 %v4526_v45, %v5943_v48 }
 0x6d0   : > { %v4530_v31 = vpop.eup %4529  ;;  %v1945_v62 = vsub.f32 %v1919_v25, %v1932_v56  ;;  %v1880_v53 = vsub.f32 %v1854_v38, %v1867_v42  ;;  %v6159_v12 = vadd.f32 %v6114_v46, %v2089_v14  ;;  %v2021_v27 = vmul.f32 %v4528_v18, %v5940_v24 }
 0x6d1   : > { %v1772_v30 = vpop.xlane.xlu1 %1771  ;;  %v3488_v57 = vadd.f32 -1.0, %v4530_v31  ;;  %v1694_v5 = vpop.xlane.xlu0 %1693  ;;  %v2061_v42 = vsub.f32 %v6008_v58, %v2009_v39  ;;  %v1997_v18 = vmul.f32 %v5943_v48, %v6146_v50 }
 0x6d2   : > { %v1958_v37 = vadd.f32 1e-05, %v1945_v62  ;;  %v1893_v13 = vadd.f32 1e-05, %v1880_v53  ;;  %v1842_v15 = vmul.f32 0.02, %v1772_v30  ;;  %v2047_v43 = vadd.f32 %v2034_v4, %v2021_v27 }
 0x6d3   : > { %v2169_v49 = vsel %vm2117_vm15, %v6131_v32, %v3488_v57  ;;  %v1829_v44 = vmul.f32 0.02, %v1694_v5  ;;  %v2135_v23 = vmul.f32 1.442695, %v6159_v12  ;;  %v2010_v5 = vadd.f32 %v1997_v18, %v1984_v35 }
 0x6d4   : > { %4537 = vrsqrt.f32 %v1958_v37  ;;  %4025 = vmatmul.mubr.f32.gmra.mrb[54].mxu0 %v2169_v49  ;;  %v2073_v47 = vmul.f32 %v2060_v8, %v2047_v43  ;;  %v1933_v3 = vmul.f32 %v1842_v15, %v1842_v15  ;;  %vm2119_vm2 = vcmp.gt.f32.partialorder %v6159_v12, 0.0 }
 0x6d5   : > { %4539 = vrsqrt.f32 %v1893_v13  ;;  %v1868_v9 = vmul.f32 %v1829_v44, %v1829_v44  ;;  %v1811_v52 = vpop.xlane.xlu1 %1810  ;;  %v1733_v16 = vpop.xlane.xlu0 %1732  ;;  %4027 = vmatprep.mubr.msk.f32.mxu0 %vm4882_vm0, %v4883_v1 }
 0x6d6   : > { %v4532_v55 = vpop.eup %4531  ;;  %v1920_v63 = vmul.f32 0.02, %v1811_v52  ;;  %v1855_v51 = vmul.f32 0.02, %v1733_v16  ;;  %4541 = vpow2.f32 %v2135_v23  ;;  %v2090_v32 = vmul.f32 %v6104_v21, %v2073_v47 }
 0x6d7   : > { %v4534_v56 = vpop.eup %4533  ;;  %v2035_v17 = vmul.f32 %v4532_v55, %v5943_v48 }
 0x6d8   : > { %v4536_v6 = vpop.eup %4535  ;;  %v1946_v45 = vsub.f32 %v1920_v63, %v1933_v3  ;;  %v1881_v25 = vsub.f32 %v1855_v51, %v1868_v9  ;;  %v6172_v38 = vadd.f32 %v6114_v46, %v2090_v32  ;;  %v2022_v14 = vmul.f32 %v4534_v56, %v5940_v24 }
 0x6d9   : > { %v1774_v22 = vpop.xlane.xlu1 %1773  ;;  %v3489_v4 = vadd.f32 -1.0, %v4536_v6  ;;  %v1696_v58 = vpop.xlane.xlu0 %1695  ;;  %v1998_v3 = vmul.f32 %v5943_v48, %v1842_v15  ;;  %v1985_v9 = vmul.f32 %v5940_v24, %v1829_v44  ;;  %v2062_v56 = vsub.f32 %v6026_v11, %v2010_v5 }
 0x6da   : > { %v1959_v31 = vadd.f32 1e-05, %v1946_v45  ;;  %v1894_v62 = vadd.f32 1e-05, %v1881_v25  ;;  %v6179_v53 = vmul.f32 0.02, %v1774_v22  ;;  %v2048_v27 = vadd.f32 %v2035_v17, %v2022_v14 }
 0x6db   : > { %v2170_v8 = vsel %vm2118_vm1, %v6140_v29, %v3489_v4  ;;  %v1830_v30 = vmul.f32 0.02, %v1696_v58  ;;  %v2137_v57 = vmul.f32 1.442695, %v6172_v38  ;;  %v2011_v14 = vadd.f32 %v1998_v3, %v1985_v9 }
 0x6dc   : > { %4543 = vrsqrt.f32 %v1959_v31  ;;  %4028 = vmatmul.mubr.f32.gmra.mrb[56].mxu0 %v2170_v8  ;;  %v2074_v50 = vmul.f32 %v2061_v42, %v2048_v27  ;;  %v1934_v61 = vmul.f32 %v6179_v53, %v6179_v53  ;;  %vm2120_vm3 = vcmp.gt.f32.partialorder %v6172_v38, 0.0 }
 0x6dd   : > { %4545 = vrsqrt.f32 %v1894_v62  ;;  %v1869_v37 = vmul.f32 %v1830_v30, %v1830_v30  ;;  %v1813_v13 = vpop.xlane.xlu1 %1812  ;;  %v1735_v43 = vpop.xlane.xlu0 %1734  ;;  %4030 = vmatprep.mubr.msk.f32.mxu0 %vm4882_vm0, %v4883_v1  ;;  %v2063_v5 = vsub.f32 %v6043_v26, %v2011_v14 }
 0x6de   : > { %v4538_v39 = vpop.eup %4537  ;;  %v1921_v49 = vmul.f32 0.02, %v1813_v13  ;;  %v1856_v29 = vmul.f32 0.02, %v1735_v43  ;;  %4547 = vpow2.f32 %v2137_v57  ;;  %v2091_v23 = vmul.f32 %v6104_v21, %v2074_v50 }
 0x6df   : > { %v4540_v47 = vpop.eup %4539  ;;  %v2036_v52 = vmul.f32 %v4538_v39, %v5943_v48 }
 0x6e0   : > { %v4542_v16 = vpop.eup %4541  ;;  %v1947_v55 = vsub.f32 %v1921_v49, %v1934_v61  ;;  %v1882_v63 = vsub.f32 %v1856_v29, %v1869_v37  ;;  %v6192_v51 = vadd.f32 %v6114_v46, %v2091_v23  ;;  %v2023_v32 = vmul.f32 %v4540_v47, %v5940_v24 }
 0x6e1   : > { %v1776_v42 = vpop.xlane.xlu1 %1775  ;;  %v3490_v17 = vadd.f32 -1.0, %v4542_v16  ;;  %v1698_v6 = vpop.xlane.xlu0 %1697  ;;  %v1999_v29 = vmul.f32 %v5943_v48, %v6179_v53  ;;  %v1986_v23 = vmul.f32 %v5940_v24, %v1830_v30 }
 0x6e2   : > { %v1960_v15 = vadd.f32 1e-05, %v1947_v55  ;;  %v1895_v45 = vadd.f32 1e-05, %v1882_v63  ;;  %v1844_v44 = vmul.f32 0.02, %v1776_v42  ;;  %v2049_v25 = vadd.f32 %v2036_v52, %v2023_v32 }
 0x6e3   : > { %v2171_v18 = vsel %vm2119_vm2, %v6159_v12, %v3490_v17  ;;  %v1831_v35 = vmul.f32 0.02, %v1698_v6  ;;  %v2139_v22 = vmul.f32 1.442695, %v6192_v51  ;;  %v2012_v42 = vadd.f32 %v1999_v29, %v1986_v23 }
 0x6e4   : > { %4549 = vrsqrt.f32 %v1960_v15  ;;  %4031 = vmatmul.mubr.f32.gmra.mrb[58].mxu0 %v2171_v18  ;;  %v2075_v4 = vmul.f32 %v2062_v56, %v2049_v25  ;;  %v1935_v11 = vmul.f32 %v1844_v44, %v1844_v44  ;;  %vm2121_vm4 = vcmp.gt.f32.partialorder %v6192_v51, 0.0 }
 0x6e5   : > { %4551 = vrsqrt.f32 %v1895_v45  ;;  %v1870_v58 = vmul.f32 %v1831_v35, %v1831_v35  ;;  %v1815_v31 = vpop.xlane.xlu1 %1814  ;;  %v1737_v62 = vpop.xlane.xlu0 %1736  ;;  %4033 = vmatprep.mubr.msk.f32.mxu0 %vm4882_vm0, %v4883_v1 }
 0x6e6   : > { %v4544_v27 = vpop.eup %4543  ;;  %v1922_v8 = vmul.f32 0.02, %v1815_v31  ;;  %v1857_v57 = vmul.f32 0.02, %v1737_v62  ;;  %4553 = vpow2.f32 %v2139_v22  ;;  %v2092_v12 = vmul.f32 %v6104_v21, %v2075_v4 }
 0x6e7   : > { %v4546_v50 = vpop.eup %4545  ;;  %v2037_v61 = vmul.f32 %v4544_v27, %v5943_v48  ;;  %v2000_v22 = vmul.f32 %v5943_v48, %v1844_v44  ;;  %v1987_v4 = vmul.f32 %v5940_v24, %v1831_v35 }
 0x6e8   : > { %v4548_v37 = vpop.eup %4547  ;;  %v1948_v13 = vsub.f32 %v1922_v8, %v1935_v11  ;;  %v1883_v43 = vsub.f32 %v1857_v57, %v1870_v58  ;;  %v6205_v39 = vadd.f32 %v6114_v46, %v2092_v12  ;;  %v2024_v49 = vmul.f32 %v4546_v50, %v5940_v24 }
 0x6e9   : > { %v1778_v47 = vpop.xlane.xlu1 %1777  ;;  %v3491_v3 = vadd.f32 -1.0, %v4548_v37  ;;  %v1700_v26 = vpop.xlane.xlu0 %1699  ;;  %v2064_v57 = vsub.f32 %v5996_v19, %v2012_v42 }
 0x6ea   : > { %v1961_v9 = vadd.f32 1e-05, %v1948_v13  ;;  %v1896_v52 = vadd.f32 1e-05, %v1883_v43  ;;  %v6212_v16 = vmul.f32 0.02, %v1778_v47  ;;  %v2050_v55 = vadd.f32 %v2037_v61, %v2024_v49 }
 0x6eb   : > { %v2172_v63 = vsel %vm2120_vm3, %v6172_v38, %v3491_v3  ;;  %v1832_v32 = vmul.f32 0.02, %v1700_v26  ;;  %v2141_v56 = vmul.f32 1.442695, %v6205_v39  ;;  %v2013_v13 = vadd.f32 %v2000_v22, %v1987_v4 }
 0x6ec   : > { %4555 = vrsqrt.f32 %v1961_v9  ;;  %4034 = vmatmul.mubr.f32.gmra.mrb[60].mxu0 %v2172_v63  ;;  %v2076_v53 = vmul.f32 %v2063_v5, %v2050_v55  ;;  %v1936_v30 = vmul.f32 %v6212_v16, %v6212_v16  ;;  %vm2122_vm5 = vcmp.gt.f32.partialorder %v6205_v39, 0.0 }
 0x6ed   : > { %4557 = vrsqrt.f32 %v1896_v52  ;;  %v1871_v17 = vmul.f32 %v1832_v32, %v1832_v32  ;;  %v1817_v6 = vpop.xlane.xlu1 %1816  ;;  %v1739_v15 = vpop.xlane.xlu0 %1738  ;;  %4036 = vmatprep.mubr.msk.f32.mxu0 %vm4882_vm0, %v4883_v1 }
 0x6ee   : > { %v4550_v45 = vpop.eup %4549  ;;  %v1923_v25 = vmul.f32 0.02, %v1817_v6  ;;  %v1858_v38 = vmul.f32 0.02, %v1739_v15  ;;  %4559 = vpow2.f32 %v2141_v56  ;;  %v2093_v14 = vmul.f32 %v6104_v21, %v2076_v53 }
 0x6ef   : > { %v4552_v18 = vpop.eup %4551  ;;  %v2038_v11 = vmul.f32 %v4550_v45, %v5943_v48  ;;  %v2065_v56 = vsub.f32 %v6005_v10, %v2013_v13  ;;  %v2001_v45 = vmul.f32 %v5943_v48, %v6212_v16 }
 0x6f0   : > { %v4554_v58 = vpop.eup %4553  ;;  %v1949_v31 = vsub.f32 %v1923_v25, %v1936_v30  ;;  %v1884_v62 = vsub.f32 %v1858_v38, %v1871_v17  ;;  %v6225_v27 = vadd.f32 %v6114_v46, %v2093_v14  ;;  %v2025_v8 = vmul.f32 %v4552_v18, %v5940_v24 }
 0x6f1   : > { %v1780_v12 = vpop.xlane.xlu1 %1779  ;;  %v3492_v50 = vadd.f32 -1.0, %v4554_v58  ;;  %v1702_v5 = vpop.xlane.xlu0 %1701  ;;  %v1988_v25 = vmul.f32 %v5940_v24, %v1832_v32 }
 0x6f2   : > { %v1962_v44 = vadd.f32 1e-05, %v1949_v31  ;;  %v1897_v61 = vadd.f32 1e-05, %v1884_v62  ;;  %v6230_v35 = vmul.f32 0.02, %v1780_v12  ;;  %v2051_v37 = vadd.f32 %v2038_v11, %v2025_v8 }
 0x6f3   : > { %v2173_v43 = vsel %vm2121_vm4, %v6192_v51, %v3492_v50  ;;  %v1833_v49 = vmul.f32 0.02, %v1702_v5  ;;  %v2143_v29 = vmul.f32 1.442695, %v6225_v27  ;;  %v2014_v16 = vadd.f32 %v2001_v45, %v1988_v25 }
 0x6f4   : > { %4561 = vrsqrt.f32 %v1962_v44  ;;  %4037 = vmatmul.mubr.f32.gmra.mrb[62].mxu0 %v2173_v43  ;;  %v2077_v23 = vmul.f32 %v2064_v57, %v2051_v37  ;;  %v1937_v19 = vmul.f32 %v6230_v35, %v6230_v35  ;;  %vm2123_vm6 = vcmp.gt.f32.partialorder %v6225_v27, 0.0 }
 0x6f5   : > { %4563 = vrsqrt.f32 %v1897_v61  ;;  %v1872_v47 = vmul.f32 %v1833_v49, %v1833_v49  ;;  %v1819_v3 = vpop.xlane.xlu1 %1818  ;;  %v1741_v26 = vpop.xlane.xlu0 %1740  ;;  %4039 = vmatprep.mubr.msk.f32.mxu0 %vm4882_vm0, %v4883_v1 }
 0x6f6   : > { %v4556_v9 = vpop.eup %4555  ;;  %v1924_v52 = vmul.f32 0.02, %v1819_v3  ;;  %v1859_v55 = vmul.f32 0.02, %v1741_v26  ;;  %4565 = vpow2.f32 %v2143_v29  ;;  %v2094_v51 = vmul.f32 %v6104_v21, %v2077_v23 }
 0x6f7   : > { %v4558_v63 = vpop.eup %4557  ;;  %v2039_v53 = vmul.f32 %v4556_v9, %v5943_v48  ;;  %v2066_v3 = vsub.f32 %v6013_v60, %v2014_v16  ;;  %v2002_v26 = vmul.f32 %v5943_v48, %v6230_v35  ;;  %v1989_v9 = vmul.f32 %v5940_v24, %v1833_v49 }
 0x6f8   : > { %v4560_v42 = vpop.eup %4559  ;;  %v1950_v30 = vsub.f32 %v1924_v52, %v1937_v19  ;;  %v1885_v17 = vsub.f32 %v1859_v55, %v1872_v47  ;;  %v6242_v6 = vadd.f32 %v6114_v46, %v2094_v51  ;;  %v2026_v15 = vmul.f32 %v4558_v63, %v5940_v24 }
 0x6f9   : > { %v1782_v38 = vpop.xlane.xlu1 %1781  ;;  %v3493_v14 = vadd.f32 -1.0, %v4560_v42  ;;  %v1704_v10 = vpop.xlane.xlu0 %1703 }
 0x6fa   : > { %v1963_v18 = vadd.f32 1e-05, %v1950_v30  ;;  %v1898_v22 = vadd.f32 1e-05, %v1885_v17  ;;  %v1847_v4 = vmul.f32 0.02, %v1782_v38  ;;  %v2052_v11 = vadd.f32 %v2039_v53, %v2026_v15 }
 0x6fb   : > { %v2174_v58 = vsel %vm2122_vm5, %v6205_v39, %v3493_v14  ;;  %v1834_v31 = vmul.f32 0.02, %v1704_v10  ;;  %v2145_v62 = vmul.f32 1.442695, %v6242_v6  ;;  %v2015_v30 = vadd.f32 %v2002_v26, %v1989_v9 }
 0x6fc   : > { %4567 = vrsqrt.f32 %v1963_v18  ;;  %4040 = vmatmul.mubr.f32.gmra.mrb[64].mxu0 %v2174_v58  ;;  %v2078_v8 = vmul.f32 %v2065_v56, %v2052_v11  ;;  %v1938_v32 = vmul.f32 %v1847_v4, %v1847_v4  ;;  %vm2124_vm7 = vcmp.gt.f32.partialorder %v6242_v6, 0.0 }
 0x6fd   : > { %4569 = vrsqrt.f32 %v1898_v22  ;;  %v1873_v57 = vmul.f32 %v1834_v31, %v1834_v31  ;;  %v1821_v12 = vpop.xlane.xlu1 %1820  ;;  %v1743_v50 = vpop.xlane.xlu0 %1742  ;;  %4042 = vmatprep.mubr.msk.f32.mxu0 %vm4882_vm0, %v4883_v1  ;;  %v2067_v25 = vsub.f32 %v6022_v59, %v2015_v30  ;;  %v2003_v14 = vmul.f32 %v5943_v48, %v1847_v4 }
 0x6fe   : > { %v4562_v5 = vpop.eup %4561  ;;  %v1925_v44 = vmul.f32 0.02, %v1821_v12  ;;  %v1860_v61 = vmul.f32 0.02, %v1743_v50  ;;  %4571 = vpow2.f32 %v2145_v62  ;;  %v2095_v39 = vmul.f32 %v6104_v21, %v2078_v8 }
 0x6ff   : > { %v4564_v37 = vpop.eup %4563  ;;  %v2040_v13 = vmul.f32 %v4562_v5, %v5943_v48  ;;  %v1990_v10 = vmul.f32 %v5940_v24, %v1834_v31 }
 0x700   : > { %v4566_v43 = vpop.eup %4565  ;;  %v1951_v29 = vsub.f32 %v1925_v44, %v1938_v32  ;;  %v1886_v23 = vsub.f32 %v1860_v61, %v1873_v57  ;;  %v2112_v19 = vadd.f32 %v6114_v46, %v2095_v39  ;;  %v2027_v47 = vmul.f32 %v4564_v37, %v5940_v24 }
 0x701   : > { %v3494_v52 = vadd.f32 -1.0, %v4566_v43  ;;  %v2016_v8 = vadd.f32 %v2003_v14, %v1990_v10 }
 0x702   : > { %v1964_v55 = vadd.f32 1e-05, %v1951_v29  ;;  %v1899_v51 = vadd.f32 1e-05, %v1886_v23  ;;  %v2053_v63 = vadd.f32 %v2040_v13, %v2027_v47  ;;  %v2147_v53 = vmul.f32 1.442695, %v2112_v19 }
 0x703   : > { %v2175_v56 = vsel %vm2123_vm6, %v6225_v27, %v3494_v52  ;;  %vm2125_vm8 = vcmp.gt.f32.partialorder %v2112_v19, 0.0 }
 0x704   : > { %4573 = vrsqrt.f32 %v1964_v55  ;;  %4043 = vmatmul.mubr.f32.gmra.mrb[66].mxu0 %v2175_v56  ;;  %v2079_v42 = vmul.f32 %v2066_v3, %v2053_v63 }
 0x705   : > { %4575 = vrsqrt.f32 %v1899_v51  ;;  %4045 = vmatprep.mubr.msk.f32.mxu0 %vm4882_vm0, %v4883_v1 }
 0x706   : > { %v4568_v60 = vpop.eup %4567  ;;  %4577 = vpow2.f32 %v2147_v53  ;;  %v2096_v35 = vmul.f32 %v6104_v21, %v2079_v42 }
 0x707   : > { %v4570_v49 = vpop.eup %4569  ;;  %v2041_v17 = vmul.f32 %v4568_v60, %v5943_v48 }
 0x708   : > { %v4572_v15 = vpop.eup %4571  ;;  %v2113_v45 = vadd.f32 %v6114_v46, %v2096_v35  ;;  %v2028_v27 = vmul.f32 %v4570_v49, %v5940_v24 }
 0x709   : > { %v3495_v38 = vadd.f32 -1.0, %v4572_v15 }
 0x70a   : > { %v2149_v18 = vmul.f32 1.442695, %v2113_v45  ;;  %v2054_v22 = vadd.f32 %v2041_v17, %v2028_v27  ;;  %vm2126_vm9 = vcmp.gt.f32.partialorder %v2113_v45, 0.0 }
 0x70b   : > { %v2176_v11 = vsel %vm2124_vm7, %v6242_v6, %v3495_v38  ;;  %v2068_v6 = vsub.f32 %v6031_v28, %v2016_v8 }
 0x70c   : > { %4046 = vmatmul.mubr.f32.gmra.mrb[68].mxu0 %v2176_v11  ;;  %4579 = vpow2.f32 %v2149_v18  ;;  %v2080_v58 = vmul.f32 %v2067_v25, %v2054_v22 }
 0x70d   : > { %4048 = vmatprep.mubr.msk.f32.mxu0 %vm4882_vm0, %v4883_v1 }
 0x70e   : > { %v4574_v62 = vpop.eup %4573  ;;  %v2097_v59 = vmul.f32 %v6104_v21, %v2080_v58 }
 0x70f   : > { %v4576_v16 = vpop.eup %4575  ;;  %v2042_v32 = vmul.f32 %v4574_v62, %v5943_v48 }
 0x710   : > { %v4578_v4 = vpop.eup %4577  ;;  %v2114_v31 = vadd.f32 %v6114_v46, %v2097_v59  ;;  %v2029_v57 = vmul.f32 %v4576_v16, %v5940_v24 }
 0x711   : > { %v3496_v12 = vadd.f32 -1.0, %v4578_v4 }
 0x712   : > { %v2151_v50 = vmul.f32 1.442695, %v2114_v31  ;;  %v2055_v5 = vadd.f32 %v2042_v32, %v2029_v57  ;;  %vm2127_vm10 = vcmp.gt.f32.partialorder %v2114_v31, 0.0 }
 0x713   : > { %v2177_v44 = vsel %vm2125_vm8, %v2112_v19, %v3496_v12 }
 0x714   : > { %4049 = vmatmul.mubr.f32.gmra.mrb[70].mxu0 %v2177_v44  ;;  %4581 = vpow2.f32 %v2151_v50  ;;  %v2081_v61 = vmul.f32 %v2068_v6, %v2055_v5  ;;  %v2859_v6 = vld [vmem:[#allocation5 + $0x280] sm:$0xff]  ;;  %v2860_v50 = vld [vmem:[#allocation5 + $0x288] sm:$0xff] }
 0x715   : > { %4051 = vmatprep.mubr.msk.f32.mxu0 %vm4882_vm0, %v4883_v1  ;;  %v4252_v5 = vpack.c.bf16 %v2860_v50, %v2859_v6  ;;  %v2873_v50 = vld [vmem:[#allocation5 + $0x2f0] sm:$0xff] }
 0x716   : > { %v4580_v39 = vpop.eup %4579  ;;  %v2098_v37 = vmul.f32 %v6104_v21, %v2081_v61 }
 0x717   : > { %v3497_v13 = vadd.f32 -1.0, %v4580_v39  ;;  %4253 = vmatpush3.bf16.msra.mxu1 %v4252_v5  ;;  %v2874_v5 = vld [vmem:[#allocation5 + $0x2f8] sm:$0xff] }
 0x718   : > { %v2115_v43 = vadd.f32 %v6114_v46, %v2098_v37  ;;  %v6292_v46 = vrot.slane %v6109_v20, %v988_v54  ;;  %v2861_v37 = vld [vmem:[#allocation5 + $0x290] sm:$0xff]  ;;  %4254 = vmatprep.subr.bf16.mxu1 %v4881_v0 }
 0x719   : > { %v2178_v29 = vsel %vm2126_vm9, %v2113_v45, %v3497_v13  ;;  %v2862_v13 = vld [vmem:[#allocation5 + $0x298] sm:$0xff] }
 0x71a   : > { %4052 = vmatmul.mubr.f32.gmra.mrb[72].mxu0 %v2178_v29  ;;  %v2153_v28 = vmul.f32 1.442695, %v2115_v43  ;;  %vm2128_vm11 = vcmp.gt.f32.partialorder %v2115_v43, 0.0 }
 0x71b   : > { %4054 = vmatprep.mubr.msk.f32.mxu0 %vm4882_vm0, %v4883_v1 }
 0x71c   : > { %4583 = vpow2.f32 %v2153_v28 }
 0x71e   : > { %v4582_v23 = vpop.eup %4581 }
 0x71f   : > { %v3498_v19 = vadd.f32 -1.0, %v4582_v23 }
 0x721   : > { %v2179_v47 = vsel %vm2127_vm10, %v2114_v31, %v3498_v19  ;;  %vm233_vm10 = vcmp.lt.s32.totalorder %v5930_v34, 8 }
 0x722   : > { %4055 = vmatmul.mubr.f32.gmra.mrb[74].mxu0 %v2179_v47 }
 0x723   : > { %4057 = vmatprep.mubr.msk.f32.mxu0 %vm4882_vm0, %v4883_v1 }
 0x726   : > { %v4584_v21 = vpop.eup %4583 }
 0x727   : > { %v3499_v3 = vadd.f32 -1.0, %v4584_v21  ;;  %v2863_v21 = vld [vmem:[#allocation5 + $0x2a0] sm:$0xff] }
 0x729   : > { %v2180_v26 = vsel %vm2128_vm11, %v2115_v43, %v3499_v3  ;;  %v4255_v43 = vpack.c.bf16 %v2862_v13, %v2861_v37  ;;  %v2864_v3 = vld [vmem:[#allocation5 + $0x2a8] sm:$0xff] }
 0x72a   : > { %4058 = vmatmul.mubr.f32.gmra.mrb[76].mxu0 %v2180_v26  ;;  %v4258_v26 = vpack.c.bf16 %v2864_v3, %v2863_v21 }
 0x72b   : > { %4256 = vmatpush3.bf16.msra.mxu1 %v4255_v43 }
 0x72c   : > { %4257 = vmatprep.subr.bf16.mxu1 %v4881_v0 }
 0x72f   : > { %4259 = vmatpush3.bf16.msra.mxu1 %v4258_v26 }
 0x730   : > { %4260 = vmatprep.subr.bf16.mxu1 %v4881_v0 }
 0x79f   : > { %v2267_v9 = vpop.f32.mrb[52].mxu0 }
 0x7a0   : > { %v6295_v52 = vadd.f32 %v2267_v9, %v6292_v46  ;;  %v4023_v55 = vpop.f32.mrb[53].mxu0 }
 0x7a2   : > { %v2422_v51 = vmul.f32 %v5943_v48, %v6295_v52  ;;  %v2344_v63 = vmul.f32 %v5940_v24, %v6295_v52  ;;  %v2331_v56 = vmul.f32 %v6295_v52, %v6295_v52 }
 0x7a4   : > { %2435 = vadd.xlane.f32.xlu1 %v2422_v51  ;;  %2357 = vadd.xlane.f32.xlu0 %v2344_v63  ;;  %v2461_v53 = vmul.f32 %v5943_v48, %v2331_v56  ;;  %v2383_v54 = vmul.f32 %v5940_v24, %v2331_v56  ;;  %v2865_v63 = vld [vmem:[#allocation5 + $0x2b0] sm:$0xff]  ;;  %v2866_v56 = vld [vmem:[#allocation5 + $0x2b8] sm:$0xff] }
 0x7a7   : > { %v2272_v20 = vpop.f32.mrb[54].mxu0 }
 0x7a8   : > { %v6306_v42 = vadd.f32 %v2272_v20, %v6292_v46  ;;  %2474 = vadd.xlane.f32.xlu1 %v2461_v53  ;;  %2396 = vadd.xlane.f32.xlu0 %v2383_v54  ;;  %v4026_v30 = vpop.f32.mrb[55].mxu0  ;;  %v4261_v53 = vpack.c.bf16 %v2866_v56, %v2865_v63 }
 0x7aa   : > { %v2423_v60 = vmul.f32 %v5943_v48, %v6306_v42  ;;  %v2345_v35 = vmul.f32 %v5940_v24, %v6306_v42  ;;  %v2332_v49 = vmul.f32 %v6306_v42, %v6306_v42  ;;  %4262 = vmatpush3.bf16.msra.mxu1 %v4261_v53 }
 0x7ab   : > { %4263 = vmatprep.subr.bf16.mxu1 %v4881_v0 }
 0x7ac   : > { %2437 = vadd.xlane.f32.xlu1 %v2423_v60  ;;  %2359 = vadd.xlane.f32.xlu0 %v2345_v35  ;;  %v2462_v17 = vmul.f32 %v5943_v48, %v2332_v49  ;;  %v2384_v15 = vmul.f32 %v5940_v24, %v2332_v49  ;;  %v2867_v49 = vld [vmem:[#allocation5 + $0x2c0] sm:$0xff] }
 0x7af   : > { %v2277_v45 = vpop.f32.mrb[56].mxu0 }
 0x7b0   : > { %v6317_v27 = vadd.f32 %v2277_v45, %v6292_v46  ;;  %2476 = vadd.xlane.f32.xlu1 %v2462_v17  ;;  %2398 = vadd.xlane.f32.xlu0 %v2384_v15  ;;  %v4029_v25 = vpop.f32.mrb[57].mxu0  ;;  %v2868_v17 = vld [vmem:[#allocation5 + $0x2c8] sm:$0xff] }
 0x7b1   : > { %v4264_v15 = vpack.c.bf16 %v2868_v17, %v2867_v49 }
 0x7b2   : > { %v2424_v38 = vmul.f32 %v5943_v48, %v6317_v27  ;;  %v2346_v14 = vmul.f32 %v5940_v24, %v6317_v27  ;;  %v2333_v10 = vmul.f32 %v6317_v27, %v6317_v27 }
 0x7b3   : > { %4265 = vmatpush3.bf16.msra.mxu1 %v4264_v15 }
 0x7b4   : > { %2439 = vadd.xlane.f32.xlu1 %v2424_v38  ;;  %2361 = vadd.xlane.f32.xlu0 %v2346_v14  ;;  %v2463_v18 = vmul.f32 %v5943_v48, %v2333_v10  ;;  %v2385_v22 = vmul.f32 %v5940_v24, %v2333_v10  ;;  %v2869_v14 = vld [vmem:[#allocation5 + $0x2d0] sm:$0xff]  ;;  %v2870_v10 = vld [vmem:[#allocation5 + $0x2d8] sm:$0xff] }
 0x7b5   : > { %4266 = vmatprep.subr.bf16.mxu1 %v4881_v0 }
 0x7b7   : > { %v2282_v11 = vpop.f32.mrb[58].mxu0 }
 0x7b8   : > { %v6328_v58 = vadd.f32 %v2282_v11, %v6292_v46  ;;  %2478 = vadd.xlane.f32.xlu1 %v2463_v18  ;;  %2400 = vadd.xlane.f32.xlu0 %v2385_v22  ;;  %v4032_v62 = vpop.f32.mrb[59].mxu0  ;;  %v4267_v18 = vpack.c.bf16 %v2870_v10, %v2869_v14 }
 0x7ba   : > { %v2425_v8 = vmul.f32 %v5943_v48, %v6328_v58  ;;  %v2347_v59 = vmul.f32 %v5940_v24, %v6328_v58  ;;  %v2334_v16 = vmul.f32 %v6328_v58, %v6328_v58  ;;  %4268 = vmatpush3.bf16.msra.mxu1 %v4267_v18 }
 0x7bb   : > { %4269 = vmatprep.subr.bf16.mxu1 %v4881_v0 }
 0x7bc   : > { %2441 = vadd.xlane.f32.xlu1 %v2425_v8  ;;  %2363 = vadd.xlane.f32.xlu0 %v2347_v59  ;;  %v2464_v32 = vmul.f32 %v5943_v48, %v2334_v16  ;;  %v2386_v4 = vmul.f32 %v5940_v24, %v2334_v16  ;;  %v2871_v16 = vld [vmem:[#allocation5 + $0x2e0] sm:$0xff] }
 0x7bf   : > { %v2287_v31 = vpop.f32.mrb[60].mxu0 }
 0x7c0   : > { %v6339_v57 = vadd.f32 %v2287_v31, %v6292_v46  ;;  %2480 = vadd.xlane.f32.xlu1 %v2464_v32  ;;  %2402 = vadd.xlane.f32.xlu0 %v2386_v4  ;;  %v4035_v12 = vpop.f32.mrb[61].mxu0  ;;  %v2872_v32 = vld [vmem:[#allocation5 + $0x2e8] sm:$0xff] }
 0x7c1   : > { %v4270_v4 = vpack.c.bf16 %v2872_v32, %v2871_v16 }
 0x7c2   : > { %v2426_v44 = vmul.f32 %v5943_v48, %v6339_v57  ;;  %v2348_v61 = vmul.f32 %v5940_v24, %v6339_v57  ;;  %v2335_v39 = vmul.f32 %v6339_v57, %v6339_v57 }
 0x7c3   : > { %4271 = vmatpush3.bf16.msra.mxu1 %v4270_v4 }
 0x7c4   : > { %2443 = vadd.xlane.f32.xlu1 %v2426_v44  ;;  %2365 = vadd.xlane.f32.xlu0 %v2348_v61  ;;  %v2465_v29 = vmul.f32 %v5943_v48, %v2335_v39  ;;  %v2387_v28 = vmul.f32 %v5940_v24, %v2335_v39  ;;  %v4273_v44 = vpack.c.bf16 %v2874_v5, %v2873_v50 }
 0x7c5   : > { %4272 = vmatprep.subr.bf16.mxu1 %v4881_v0 }
 0x7c7   : > { %v2292_v23 = vpop.f32.mrb[62].mxu0  ;;  %4274 = vmatpush3.bf16.msra.mxu1 %v4273_v44 }
 0x7c8   : > { %v6351_v19 = vadd.f32 %v2292_v23, %v6292_v46  ;;  %2482 = vadd.xlane.f32.xlu1 %v2465_v29  ;;  %2404 = vadd.xlane.f32.xlu0 %v2387_v28  ;;  %v4038_v47 = vpop.f32.mrb[63].mxu0 }
 0x7ca   : > { %v2427_v9 = vmul.f32 %v5943_v48, %v6351_v19  ;;  %v2349_v55 = vmul.f32 %v5940_v24, %v6351_v19  ;;  %v2336_v51 = vmul.f32 %v6351_v19, %v6351_v19 }
 0x7cc   : > { %2445 = vadd.xlane.f32.xlu1 %v2427_v9  ;;  %2367 = vadd.xlane.f32.xlu0 %v2349_v55  ;;  %v2466_v54 = vmul.f32 %v5943_v48, %v2336_v51  ;;  %v2388_v20 = vmul.f32 %v5940_v24, %v2336_v51 }
 0x7cf   : > { %v2297_v30 = vpop.f32.mrb[64].mxu0 }
 0x7d0   : > { %v6364_v60 = vadd.f32 %v2297_v30, %v6292_v46  ;;  %2484 = vadd.xlane.f32.xlu1 %v2466_v54  ;;  %2406 = vadd.xlane.f32.xlu0 %v2388_v20  ;;  %v4041_v35 = vpop.f32.mrb[65].mxu0 }
 0x7d2   : > { %v2428_v45 = vmul.f32 %v5943_v48, %v6364_v60  ;;  %v2350_v25 = vmul.f32 %v5940_v24, %v6364_v60  ;;  %v2337_v38 = vmul.f32 %v6364_v60, %v6364_v60 }
 0x7d4   : > { %2447 = vadd.xlane.f32.xlu1 %v2428_v45  ;;  %2369 = vadd.xlane.f32.xlu0 %v2350_v25  ;;  %v2467_v22 = vmul.f32 %v5943_v48, %v2337_v38  ;;  %v2389_v11 = vmul.f32 %v5940_v24, %v2337_v38 }
 0x7d7   : > { %v2302_v62 = vpop.f32.mrb[66].mxu0 }
 0x7d8   : > { %v6377_v8 = vadd.f32 %v2302_v62, %v6292_v46  ;;  %2486 = vadd.xlane.f32.xlu1 %v2467_v22  ;;  %2408 = vadd.xlane.f32.xlu0 %v2389_v11  ;;  %v4044_v59 = vpop.f32.mrb[67].mxu0 }
 0x7da   : > { %v2429_v31 = vmul.f32 %v5943_v48, %v6377_v8  ;;  %v2351_v12 = vmul.f32 %v5940_v24, %v6377_v8  ;;  %v2338_v6 = vmul.f32 %v6377_v8, %v6377_v8 }
 0x7dc   : > { %2449 = vadd.xlane.f32.xlu1 %v2429_v31  ;;  %2371 = vadd.xlane.f32.xlu0 %v2351_v12  ;;  %v2468_v61 = vmul.f32 %v5943_v48, %v2338_v6  ;;  %v2390_v39 = vmul.f32 %v5940_v24, %v2338_v6 }
 0x7df   : > { %v2307_v37 = vpop.f32.mrb[68].mxu0 }
 0x7e0   : > { %v6390_v13 = vadd.f32 %v2307_v37, %v6292_v46  ;;  %2488 = vadd.xlane.f32.xlu1 %v2468_v61  ;;  %2410 = vadd.xlane.f32.xlu0 %v2390_v39  ;;  %v4047_v43 = vpop.f32.mrb[69].mxu0 }
 0x7e2   : > { %v2430_v29 = vmul.f32 %v5943_v48, %v6390_v13  ;;  %v2352_v28 = vmul.f32 %v5940_v24, %v6390_v13  ;;  %v2339_v0 = vmul.f32 %v6390_v13, %v6390_v13 }
 0x7e4   : > { %2451 = vadd.xlane.f32.xlu1 %v2430_v29  ;;  %2373 = vadd.xlane.f32.xlu0 %v2352_v28  ;;  %v2469_v23 = vmul.f32 %v5943_v48, %v2339_v0  ;;  %v2391_v47 = vmul.f32 %v5940_v24, %v2339_v0 }
 0x7e7   : > { %v2312_v21 = vpop.f32.mrb[70].mxu0 }
 0x7e8   : > { %v6401_v3 = vadd.f32 %v2312_v21, %v6292_v46  ;;  %2490 = vadd.xlane.f32.xlu1 %v2469_v23  ;;  %2412 = vadd.xlane.f32.xlu0 %v2391_v47  ;;  %v4050_v26 = vpop.f32.mrb[71].mxu0 }
 0x7ea   : > { %v2431_v9 = vmul.f32 %v5943_v48, %v6401_v3  ;;  %v2353_v55 = vmul.f32 %v5940_v24, %v6401_v3  ;;  %v2340_v51 = vmul.f32 %v6401_v3, %v6401_v3 }
 0x7ec   : > { %2453 = vadd.xlane.f32.xlu1 %v2431_v9  ;;  %2375 = vadd.xlane.f32.xlu0 %v2353_v55  ;;  %v2470_v53 = vmul.f32 %v5943_v48, %v2340_v51  ;;  %v2392_v54 = vmul.f32 %v5940_v24, %v2340_v51 }
 0x7ed   : > { %v2317_v63 = vpop.f32.mrb[72].mxu0 }
 0x7ee   : > { %v6410_v56 = vadd.f32 %v2317_v63, %v6292_v46  ;;  %v4053_v20 = vpop.f32.mrb[73].mxu0 }
 0x7f0   : > { %2492 = vadd.xlane.f32.xlu1 %v2470_v53  ;;  %2414 = vadd.xlane.f32.xlu0 %v2392_v54  ;;  %v2432_v30 = vmul.f32 %v5943_v48, %v6410_v56  ;;  %v2354_v35 = vmul.f32 %v5940_v24, %v6410_v56  ;;  %v2341_v49 = vmul.f32 %v6410_v56, %v6410_v56 }
 0x7f2   : > { %v2471_v45 = vmul.f32 %v5943_v48, %v2341_v49  ;;  %v2393_v25 = vmul.f32 %v5940_v24, %v2341_v49 }
 0x7f4   : > { %2455 = vadd.xlane.f32.xlu1 %v2432_v30  ;;  %2377 = vadd.xlane.f32.xlu0 %v2354_v35 }
 0x7f5   : > { %v2322_v17 = vpop.f32.mrb[74].mxu0 }
 0x7f6   : > { %v6421_v15 = vadd.f32 %v2322_v17, %v6292_v46  ;;  %v4056_v38 = vpop.f32.mrb[75].mxu0 }
 0x7f8   : > { %2494 = vadd.xlane.f32.xlu1 %v2471_v45  ;;  %2416 = vadd.xlane.f32.xlu0 %v2393_v25  ;;  %v2433_v14 = vmul.f32 %v5943_v48, %v6421_v15  ;;  %v2355_v10 = vmul.f32 %v5940_v24, %v6421_v15  ;;  %v2342_v18 = vmul.f32 %v6421_v15, %v6421_v15 }
 0x7fa   : > { %v2472_v62 = vmul.f32 %v5943_v48, %v2342_v18  ;;  %v2394_v59 = vmul.f32 %v5940_v24, %v2342_v18 }
 0x7fc   : > { %2457 = vadd.xlane.f32.xlu1 %v2433_v14  ;;  %2379 = vadd.xlane.f32.xlu0 %v2355_v10 }
 0x7fd   : > { %v2327_v22 = vpop.f32.mrb[76].mxu0 }
 0x7fe   : > { %v6432_v11 = vadd.f32 %v2327_v22, %v6292_v46  ;;  %v4059_v16 = vpop.f32.mrb[77].mxu0 }
 0x800   : > { %2496 = vadd.xlane.f32.xlu1 %v2472_v62  ;;  %2418 = vadd.xlane.f32.xlu0 %v2394_v59  ;;  %v2434_v32 = vmul.f32 %v5943_v48, %v6432_v11  ;;  %v2356_v4 = vmul.f32 %v5940_v24, %v6432_v11  ;;  %v2343_v31 = vmul.f32 %v6432_v11, %v6432_v11 }
 0x802   : > { %v2473_v46 = vmul.f32 %v5943_v48, %v2343_v31  ;;  %v2395_v12 = vmul.f32 %v5940_v24, %v2343_v31 }
 0x804   : > { %2459 = vadd.xlane.f32.xlu1 %v2434_v32  ;;  %2381 = vadd.xlane.f32.xlu0 %v2356_v4 }
 0x808   : > { %2498 = vadd.xlane.f32.xlu1 %v2473_v46  ;;  %2420 = vadd.xlane.f32.xlu0 %v2395_v12 }
 0x831   : > { %v2436_v6 = vpop.xlane.xlu1 %2435  ;;  %v2358_v50 = vpop.xlane.xlu0 %2357 }
 0x832   : > { %v2513_v5 = vmul.f32 0.02, %v2436_v6  ;;  %v2500_v44 = vmul.f32 0.02, %v2358_v50 }
 0x834   : > { %v2604_v37 = vmul.f32 %v2513_v5, %v2513_v5  ;;  %v2539_v43 = vmul.f32 %v2500_v44, %v2500_v44  ;;  %v2669_v45 = vmul.f32 %v5943_v48, %v2513_v5  ;;  %v2656_v25 = vmul.f32 %v5940_v24, %v2500_v44 }
 0x835   : > { %v2475_v61 = vpop.xlane.xlu1 %2474  ;;  %v2397_v39 = vpop.xlane.xlu0 %2396 }
 0x836   : > { %v2591_v29 = vmul.f32 0.02, %v2475_v61  ;;  %v2526_v28 = vmul.f32 0.02, %v2397_v39  ;;  %v2682_v59 = vadd.f32 %v2669_v45, %v2656_v25 }
 0x838   : > { %v2617_v0 = vsub.f32 %v2591_v29, %v2604_v37  ;;  %v2552_v23 = vsub.f32 %v2526_v28, %v2539_v43  ;;  %v2734_v37 = vsub.f32 %v6295_v52, %v2682_v59 }
 0x839   : > { %v2438_v47 = vpop.xlane.xlu1 %2437  ;;  %v2360_v21 = vpop.xlane.xlu0 %2359 }
 0x83a   : > { %v2630_v26 = vadd.f32 1e-05, %v2617_v0  ;;  %v2565_v9 = vadd.f32 1e-05, %v2552_v23  ;;  %v2514_v55 = vmul.f32 0.02, %v2438_v47 }
 0x83b   : > { %v2501_v51 = vmul.f32 0.02, %v2360_v21  ;;  %v6451_v23 = vld [vmem:[#allocation7 + $0x8] sm:$0xff] }
 0x83c   : > { %4585 = vrsqrt.f32 %v2630_v26  ;;  %v2605_v54 = vmul.f32 %v2514_v55, %v2514_v55  ;;  %v2670_v43 = vmul.f32 %v5943_v48, %v2514_v55  ;;  %v6456_v47 = vrot.slane %v6451_v23, %v1005_v36 }
 0x83d   : > { %4587 = vrsqrt.f32 %v2565_v9  ;;  %v2477_v63 = vpop.xlane.xlu1 %2476  ;;  %v2399_v53 = vpop.xlane.xlu0 %2398  ;;  %v2540_v20 = vmul.f32 %v2501_v51, %v2501_v51  ;;  %v2657_v29 = vmul.f32 %v5940_v24, %v2501_v51  ;;  %v6461_v52 = vrot.slane %v6451_v23, %v1103_v2 }
 0x83e   : > { %v2592_v30 = vmul.f32 0.02, %v2477_v63  ;;  %v2527_v35 = vmul.f32 0.02, %v2399_v53 }
 0x83f   : > { %v2683_v51 = vadd.f32 %v2670_v43, %v2657_v29 }
 0x840   : > { %v2618_v49 = vsub.f32 %v2592_v30, %v2605_v54  ;;  %v2553_v17 = vsub.f32 %v2527_v35, %v2540_v20 }
 0x841   : > { %v2440_v38 = vpop.xlane.xlu1 %2439  ;;  %v2362_v14 = vpop.xlane.xlu0 %2361  ;;  %v2735_v59 = vsub.f32 %v6306_v42, %v2683_v51 }
 0x842   : > { %v2631_v10 = vadd.f32 1e-05, %v2618_v49  ;;  %v2566_v18 = vadd.f32 1e-05, %v2553_v17  ;;  %v2515_v22 = vmul.f32 0.02, %v2440_v38 }
 0x843   : > { %v2502_v62 = vmul.f32 0.02, %v2362_v14 }
 0x844   : > { %4589 = vrsqrt.f32 %v2631_v10  ;;  %v2606_v31 = vmul.f32 %v2515_v22, %v2515_v22 }
 0x845   : > { %4591 = vrsqrt.f32 %v2566_v18  ;;  %v2479_v16 = vpop.xlane.xlu1 %2478  ;;  %v2401_v32 = vpop.xlane.xlu0 %2400  ;;  %v2541_v46 = vmul.f32 %v2502_v62, %v2502_v62 }
 0x846   : > { %v4586_v4 = vpop.eup %4585  ;;  %v2593_v12 = vmul.f32 0.02, %v2479_v16  ;;  %v2528_v6 = vmul.f32 0.02, %v2401_v32  ;;  %v2671_v16 = vmul.f32 %v5943_v48, %v2515_v22  ;;  %v2658_v32 = vmul.f32 %v5940_v24, %v2502_v62 }
 0x847   : > { %v4588_v50 = vpop.eup %4587  ;;  %v2708_v5 = vmul.f32 %v4586_v4, %v5943_v48 }
 0x848   : > { %v2695_v44 = vmul.f32 %v4588_v50, %v5940_v24  ;;  %v2619_v61 = vsub.f32 %v2593_v12, %v2606_v31  ;;  %v2554_v39 = vsub.f32 %v2528_v6, %v2541_v46 }
 0x849   : > { %v2442_v28 = vpop.xlane.xlu1 %2441  ;;  %v2364_v0 = vpop.xlane.xlu0 %2363 }
 0x84a   : > { %v2632_v21 = vadd.f32 1e-05, %v2619_v61  ;;  %v2567_v26 = vadd.f32 1e-05, %v2554_v39  ;;  %v2516_v9 = vmul.f32 0.02, %v2442_v28  ;;  %v2721_v63 = vadd.f32 %v2708_v5, %v2695_v44 }
 0x84b   : > { %v2503_v53 = vmul.f32 0.02, %v2364_v0  ;;  %v2684_v39 = vadd.f32 %v2671_v16, %v2658_v32 }
 0x84c   : > { %4593 = vrsqrt.f32 %v2632_v21  ;;  %v2747_v55 = vmul.f32 %v2734_v37, %v2721_v63  ;;  %v2607_v54 = vmul.f32 %v2516_v9, %v2516_v9 }
 0x84d   : > { %4595 = vrsqrt.f32 %v2567_v26  ;;  %v2481_v20 = vpop.xlane.xlu1 %2480  ;;  %v2403_v30 = vpop.xlane.xlu0 %2402  ;;  %v2542_v36 = vmul.f32 %v2503_v53, %v2503_v53  ;;  %v2672_v26 = vmul.f32 %v5943_v48, %v2516_v9  ;;  %v2659_v63 = vmul.f32 %v5940_v24, %v2503_v53 }
 0x84e   : > { %v4590_v35 = vpop.eup %4589  ;;  %v2594_v49 = vmul.f32 0.02, %v2481_v20  ;;  %v2529_v17 = vmul.f32 0.02, %v2403_v30  ;;  %v2764_v45 = vmul.f32 %v6456_v47, %v2747_v55 }
 0x84f   : > { %v4592_v25 = vpop.eup %4591  ;;  %v2709_v38 = vmul.f32 %v4590_v35, %v5943_v48  ;;  %v2736_v35 = vsub.f32 %v6317_v27, %v2684_v39  ;;  %v2685_v9 = vadd.f32 %v2672_v26, %v2659_v63 }
 0x850   : > { %v2620_v14 = vsub.f32 %v2594_v49, %v2607_v54  ;;  %v2555_v10 = vsub.f32 %v2529_v17, %v2542_v36  ;;  %v6466_v2 = vadd.f32 %v6461_v52, %v2764_v45  ;;  %v2696_v18 = vmul.f32 %v4592_v25, %v5940_v24 }
 0x851   : > { %v2444_v4 = vpop.xlane.xlu1 %2443  ;;  %v2366_v31 = vpop.xlane.xlu0 %2365 }
 0x852   : > { %v2633_v46 = vadd.f32 1e-05, %v2620_v14  ;;  %v2568_v12 = vadd.f32 1e-05, %v2555_v10  ;;  %v2517_v6 = vmul.f32 0.02, %v2444_v4  ;;  %v2722_v50 = vadd.f32 %v2709_v38, %v2696_v18 }
 0x853   : > { %v2504_v5 = vmul.f32 0.02, %v2366_v31  ;;  %v2807_v44 = vmul.f32 1.442695, %v6466_v2  ;;  %vm2794_vm12 = vcmp.gt.f32.partialorder %v6466_v2, 0.0 }
 0x854   : > { %4597 = vrsqrt.f32 %v2633_v46  ;;  %v2748_v61 = vmul.f32 %v2735_v59, %v2722_v50  ;;  %v2608_v37 = vmul.f32 %v2517_v6, %v2517_v6  ;;  %v2737_v50 = vsub.f32 %v6328_v58, %v2685_v9 }
 0x855   : > { %4599 = vrsqrt.f32 %v2568_v12  ;;  %v2543_v43 = vmul.f32 %v2504_v5, %v2504_v5  ;;  %v2483_v42 = vpop.xlane.xlu1 %2482  ;;  %v2405_v29 = vpop.xlane.xlu0 %2404 }
 0x856   : > { %v4594_v22 = vpop.eup %4593  ;;  %v2595_v28 = vmul.f32 0.02, %v2483_v42  ;;  %v2530_v62 = vmul.f32 0.02, %v2405_v29  ;;  %4601 = vpow2.f32 %v2807_v44  ;;  %v2765_v0 = vmul.f32 %v6456_v47, %v2748_v61 }
 0x857   : > { %v4596_v21 = vpop.eup %4595  ;;  %v2710_v55 = vmul.f32 %v4594_v22, %v5943_v48  ;;  %v2673_v29 = vmul.f32 %v5943_v48, %v2517_v6  ;;  %v2660_v22 = vmul.f32 %v5940_v24, %v2504_v5 }
 0x858   : > { %v2621_v51 = vsub.f32 %v2595_v28, %v2608_v37  ;;  %v2556_v54 = vsub.f32 %v2530_v62, %v2543_v43  ;;  %v6478_v20 = vadd.f32 %v6461_v52, %v2765_v0  ;;  %v2697_v30 = vmul.f32 %v4596_v21, %v5940_v24 }
 0x859   : > { %v2446_v36 = vpop.xlane.xlu1 %2445  ;;  %v2368_v49 = vpop.xlane.xlu0 %2367 }
 0x85a   : > { %v2634_v17 = vadd.f32 1e-05, %v2621_v51  ;;  %v2569_v45 = vadd.f32 1e-05, %v2556_v54  ;;  %v2518_v25 = vmul.f32 0.02, %v2446_v36  ;;  %v2723_v38 = vadd.f32 %v2710_v55, %v2697_v30 }
 0x85b   : > { %v2505_v14 = vmul.f32 0.02, %v2368_v49  ;;  %v2809_v53 = vmul.f32 1.442695, %v6478_v20  ;;  %v2686_v30 = vadd.f32 %v2673_v29, %v2660_v22  ;;  %vm2795_vm13 = vcmp.gt.f32.partialorder %v6478_v20, 0.0 }
 0x85c   : > { %4603 = vrsqrt.f32 %v2634_v17  ;;  %v2749_v10 = vmul.f32 %v2736_v35, %v2723_v38  ;;  %v2609_v18 = vmul.f32 %v2518_v25, %v2518_v25 }
 0x85d   : > { %4605 = vrsqrt.f32 %v2569_v45  ;;  %v2544_v59 = vmul.f32 %v2505_v14, %v2505_v14  ;;  %v2485_v16 = vpop.xlane.xlu1 %2484  ;;  %v2407_v32 = vpop.xlane.xlu0 %2406 }
 0x85e   : > { %v4598_v4 = vpop.eup %4597  ;;  %v2596_v31 = vmul.f32 0.02, %v2485_v16  ;;  %v2531_v27 = vmul.f32 0.02, %v2407_v32  ;;  %4607 = vpow2.f32 %v2809_v53  ;;  %v2766_v46 = vmul.f32 %v6456_v47, %v2749_v10 }
 0x85f   : > { %v4600_v12 = vpop.eup %4599  ;;  %v2711_v44 = vmul.f32 %v4598_v4, %v5943_v48  ;;  %v2674_v53 = vmul.f32 %v5943_v48, %v2518_v25  ;;  %v2661_v10 = vmul.f32 %v5940_v24, %v2505_v14 }
 0x860   : > { %v4602_v61 = vpop.eup %4601  ;;  %v2622_v39 = vsub.f32 %v2596_v31, %v2609_v18  ;;  %v2557_v37 = vsub.f32 %v2531_v27, %v2544_v59  ;;  %v6487_v43 = vadd.f32 %v6461_v52, %v2766_v46  ;;  %v2698_v42 = vmul.f32 %v4600_v12, %v5940_v24 }
 0x861   : > { %v2448_v28 = vpop.xlane.xlu1 %2447  ;;  %v3500_v62 = vadd.f32 -1.0, %v4602_v61  ;;  %v2370_v0 = vpop.xlane.xlu0 %2369  ;;  %v2738_v27 = vsub.f32 %v6339_v57, %v2686_v30 }
 0x862   : > { %v2635_v58 = vadd.f32 1e-05, %v2622_v39  ;;  %v2570_v21 = vadd.f32 1e-05, %v2557_v37  ;;  %v6493_v26 = vmul.f32 0.02, %v2448_v28  ;;  %v2724_v63 = vadd.f32 %v2711_v44, %v2698_v42 }
 0x863   : > { %v2846_v55 = vsel %vm2794_vm12, %v6466_v2, %v3500_v62  ;;  %v2506_v51 = vmul.f32 0.02, %v2370_v0  ;;  %v2811_v54 = vmul.f32 1.442695, %v6487_v43  ;;  %v2687_v39 = vadd.f32 %v2674_v53, %v2661_v10 }
 0x864   : > { %4609 = vrsqrt.f32 %v2635_v58  ;;  %4093 = vmatmul.mubr.f32.vlgmr.msra.gmra.mrb[52].mxu1 %v2846_v55  ;;  %v2750_v6 = vmul.f32 %v2737_v50, %v2724_v63  ;;  %v2610_v5 = vmul.f32 %v6493_v26, %v6493_v26  ;;  %vm2796_vm14 = vcmp.gt.f32.partialorder %v6487_v43, 0.0 }
 0x865   : > { %4611 = vrsqrt.f32 %v2570_v21  ;;  %v2545_v35 = vmul.f32 %v2506_v51, %v2506_v51  ;;  %v2487_v36 = vpop.xlane.xlu1 %2486  ;;  %v2409_v49 = vpop.xlane.xlu0 %2408  ;;  %4095 = vmatprep.mubr.msk.f32.mxu1 %vm4882_vm0, %v4883_v1 }
 0x866   : > { %v4604_v17 = vpop.eup %4603  ;;  %v2597_v45 = vmul.f32 0.02, %v2487_v36  ;;  %v2532_v2 = vmul.f32 0.02, %v2409_v49  ;;  %4613 = vpow2.f32 %v2811_v54  ;;  %v2767_v38 = vmul.f32 %v6456_v47, %v2750_v6 }
 0x867   : > { %v4606_v9 = vpop.eup %4605  ;;  %v2712_v18 = vmul.f32 %v4604_v17, %v5943_v48  ;;  %v2739_v54 = vsub.f32 %v6351_v19, %v2687_v39  ;;  %v2675_v17 = vmul.f32 %v5943_v48, %v6493_v26 }
 0x868   : > { %v4608_v59 = vpop.eup %4607  ;;  %v2623_v16 = vsub.f32 %v2597_v45, %v2610_v5  ;;  %v2558_v32 = vsub.f32 %v2532_v2, %v2545_v35  ;;  %v6506_v4 = vadd.f32 %v6461_v52, %v2767_v38  ;;  %v2699_v31 = vmul.f32 %v4606_v9, %v5940_v24 }
 0x869   : > { %v2450_v46 = vpop.xlane.xlu1 %2449  ;;  %v3501_v12 = vadd.f32 -1.0, %v4608_v59  ;;  %v2372_v50 = vpop.xlane.xlu0 %2371  ;;  %v2662_v45 = vmul.f32 %v5940_v24, %v2506_v51 }
 0x86a   : > { %v2636_v25 = vadd.f32 1e-05, %v2623_v16  ;;  %v2571_v44 = vadd.f32 1e-05, %v2558_v32  ;;  %v2520_v14 = vmul.f32 0.02, %v2450_v46  ;;  %v2725_v61 = vadd.f32 %v2712_v18, %v2699_v31 }
 0x86b   : > { %v2847_v37 = vsel %vm2795_vm13, %v6478_v20, %v3501_v12  ;;  %v2507_v42 = vmul.f32 0.02, %v2372_v50  ;;  %v2813_v29 = vmul.f32 1.442695, %v6506_v4  ;;  %v2688_v31 = vadd.f32 %v2675_v17, %v2662_v45 }
 0x86c   : > { %4615 = vrsqrt.f32 %v2636_v25  ;;  %4096 = vmatmul.mubr.f32.gmra.mrb[54].mxu1 %v2847_v37  ;;  %v2751_v22 = vmul.f32 %v2738_v27, %v2725_v61  ;;  %v2611_v57 = vmul.f32 %v2520_v14, %v2520_v14  ;;  %v2676_v39 = vmul.f32 %v5943_v48, %v2520_v14 }
 0x86d   : > { %4617 = vrsqrt.f32 %v2571_v44  ;;  %v2546_v28 = vmul.f32 %v2507_v42, %v2507_v42  ;;  %v2489_v62 = vpop.xlane.xlu1 %2488  ;;  %v2411_v0 = vpop.xlane.xlu0 %2410  ;;  %4098 = vmatprep.mubr.msk.f32.mxu1 %vm4882_vm0, %v4883_v1  ;;  %v2663_v37 = vmul.f32 %v5940_v24, %v2507_v42  ;;  %vm2797_vm15 = vcmp.gt.f32.partialorder %v6506_v4, 0.0 }
 0x86e   : > { %v4610_v58 = vpop.eup %4609  ;;  %v2598_v21 = vmul.f32 0.02, %v2489_v62  ;;  %v2533_v63 = vmul.f32 0.02, %v2411_v0  ;;  %4619 = vpow2.f32 %v2813_v29  ;;  %v2768_v20 = vmul.f32 %v6456_v47, %v2751_v22 }
 0x86f   : > { %v4612_v55 = vpop.eup %4611  ;;  %v2713_v6 = vmul.f32 %v4610_v58, %v5943_v48  ;;  %v2740_v58 = vsub.f32 %v6364_v60, %v2688_v31 }
 0x870   : > { %v4614_v30 = vpop.eup %4613  ;;  %v2624_v5 = vsub.f32 %v2598_v21, %v2611_v57  ;;  %v2559_v35 = vsub.f32 %v2533_v63, %v2546_v28  ;;  %v6519_v36 = vadd.f32 %v6461_v52, %v2768_v20  ;;  %v2700_v49 = vmul.f32 %v4612_v55, %v5940_v24 }
 0x871   : > { %v2452_v2 = vpop.xlane.xlu1 %2451  ;;  %v3502_v38 = vadd.f32 -1.0, %v4614_v30  ;;  %v2374_v19 = vpop.xlane.xlu0 %2373 }
 0x872   : > { %v2637_v9 = vadd.f32 1e-05, %v2624_v5  ;;  %v2572_v53 = vadd.f32 1e-05, %v2559_v35  ;;  %v6526_v10 = vmul.f32 0.02, %v2452_v2  ;;  %v2726_v18 = vadd.f32 %v2713_v6, %v2700_v49 }
 0x873   : > { %v2848_v59 = vsel %vm2796_vm14, %v6487_v43, %v3502_v38  ;;  %v2508_v16 = vmul.f32 0.02, %v2374_v19  ;;  %v2815_v32 = vmul.f32 1.442695, %v6519_v36  ;;  %v2689_v6 = vadd.f32 %v2676_v39, %v2663_v37 }
 0x874   : > { %4621 = vrsqrt.f32 %v2637_v9  ;;  %4099 = vmatmul.mubr.f32.gmra.mrb[56].mxu1 %v2848_v59  ;;  %v2752_v26 = vmul.f32 %v2739_v54, %v2726_v18  ;;  %v2612_v51 = vmul.f32 %v6526_v10, %v6526_v10  ;;  %vm2798_vm1 = vcmp.gt.f32.partialorder %v6519_v36, 0.0 }
 0x875   : > { %4623 = vrsqrt.f32 %v2572_v53  ;;  %v2547_v27 = vmul.f32 %v2508_v16, %v2508_v16  ;;  %v2491_v46 = vpop.xlane.xlu1 %2490  ;;  %v2413_v12 = vpop.xlane.xlu0 %2412  ;;  %4101 = vmatprep.mubr.msk.f32.mxu1 %vm4882_vm0, %v4883_v1  ;;  %v2741_v18 = vsub.f32 %v6377_v8, %v2689_v6 }
 0x876   : > { %v4616_v50 = vpop.eup %4615  ;;  %v2599_v25 = vmul.f32 0.02, %v2491_v46  ;;  %v2534_v43 = vmul.f32 0.02, %v2413_v12  ;;  %4625 = vpow2.f32 %v2815_v32  ;;  %v2769_v44 = vmul.f32 %v6456_v47, %v2752_v26 }
 0x877   : > { %v4618_v61 = vpop.eup %4617  ;;  %v2714_v29 = vmul.f32 %v4616_v50, %v5943_v48  ;;  %v2677_v46 = vmul.f32 %v5943_v48, %v6526_v10  ;;  %v2664_v12 = vmul.f32 %v5940_v24, %v2508_v16 }
 0x878   : > { %v4620_v22 = vpop.eup %4619  ;;  %v2625_v57 = vsub.f32 %v2599_v25, %v2612_v51  ;;  %v2560_v28 = vsub.f32 %v2534_v43, %v2547_v27  ;;  %v6539_v62 = vadd.f32 %v6461_v52, %v2769_v44  ;;  %v2701_v0 = vmul.f32 %v4618_v61, %v5940_v24 }
 0x879   : > { %v2454_v21 = vpop.xlane.xlu1 %2453  ;;  %v3503_v63 = vadd.f32 -1.0, %v4620_v22  ;;  %v2376_v20 = vpop.xlane.xlu0 %2375 }
 0x87a   : > { %v2638_v14 = vadd.f32 1e-05, %v2625_v57  ;;  %v2573_v55 = vadd.f32 1e-05, %v2560_v28  ;;  %v2522_v42 = vmul.f32 0.02, %v2454_v21  ;;  %v2727_v54 = vadd.f32 %v2714_v29, %v2701_v0 }
 0x87b   : > { %v2849_v30 = vsel %vm2797_vm15, %v6506_v4, %v3503_v63  ;;  %v2509_v5 = vmul.f32 0.02, %v2376_v20  ;;  %v2817_v35 = vmul.f32 1.442695, %v6539_v62  ;;  %v2690_v57 = vadd.f32 %v2677_v46, %v2664_v12 }
 0x87c   : > { %4627 = vrsqrt.f32 %v2638_v14  ;;  %4102 = vmatmul.mubr.f32.gmra.mrb[58].mxu1 %v2849_v30  ;;  %v2753_v49 = vmul.f32 %v2740_v58, %v2727_v54  ;;  %v2613_v60 = vmul.f32 %v2522_v42, %v2522_v42  ;;  %vm2799_vm2 = vcmp.gt.f32.partialorder %v6539_v62, 0.0 }
 0x87d   : > { %4629 = vrsqrt.f32 %v2573_v55  ;;  %v2548_v17 = vmul.f32 %v2509_v5, %v2509_v5  ;;  %v2493_v45 = vpop.xlane.xlu1 %2492  ;;  %v2415_v2 = vpop.xlane.xlu0 %2414  ;;  %4104 = vmatprep.mubr.msk.f32.mxu1 %vm4882_vm0, %v4883_v1  ;;  %v2678_v55 = vmul.f32 %v5943_v48, %v2522_v42  ;;  %v2665_v54 = vmul.f32 %v5940_v24, %v2509_v5 }
 0x87e   : > { %v4622_v38 = vpop.eup %4621  ;;  %v2600_v19 = vmul.f32 0.02, %v2493_v45  ;;  %v2535_v9 = vmul.f32 0.02, %v2415_v2  ;;  %4631 = vpow2.f32 %v2817_v35  ;;  %v2770_v4 = vmul.f32 %v6456_v47, %v2753_v49 }
 0x87f   : > { %v4624_v53 = vpop.eup %4623  ;;  %v2715_v59 = vmul.f32 %v4622_v38, %v5943_v48  ;;  %v2742_v45 = vsub.f32 %v6390_v13, %v2690_v57 }
 0x880   : > { %v4626_v32 = vpop.eup %4625  ;;  %v2626_v26 = vsub.f32 %v2600_v19, %v2613_v60  ;;  %v2561_v31 = vsub.f32 %v2535_v9, %v2548_v17  ;;  %v6552_v51 = vadd.f32 %v6461_v52, %v2770_v4  ;;  %v2702_v27 = vmul.f32 %v4624_v53, %v5940_v24 }
 0x881   : > { %v2456_v50 = vpop.xlane.xlu1 %2455  ;;  %v3504_v25 = vadd.f32 -1.0, %v4626_v32  ;;  %v2378_v8 = vpop.xlane.xlu0 %2377  ;;  %v2691_v53 = vadd.f32 %v2678_v55, %v2665_v54 }
 0x882   : > { %v2639_v43 = vadd.f32 1e-05, %v2626_v26  ;;  %v2574_v44 = vadd.f32 1e-05, %v2561_v31  ;;  %v6559_v61 = vmul.f32 0.02, %v2456_v50  ;;  %v2728_v39 = vadd.f32 %v2715_v59, %v2702_v27 }
 0x883   : > { %v2850_v37 = vsel %vm2798_vm1, %v6519_v36, %v3504_v25  ;;  %v2510_v29 = vmul.f32 0.02, %v2378_v8  ;;  %v2819_v22 = vmul.f32 1.442695, %v6552_v51  ;;  %vm2800_vm3 = vcmp.gt.f32.partialorder %v6552_v51, 0.0 }
 0x884   : > { %4633 = vrsqrt.f32 %v2639_v43  ;;  %4105 = vmatmul.mubr.f32.gmra.mrb[60].mxu1 %v2850_v37  ;;  %v2754_v10 = vmul.f32 %v2741_v18, %v2728_v39  ;;  %v2614_v16 = vmul.f32 %v6559_v61, %v6559_v61  ;;  %v2743_v43 = vsub.f32 %v6401_v3, %v2691_v53 }
 0x885   : > { %4635 = vrsqrt.f32 %v2574_v44  ;;  %v2549_v28 = vmul.f32 %v2510_v29, %v2510_v29  ;;  %v2495_v0 = vpop.xlane.xlu1 %2494  ;;  %v2417_v58 = vpop.xlane.xlu0 %2416  ;;  %4107 = vmatprep.mubr.msk.f32.mxu1 %vm4882_vm0, %v4883_v1 }
 0x886   : > { %v4628_v21 = vpop.eup %4627  ;;  %v2601_v63 = vmul.f32 0.02, %v2495_v0  ;;  %v2536_v36 = vmul.f32 0.02, %v2417_v58  ;;  %4637 = vpow2.f32 %v2819_v22  ;;  %v2771_v20 = vmul.f32 %v6456_v47, %v2754_v10 }
 0x887   : > { %v4630_v14 = vpop.eup %4629  ;;  %v2716_v6 = vmul.f32 %v4628_v21, %v5943_v48 }
 0x888   : > { %v4632_v30 = vpop.eup %4631  ;;  %v2627_v35 = vsub.f32 %v2601_v63, %v2614_v16  ;;  %v2562_v49 = vsub.f32 %v2536_v36, %v2549_v28  ;;  %v6572_v60 = vadd.f32 %v6461_v52, %v2771_v20  ;;  %v2703_v17 = vmul.f32 %v4630_v14, %v5940_v24 }
 0x889   : > { %v2458_v2 = vpop.xlane.xlu1 %2457  ;;  %v3505_v38 = vadd.f32 -1.0, %v4632_v30  ;;  %v2380_v19 = vpop.xlane.xlu0 %2379  ;;  %v2679_v16 = vmul.f32 %v5943_v48, %v6559_v61  ;;  %v2666_v28 = vmul.f32 %v5940_v24, %v2510_v29 }
 0x88a   : > { %v2640_v42 = vadd.f32 1e-05, %v2627_v35  ;;  %v2575_v9 = vadd.f32 1e-05, %v2562_v49  ;;  %v6577_v5 = vmul.f32 0.02, %v2458_v2  ;;  %v2729_v4 = vadd.f32 %v2716_v6, %v2703_v17 }
 0x88b   : > { %v2851_v18 = vsel %vm2799_vm2, %v6539_v62, %v3505_v38  ;;  %v2511_v59 = vmul.f32 0.02, %v2380_v19  ;;  %v2821_v32 = vmul.f32 1.442695, %v6572_v60  ;;  %v2692_v61 = vadd.f32 %v2679_v16, %v2666_v28 }
 0x88c   : > { %4639 = vrsqrt.f32 %v2640_v42  ;;  %4108 = vmatmul.mubr.f32.gmra.mrb[62].mxu1 %v2851_v18  ;;  %v2755_v26 = vmul.f32 %v2742_v45, %v2729_v4  ;;  %v2615_v13 = vmul.f32 %v6577_v5, %v6577_v5  ;;  %vm2801_vm4 = vcmp.gt.f32.partialorder %v6572_v60, 0.0 }
 0x88d   : > { %4641 = vrsqrt.f32 %v2575_v9  ;;  %v2550_v31 = vmul.f32 %v2511_v59, %v2511_v59  ;;  %v2497_v27 = vpop.xlane.xlu1 %2496  ;;  %v2419_v46 = vpop.xlane.xlu0 %2418  ;;  %4110 = vmatprep.mubr.msk.f32.mxu1 %vm4882_vm0, %v4883_v1 }
 0x88e   : > { %v4634_v12 = vpop.eup %4633  ;;  %v2602_v50 = vmul.f32 0.02, %v2497_v27  ;;  %v2537_v25 = vmul.f32 0.02, %v2419_v46  ;;  %4643 = vpow2.f32 %v2821_v32  ;;  %v2772_v62 = vmul.f32 %v6456_v47, %v2755_v26 }
 0x88f   : > { %v4636_v8 = vpop.eup %4635  ;;  %v2717_v44 = vmul.f32 %v4634_v12, %v5943_v48  ;;  %v2744_v32 = vsub.f32 %v6410_v56, %v2692_v61  ;;  %v2680_v26 = vmul.f32 %v5943_v48, %v6577_v5 }
 0x890   : > { %v4638_v39 = vpop.eup %4637  ;;  %v2628_v37 = vsub.f32 %v2602_v50, %v2615_v13  ;;  %v2563_v22 = vsub.f32 %v2537_v25, %v2550_v31  ;;  %v6589_v10 = vadd.f32 %v6461_v52, %v2772_v62  ;;  %v2704_v57 = vmul.f32 %v4636_v8, %v5940_v24 }
 0x891   : > { %v2460_v0 = vpop.xlane.xlu1 %2459  ;;  %v3506_v58 = vadd.f32 -1.0, %v4638_v39  ;;  %v2382_v3 = vpop.xlane.xlu0 %2381  ;;  %v2667_v13 = vmul.f32 %v5940_v24, %v2511_v59 }
 0x892   : > { %v2641_v21 = vadd.f32 1e-05, %v2628_v37  ;;  %v2576_v63 = vadd.f32 1e-05, %v2563_v22  ;;  %v2525_v36 = vmul.f32 0.02, %v2460_v0  ;;  %v2730_v20 = vadd.f32 %v2717_v44, %v2704_v57 }
 0x893   : > { %v2852_v14 = vsel %vm2800_vm3, %v6552_v51, %v3506_v58  ;;  %v2512_v55 = vmul.f32 0.02, %v2382_v3  ;;  %v2823_v54 = vmul.f32 1.442695, %v6589_v10  ;;  %v2693_v8 = vadd.f32 %v2680_v26, %v2667_v13 }
 0x894   : > { %4645 = vrsqrt.f32 %v2641_v21  ;;  %4111 = vmatmul.mubr.f32.gmra.mrb[64].mxu1 %v2852_v14  ;;  %v2756_v6 = vmul.f32 %v2743_v43, %v2730_v20  ;;  %v2616_v29 = vmul.f32 %v2525_v36, %v2525_v36  ;;  %vm2802_vm5 = vcmp.gt.f32.partialorder %v6589_v10, 0.0 }
 0x895   : > { %4647 = vrsqrt.f32 %v2576_v63  ;;  %v2551_v30 = vmul.f32 %v2512_v55, %v2512_v55  ;;  %v2499_v35 = vpop.xlane.xlu1 %2498  ;;  %v2421_v49 = vpop.xlane.xlu0 %2420  ;;  %4113 = vmatprep.mubr.msk.f32.mxu1 %vm4882_vm0, %v4883_v1  ;;  %v2745_v37 = vsub.f32 %v6421_v15, %v2693_v8  ;;  %v2681_v57 = vmul.f32 %v5943_v48, %v2525_v36 }
 0x896   : > { %v4640_v17 = vpop.eup %4639  ;;  %v2603_v45 = vmul.f32 0.02, %v2499_v35  ;;  %v2538_v2 = vmul.f32 0.02, %v2421_v49  ;;  %4649 = vpow2.f32 %v2823_v54  ;;  %v2773_v51 = vmul.f32 %v6456_v47, %v2756_v6 }
 0x897   : > { %v4642_v38 = vpop.eup %4641  ;;  %v2718_v19 = vmul.f32 %v4640_v17, %v5943_v48  ;;  %v2668_v16 = vmul.f32 %v5940_v24, %v2512_v55 }
 0x898   : > { %v4644_v42 = vpop.eup %4643  ;;  %v2629_v9 = vsub.f32 %v2603_v45, %v2616_v29  ;;  %v2564_v4 = vsub.f32 %v2538_v2, %v2551_v30  ;;  %v2790_v53 = vadd.f32 %v6461_v52, %v2773_v51  ;;  %v2705_v18 = vmul.f32 %v4642_v38, %v5940_v24 }
 0x899   : > { %v3507_v31 = vadd.f32 -1.0, %v4644_v42  ;;  %v2694_v63 = vadd.f32 %v2681_v57, %v2668_v16 }
 0x89a   : > { %v2642_v27 = vadd.f32 1e-05, %v2629_v9  ;;  %v2577_v46 = vadd.f32 1e-05, %v2564_v4  ;;  %v2731_v12 = vadd.f32 %v2718_v19, %v2705_v18  ;;  %v2825_v25 = vmul.f32 1.442695, %v2790_v53 }
 0x89b   : > { %v2853_v50 = vsel %vm2801_vm4, %v6572_v60, %v3507_v31  ;;  %vm2803_vm6 = vcmp.gt.f32.partialorder %v2790_v53, 0.0  ;;  %v6645_v4 = vsel %vm233_vm10, 1.0, %v4883_v1 }
 0x89c   : > { %4651 = vrsqrt.f32 %v2642_v27  ;;  %4114 = vmatmul.mubr.f32.gmra.mrb[66].mxu1 %v2853_v50  ;;  %v2757_v62 = vmul.f32 %v2744_v32, %v2731_v12 }
 0x89d   : > { %4653 = vrsqrt.f32 %v2577_v46  ;;  %4116 = vmatprep.mubr.msk.f32.mxu1 %vm4882_vm0, %v4883_v1 }
 0x89e   : > { %v4646_v56 = vpop.eup %4645  ;;  %4655 = vpow2.f32 %v2825_v25  ;;  %v2774_v5 = vmul.f32 %v6456_v47, %v2757_v62 }
 0x89f   : > { %v4648_v59 = vpop.eup %4647  ;;  %v2719_v43 = vmul.f32 %v4646_v56, %v5943_v48 }
 0x8a0   : > { %v4650_v44 = vpop.eup %4649  ;;  %v2791_v39 = vadd.f32 %v6461_v52, %v2774_v5  ;;  %v2706_v60 = vmul.f32 %v4648_v59, %v5940_v24 }
 0x8a1   : > { %v3508_v22 = vadd.f32 -1.0, %v4650_v44 }
 0x8a2   : > { %v2827_v28 = vmul.f32 1.442695, %v2791_v39  ;;  %v2732_v0 = vadd.f32 %v2719_v43, %v2706_v60  ;;  %vm2804_vm7 = vcmp.gt.f32.partialorder %v2791_v39, 0.0 }
 0x8a3   : > { %v2854_v58 = vsel %vm2802_vm5, %v6589_v10, %v3508_v22  ;;  %v2746_v10 = vsub.f32 %v6432_v11, %v2694_v63 }
 0x8a4   : > { %4117 = vmatmul.mubr.f32.gmra.mrb[68].mxu1 %v2854_v58  ;;  %4657 = vpow2.f32 %v2827_v28  ;;  %v2758_v3 = vmul.f32 %v2745_v37, %v2732_v0 }
 0x8a5   : > { %4119 = vmatprep.mubr.msk.f32.mxu1 %vm4882_vm0, %v4883_v1 }
 0x8a6   : > { %v4652_v21 = vpop.eup %4651  ;;  %v2775_v15 = vmul.f32 %v6456_v47, %v2758_v3 }
 0x8a7   : > { %v4654_v20 = vpop.eup %4653  ;;  %v2720_v14 = vmul.f32 %v4652_v21, %v5943_v48 }
 0x8a8   : > { %v4656_v36 = vpop.eup %4655  ;;  %v2792_v55 = vadd.f32 %v6461_v52, %v2775_v15  ;;  %v2707_v54 = vmul.f32 %v4654_v20, %v5940_v24 }
 0x8a9   : > { %v3509_v6 = vadd.f32 -1.0, %v4656_v36 }
 0x8aa   : > { %v2829_v61 = vmul.f32 1.442695, %v2792_v55  ;;  %v2733_v29 = vadd.f32 %v2720_v14, %v2707_v54  ;;  %vm2805_vm8 = vcmp.gt.f32.partialorder %v2792_v55, 0.0 }
 0x8ab   : > { %v2855_v30 = vsel %vm2803_vm6, %v2790_v53, %v3509_v6 }
 0x8ac   : > { %4120 = vmatmul.mubr.f32.gmra.mrb[70].mxu1 %v2855_v30  ;;  %4659 = vpow2.f32 %v2829_v61  ;;  %v2759_v35 = vmul.f32 %v2746_v10, %v2733_v29 }
 0x8ad   : > { %4122 = vmatprep.mubr.msk.f32.mxu1 %vm4882_vm0, %v4883_v1 }
 0x8ae   : > { %v4658_v49 = vpop.eup %4657  ;;  %v2776_v48 = vmul.f32 %v6456_v47, %v2759_v35 }
 0x8af   : > { %v3510_v17 = vadd.f32 -1.0, %v4658_v49 }
 0x8b0   : > { %v2793_v24 = vadd.f32 %v6461_v52, %v2776_v48  ;;  %v6640_v52 = vrot.slane %v6451_v23, %v1406_v7 }
 0x8b1   : > { %v2856_v45 = vsel %vm2804_vm7, %v2791_v39, %v3510_v17 }
 0x8b2   : > { %4123 = vmatmul.mubr.f32.gmra.mrb[72].mxu1 %v2856_v45  ;;  %v2831_v11 = vmul.f32 1.442695, %v2793_v24  ;;  %vm2806_vm9 = vcmp.gt.f32.partialorder %v2793_v24, 0.0 }
 0x8b3   : > { %4125 = vmatprep.mubr.msk.f32.mxu1 %vm4882_vm0, %v4883_v1 }
 0x8b4   : > { %4661 = vpow2.f32 %v2831_v11 }
 0x8b6   : > { %v4660_v2 = vpop.eup %4659 }
 0x8b7   : > { %v3511_v51 = vadd.f32 -1.0, %v4660_v2 }
 0x8b9   : > { %v2857_v38 = vsel %vm2805_vm8, %v2792_v55, %v3511_v51 }
 0x8ba   : > { %4126 = vmatmul.mubr.f32.gmra.mrb[74].mxu1 %v2857_v38 }
 0x8bb   : > { %4128 = vmatprep.mubr.msk.f32.mxu1 %vm4882_vm0, %v4883_v1 }
 0x8be   : > { %v4662_v47 = vpop.eup %4661 }
 0x8bf   : > { %v3512_v19 = vadd.f32 -1.0, %v4662_v47 }
 0x8c1   : > { %v2858_v42 = vsel %vm2806_vm9, %v2793_v24, %v3512_v19 }
 0x8c2   : > { %4129 = vmatmul.mubr.f32.gmra.mrb[76].mxu1 %v2858_v42 }
 0x937   : > { %v2945_v9 = vpop.f32.mrb[52].mxu1 }
 0x938   : > { %v6648_v53 = vadd.f32 %v2945_v9, %v6640_v52  ;;  %v4094_v18 = vpop.f32.mrb[53].mxu1 }
 0x93a   : > { %v3009_v32 = vmul.f32 %v6645_v4, %v6648_v53  ;;  %v3061_v26 = vmul.f32 %v6648_v53, %v6648_v53 }
 0x93c   : > { %3022 = vadd.xlane.f32.xlu0 %v3009_v32  ;;  %v3074_v40 = vmul.f32 %v6645_v4, %v3061_v26 }
 0x93e   : > { %3087 = vadd.xlane.f32.xlu1 %v3074_v40 }
 0x93f   : > { %v2950_v7 = vpop.f32.mrb[54].mxu1 }
 0x940   : > { %v6656_v23 = vadd.f32 %v2950_v7, %v6640_v52  ;;  %v4097_v1 = vpop.f32.mrb[55].mxu1 }
 0x942   : > { %v3010_v13 = vmul.f32 %v6645_v4, %v6656_v23  ;;  %v3062_v31 = vmul.f32 %v6656_v23, %v6656_v23 }
 0x944   : > { %3024 = vadd.xlane.f32.xlu1 %v3010_v13  ;;  %v3075_v27 = vmul.f32 %v6645_v4, %v3062_v31 }
 0x946   : > { %3089 = vadd.xlane.f32.xlu0 %v3075_v27 }
 0x947   : > { %v2955_v46 = vpop.f32.mrb[56].mxu1 }
 0x948   : > { %v6664_v12 = vadd.f32 %v2955_v46, %v6640_v52  ;;  %v4100_v50 = vpop.f32.mrb[57].mxu1 }
 0x94a   : > { %v3011_v25 = vmul.f32 %v6645_v4, %v6664_v12  ;;  %v3063_v62 = vmul.f32 %v6664_v12, %v6664_v12 }
 0x94c   : > { %3026 = vadd.xlane.f32.xlu0 %v3011_v25  ;;  %v3076_v8 = vmul.f32 %v6645_v4, %v3063_v62 }
 0x94e   : > { %3091 = vadd.xlane.f32.xlu1 %v3076_v8 }
 0x94f   : > { %v2960_v56 = vpop.f32.mrb[58].mxu1 }
 0x950   : > { %v6672_v5 = vadd.f32 %v2960_v56, %v6640_v52  ;;  %v4103_v59 = vpop.f32.mrb[59].mxu1 }
 0x952   : > { %v3012_v43 = vmul.f32 %v6645_v4, %v6672_v5  ;;  %v3064_v44 = vmul.f32 %v6672_v5, %v6672_v5 }
 0x954   : > { %3028 = vadd.xlane.f32.xlu1 %v3012_v43  ;;  %v3077_v39 = vmul.f32 %v6645_v4, %v3064_v44 }
 0x956   : > { %3093 = vadd.xlane.f32.xlu0 %v3077_v39 }
 0x957   : > { %v2965_v60 = vpop.f32.mrb[60].mxu1 }
 0x958   : > { %v6680_v37 = vadd.f32 %v2965_v60, %v6640_v52  ;;  %v4106_v22 = vpop.f32.mrb[61].mxu1 }
 0x95a   : > { %v3013_v57 = vmul.f32 %v6645_v4, %v6680_v37  ;;  %v3065_v16 = vmul.f32 %v6680_v37, %v6680_v37 }
 0x95c   : > { %3030 = vadd.xlane.f32.xlu0 %v3013_v57  ;;  %v3078_v28 = vmul.f32 %v6645_v4, %v3065_v16 }
 0x95e   : > { %3095 = vadd.xlane.f32.xlu1 %v3078_v28 }
 0x95f   : > { %v2970_v0 = vpop.f32.mrb[62].mxu1 }
 0x960   : > { %v6688_v58 = vadd.f32 %v2970_v0, %v6640_v52  ;;  %v4109_v3 = vpop.f32.mrb[63].mxu1 }
 0x962   : > { %v3014_v21 = vmul.f32 %v6645_v4, %v6688_v58  ;;  %v3066_v63 = vmul.f32 %v6688_v58, %v6688_v58 }
 0x964   : > { %3032 = vadd.xlane.f32.xlu1 %v3014_v21  ;;  %v3079_v15 = vmul.f32 %v6645_v4, %v3066_v63 }
 0x966   : > { %3097 = vadd.xlane.f32.xlu0 %v3079_v15 }
 0x967   : > { %v2975_v20 = vpop.f32.mrb[64].mxu1 }
 0x968   : > { %v6696_v14 = vadd.f32 %v2975_v20, %v6640_v52  ;;  %v4112_v36 = vpop.f32.mrb[65].mxu1 }
 0x969   : > { %v222_v36 = vld [vmem:[#allocation7 + $0x10] sm:$0xff] }
 0x96a   : > { %v3015_v55 = vmul.f32 %v6645_v4, %v6696_v14  ;;  %v3067_v54 = vmul.f32 %v6696_v14, %v6696_v14 }
 0x96c   : > { %3034 = vadd.xlane.f32.xlu0 %v3015_v55  ;;  %v3080_v6 = vmul.f32 %v6645_v4, %v3067_v54 }
 0x96e   : > { %3099 = vadd.xlane.f32.xlu1 %v3080_v6  ;;  %v6752_v6 = vrot.slane %v222_v36, %v5161_v41 }
 0x96f   : > { %v2980_v10 = vpop.f32.mrb[66].mxu1 }
 0x970   : > { %v6704_v61 = vadd.f32 %v2980_v10, %v6640_v52  ;;  %v4115_v29 = vpop.f32.mrb[67].mxu1 }
 0x972   : > { %v3016_v30 = vmul.f32 %v6645_v4, %v6704_v61  ;;  %v3068_v35 = vmul.f32 %v6704_v61, %v6704_v61 }
 0x974   : > { %3036 = vadd.xlane.f32.xlu1 %v3016_v30  ;;  %v3081_v49 = vmul.f32 %v6645_v4, %v3068_v35 }
 0x976   : > { %3101 = vadd.xlane.f32.xlu0 %v3081_v49 }
 0x977   : > { %v2985_v48 = vpop.f32.mrb[68].mxu1 }
 0x978   : > { %v6712_v17 = vadd.f32 %v2985_v48, %v6640_v52  ;;  %v4118_v24 = vpop.f32.mrb[69].mxu1  ;;  %v6756_v48 = vrot.slane %v222_v36, %v5260_v33 }
 0x97a   : > { %v3017_v45 = vmul.f32 %v6645_v4, %v6712_v17  ;;  %v3069_v11 = vmul.f32 %v6712_v17, %v6712_v17 }
 0x97c   : > { %3038 = vadd.xlane.f32.xlu0 %v3017_v45  ;;  %v3082_v2 = vmul.f32 %v6645_v4, %v3069_v11 }
 0x97e   : > { %3103 = vadd.xlane.f32.xlu1 %v3082_v2 }
 0x97f   : > { %v2990_v51 = vpop.f32.mrb[70].mxu1 }
 0x980   : > { %v6720_v38 = vadd.f32 %v2990_v51, %v6640_v52  ;;  %v4121_v47 = vpop.f32.mrb[71].mxu1 }
 0x982   : > { %v3018_v19 = vmul.f32 %v6645_v4, %v6720_v38  ;;  %v3070_v42 = vmul.f32 %v6720_v38, %v6720_v38 }
 0x984   : > { %3040 = vadd.xlane.f32.xlu1 %v3018_v19  ;;  %v3083_v9 = vmul.f32 %v6645_v4, %v3070_v42 }
 0x985   : > { %v2995_v18 = vpop.f32.mrb[72].mxu1 }
 0x986   : > { %3105 = vadd.xlane.f32.xlu0 %v3083_v9  ;;  %v6728_v32 = vadd.f32 %v2995_v18, %v6640_v52  ;;  %v4124_v26 = vpop.f32.mrb[73].mxu1 }
 0x988   : > { %v3019_v40 = vmul.f32 %v6645_v4, %v6728_v32  ;;  %v3071_v7 = vmul.f32 %v6728_v32, %v6728_v32 }
 0x98a   : > { %3042 = vadd.xlane.f32.xlu0 %v3019_v40  ;;  %v3084_v1 = vmul.f32 %v6645_v4, %v3071_v7 }
 0x98c   : > { %3107 = vadd.xlane.f32.xlu1 %v3084_v1 }
 0x98d   : > { %v3000_v13 = vpop.f32.mrb[74].mxu1 }
 0x98e   : > { %v6736_v31 = vadd.f32 %v3000_v13, %v6640_v52  ;;  %v4127_v27 = vpop.f32.mrb[75].mxu1 }
 0x990   : > { %v3020_v46 = vmul.f32 %v6645_v4, %v6736_v31  ;;  %v3072_v59 = vmul.f32 %v6736_v31, %v6736_v31 }
 0x992   : > { %3044 = vadd.xlane.f32.xlu1 %v3020_v46  ;;  %v3085_v44 = vmul.f32 %v6645_v4, %v3072_v59 }
 0x995   : > { %v3005_v50 = vpop.f32.mrb[76].mxu1 }
 0x996   : > { %v6741_v25 = vadd.f32 %v3005_v50, %v6640_v52  ;;  %v4130_v62 = vpop.f32.mrb[77].mxu1 }
 0x998   : > { %v3021_v8 = vmul.f32 %v6645_v4, %v6741_v25  ;;  %v3073_v56 = vmul.f32 %v6741_v25, %v6741_v25 }
 0x99a   : > { %3046 = vadd.xlane.f32.xlu0 %v3021_v8  ;;  %v3086_v43 = vmul.f32 %v6645_v4, %v3073_v56 }
 0x99c   : > { %3111 = vadd.xlane.f32.xlu1 %v3086_v43 }
 0x99e   : > { %3109 = vadd.xlane.f32.xlu0 %v3085_v44 }
 0x9c9   : > { %v3023_v39 = vpop.xlane.xlu0 %3022 }
 0x9ca   : > { %v3048_v52 = vmul.f32 0.125, %v3023_v39 }
 0x9cb   : > { %v3088_v60 = vpop.xlane.xlu1 %3087 }
 0x9cc   : > { %v3126_v22 = vmul.f32 %v3048_v52, %v3048_v52  ;;  %v3113_v57 = vmul.f32 0.125, %v3088_v60  ;;  %v3152_v10 = vsub.f32 %v6648_v53, %v3048_v52 }
 0x9ce   : > { %v3139_v16 = vsub.f32 %v3113_v57, %v3126_v22 }
 0x9d0   : > { %v3165_v28 = vadd.f32 1e-05, %v3139_v16 }
 0x9d1   : > { %v3025_v0 = vpop.xlane.xlu1 %3024 }
 0x9d2   : > { %4663 = vrsqrt.f32 %v3165_v28  ;;  %v3049_v3 = vmul.f32 0.125, %v3025_v0 }
 0x9d3   : > { %v3090_v21 = vpop.xlane.xlu0 %3089 }
 0x9d4   : > { %v3127_v63 = vmul.f32 %v3049_v3, %v3049_v3  ;;  %v3114_v15 = vmul.f32 0.125, %v3090_v21  ;;  %v3153_v42 = vsub.f32 %v6656_v23, %v3049_v3 }
 0x9d6   : > { %v3140_v20 = vsub.f32 %v3114_v15, %v3127_v63 }
 0x9d8   : > { %v3166_v55 = vadd.f32 1e-05, %v3140_v20 }
 0x9d9   : > { %v3027_v54 = vpop.xlane.xlu0 %3026 }
 0x9da   : > { %4665 = vrsqrt.f32 %v3166_v55  ;;  %v3050_v4 = vmul.f32 0.125, %v3027_v54 }
 0x9db   : > { %v3092_v29 = vpop.xlane.xlu1 %3091 }
 0x9dc   : > { %v4664_v30 = vpop.eup %4663  ;;  %v3128_v35 = vmul.f32 %v3050_v4, %v3050_v4  ;;  %v3115_v49 = vmul.f32 0.125, %v3092_v29  ;;  %v3154_v8 = vsub.f32 %v6664_v12, %v3050_v4 }
 0x9dd   : > { %v3191_v24 = vmul.f32 %v4664_v30, %v3152_v10 }
 0x9de   : > { %v3141_v45 = vsub.f32 %v3115_v49, %v3128_v35 }
 0x9df   : > { %v3208_v11 = vmul.f32 %v6752_v6, %v3191_v24 }
 0x9e0   : > { %v3167_v2 = vadd.f32 1e-05, %v3141_v45 }
 0x9e1   : > { %v3225_v51 = vadd.f32 %v6756_v48, %v3208_v11  ;;  %v3029_v47 = vpop.xlane.xlu1 %3028 }
 0x9e2   : > { %4667 = vrsqrt.f32 %v3167_v2  ;;  %v3051_v41 = vmul.f32 0.125, %v3029_v47 }
 0x9e3   : > { %v3251_v19 = vmul.f32 1.442695, %v3225_v51  ;;  %v3094_v9 = vpop.xlane.xlu0 %3093  ;;  %vm3238_vm0 = vcmp.gt.f32.partialorder %v3225_v51, 0.0 }
 0x9e4   : > { %v4666_v18 = vpop.eup %4665  ;;  %v3129_v26 = vmul.f32 %v3051_v41, %v3051_v41  ;;  %v3116_v40 = vmul.f32 0.125, %v3094_v9  ;;  %v3155_v20 = vsub.f32 %v6672_v5, %v3051_v41 }
 0x9e5   : > { %4669 = vpow2.f32 %v3251_v19  ;;  %v3192_v33 = vmul.f32 %v4666_v18, %v3153_v42 }
 0x9e6   : > { %v3142_v7 = vsub.f32 %v3116_v40, %v3129_v26 }
 0x9e7   : > { %v3209_v1 = vmul.f32 %v6752_v6, %v3192_v33 }
 0x9e8   : > { %v3168_v13 = vadd.f32 1e-05, %v3142_v7 }
 0x9e9   : > { %v3226_v27 = vadd.f32 %v6756_v48, %v3209_v1  ;;  %v3031_v46 = vpop.xlane.xlu0 %3030 }
 0x9ea   : > { %4671 = vrsqrt.f32 %v3168_v13  ;;  %v3052_v50 = vmul.f32 0.125, %v3031_v46 }
 0x9eb   : > { %v3253_v62 = vmul.f32 1.442695, %v3226_v27  ;;  %v3096_v56 = vpop.xlane.xlu1 %3095  ;;  %vm3239_vm11 = vcmp.gt.f32.partialorder %v3226_v27, 0.0 }
 0x9ec   : > { %v4668_v59 = vpop.eup %4667  ;;  %v3130_v43 = vmul.f32 %v3052_v50, %v3052_v50  ;;  %v3117_v44 = vmul.f32 0.125, %v3096_v56  ;;  %v3156_v41 = vsub.f32 %v6680_v37, %v3052_v50 }
 0x9ed   : > { %4673 = vpow2.f32 %v3253_v62  ;;  %v3193_v39 = vmul.f32 %v4668_v59, %v3154_v8 }
 0x9ee   : > { %v3143_v52 = vsub.f32 %v3117_v44, %v3130_v43 }
 0x9ef   : > { %v4670_v60 = vpop.eup %4669  ;;  %v3210_v22 = vmul.f32 %v6752_v6, %v3193_v39 }
 0x9f0   : > { %v3513_v57 = vadd.f32 -1.0, %v4670_v60  ;;  %v3169_v16 = vadd.f32 1e-05, %v3143_v52 }
 0x9f1   : > { %v3227_v28 = vadd.f32 %v6756_v48, %v3210_v22  ;;  %v3033_v0 = vpop.xlane.xlu1 %3032 }
 0x9f2   : > { %v3290_v3 = vsel %vm3238_vm0, %v3225_v51, %v3513_v57  ;;  %4675 = vrsqrt.f32 %v3169_v16  ;;  %v3053_v21 = vmul.f32 0.125, %v3033_v0 }
 0x9f3   : > { %v3304_v63 = vsel %vm233_vm10, %v3290_v3, %v6648_v53  ;;  %v3255_v15 = vmul.f32 1.442695, %v3227_v28  ;;  %v3098_v36 = vpop.xlane.xlu0 %3097  ;;  %vm3240_vm12 = vcmp.gt.f32.partialorder %v3227_v28, 0.0 }
 0x9f4   : > { %v4672_v55 = vpop.eup %4671  ;;  %3317 = vst [vmem:[%s6772_s18] sm:$0xff] %v3304_v63  ;;  %v3131_v54 = vmul.f32 %v3053_v21, %v3053_v21  ;;  %v3118_v4 = vmul.f32 0.125, %v3098_v36  ;;  %v3157_v56 = vsub.f32 %v6688_v58, %v3053_v21 }
 0x9f5   : > { %4677 = vpow2.f32 %v3255_v15  ;;  %v3194_v10 = vmul.f32 %v4672_v55, %v3155_v20 }
 0x9f6   : > { %v3144_v29 = vsub.f32 %v3118_v4, %v3131_v54 }
 0x9f7   : > { %v4674_v30 = vpop.eup %4673  ;;  %v3211_v35 = vmul.f32 %v6752_v6, %v3194_v10 }
 0x9f8   : > { %v3514_v53 = vadd.f32 -1.0, %v4674_v30  ;;  %v3170_v49 = vadd.f32 1e-05, %v3144_v29 }
 0x9f9   : > { %v3228_v24 = vadd.f32 %v6756_v48, %v3211_v35  ;;  %v3035_v45 = vpop.xlane.xlu0 %3034 }
 0x9fa   : > { %v3291_v11 = vsel %vm3239_vm11, %v3226_v27, %v3514_v53  ;;  %4679 = vrsqrt.f32 %v3170_v49  ;;  %v3054_v2 = vmul.f32 0.125, %v3035_v45 }
 0x9fb   : > { %v3305_v51 = vsel %vm233_vm10, %v3291_v11, %v6656_v23  ;;  %v3257_v47 = vmul.f32 1.442695, %v3228_v24  ;;  %v3100_v19 = vpop.xlane.xlu1 %3099  ;;  %vm3241_vm13 = vcmp.gt.f32.partialorder %v3228_v24, 0.0 }
 0x9fc   : > { %v4676_v42 = vpop.eup %4675  ;;  %3318 = vst [vmem:[%s6772_s18 + $0x8] sm:$0xff] %v3305_v51  ;;  %v3132_v9 = vmul.f32 %v3054_v2, %v3054_v2  ;;  %v3119_v18 = vmul.f32 0.125, %v3100_v19  ;;  %v3158_v20 = vsub.f32 %v6696_v14, %v3054_v2 }
 0x9fd   : > { %4681 = vpow2.f32 %v3257_v47  ;;  %v3195_v26 = vmul.f32 %v4676_v42, %v3156_v41 }
 0x9fe   : > { %v3145_v40 = vsub.f32 %v3119_v18, %v3132_v9 }
 0x9ff   : > { %v4678_v33 = vpop.eup %4677  ;;  %v3212_v7 = vmul.f32 %v6752_v6, %v3195_v26 }
 0xa00   : > { %v3515_v1 = vadd.f32 -1.0, %v4678_v33  ;;  %v3171_v13 = vadd.f32 1e-05, %v3145_v40 }
 0xa01   : > { %v3229_v23 = vadd.f32 %v6756_v48, %v3212_v7  ;;  %v3037_v27 = vpop.xlane.xlu1 %3036 }
 0xa02   : > { %v3292_v46 = vsel %vm3240_vm12, %v3227_v28, %v3515_v1  ;;  %4683 = vrsqrt.f32 %v3171_v13  ;;  %v3055_v50 = vmul.f32 0.125, %v3037_v27 }
 0xa03   : > { %v3306_v62 = vsel %vm233_vm10, %v3292_v46, %v6664_v12  ;;  %v3259_v8 = vmul.f32 1.442695, %v3229_v23  ;;  %v3102_v59 = vpop.xlane.xlu0 %3101  ;;  %vm3242_vm14 = vcmp.gt.f32.partialorder %v3229_v23, 0.0 }
 0xa04   : > { %v4680_v43 = vpop.eup %4679  ;;  %3319 = vst [vmem:[%s6772_s18 + $0x10] sm:$0xff] %v3306_v62  ;;  %v3133_v44 = vmul.f32 %v3055_v50, %v3055_v50  ;;  %v3120_v39 = vmul.f32 0.125, %v3102_v59  ;;  %v3159_v47 = vsub.f32 %v6704_v61, %v3055_v50 }
 0xa05   : > { %4685 = vpow2.f32 %v3259_v8  ;;  %v3196_v52 = vmul.f32 %v4680_v43, %v3157_v56 }
 0xa06   : > { %v3146_v60 = vsub.f32 %v3120_v39, %v3133_v44 }
 0xa07   : > { %v4682_v22 = vpop.eup %4681  ;;  %v3213_v57 = vmul.f32 %v6752_v6, %v3196_v52 }
 0xa08   : > { %v3516_v16 = vadd.f32 -1.0, %v4682_v22  ;;  %v3172_v28 = vadd.f32 1e-05, %v3146_v60 }
 0xa09   : > { %v3230_v12 = vadd.f32 %v6756_v48, %v3213_v57  ;;  %v3039_v0 = vpop.xlane.xlu0 %3038 }
 0xa0a   : > { %v3293_v3 = vsel %vm3241_vm13, %v3228_v24, %v3516_v16  ;;  %4687 = vrsqrt.f32 %v3172_v28  ;;  %v3056_v21 = vmul.f32 0.125, %v3039_v0 }
 0xa0b   : > { %v3307_v63 = vsel %vm233_vm10, %v3293_v3, %v6672_v5  ;;  %v3261_v15 = vmul.f32 1.442695, %v3230_v12  ;;  %v3104_v36 = vpop.xlane.xlu1 %3103  ;;  %vm3243_vm15 = vcmp.gt.f32.partialorder %v3230_v12, 0.0 }
 0xa0c   : > { %v4684_v55 = vpop.eup %4683  ;;  %3320 = vst [vmem:[%s6772_s18 + $0x18] sm:$0xff] %v3307_v63  ;;  %v3134_v54 = vmul.f32 %v3056_v21, %v3056_v21  ;;  %v3121_v4 = vmul.f32 0.125, %v3104_v36  ;;  %v3160_v56 = vsub.f32 %v6712_v17, %v3056_v21 }
 0xa0d   : > { %4689 = vpow2.f32 %v3261_v15  ;;  %v3197_v10 = vmul.f32 %v4684_v55, %v3158_v20 }
 0xa0e   : > { %v3147_v29 = vsub.f32 %v3121_v4, %v3134_v54 }
 0xa0f   : > { %v4686_v30 = vpop.eup %4685  ;;  %v3214_v35 = vmul.f32 %v6752_v6, %v3197_v10 }
 0xa10   : > { %v3517_v53 = vadd.f32 -1.0, %v4686_v30  ;;  %v3173_v49 = vadd.f32 1e-05, %v3147_v29 }
 0xa11   : > { %v3231_v5 = vadd.f32 %v6756_v48, %v3214_v35  ;;  %v3041_v24 = vpop.xlane.xlu1 %3040 }
 0xa12   : > { %v3294_v45 = vsel %vm3242_vm14, %v3229_v23, %v3517_v53  ;;  %4691 = vrsqrt.f32 %v3173_v49  ;;  %v3057_v11 = vmul.f32 0.125, %v3041_v24 }
 0xa13   : > { %v3308_v2 = vsel %vm233_vm10, %v3294_v45, %v6680_v37  ;;  %v3263_v51 = vmul.f32 1.442695, %v3231_v5  ;;  %v3106_v41 = vpop.xlane.xlu0 %3105  ;;  %vm3244_vm1 = vcmp.gt.f32.partialorder %v3231_v5, 0.0 }
 0xa14   : > { %v4688_v19 = vpop.eup %4687  ;;  %3321 = vst [vmem:[%s6772_s18 + $0x20] sm:$0xff] %v3308_v2  ;;  %v3135_v42 = vmul.f32 %v3057_v11, %v3057_v11  ;;  %v3122_v9 = vmul.f32 0.125, %v3106_v41  ;;  %v3161_v0 = vsub.f32 %v6720_v38, %v3057_v11 }
 0xa15   : > { %4693 = vpow2.f32 %v3263_v51  ;;  %v3198_v18 = vmul.f32 %v4688_v19, %v3159_v47 }
 0xa16   : > { %v3148_v26 = vsub.f32 %v3122_v9, %v3135_v42 }
 0xa17   : > { %v4690_v40 = vpop.eup %4689  ;;  %v3215_v33 = vmul.f32 %v6752_v6, %v3198_v18  ;;  %v3043_v7 = vpop.xlane.xlu0 %3042 }
 0xa18   : > { %v3518_v1 = vadd.f32 -1.0, %v4690_v40  ;;  %v3174_v13 = vadd.f32 1e-05, %v3148_v26  ;;  %v3058_v23 = vmul.f32 0.125, %v3043_v7 }
 0xa19   : > { %v3232_v37 = vadd.f32 %v6756_v48, %v3215_v33  ;;  %v3108_v27 = vpop.xlane.xlu1 %3107 }
 0xa1a   : > { %v3295_v46 = vsel %vm3243_vm15, %v3230_v12, %v3518_v1  ;;  %4695 = vrsqrt.f32 %v3174_v13  ;;  %v3136_v50 = vmul.f32 %v3058_v23, %v3058_v23  ;;  %v3123_v59 = vmul.f32 0.125, %v3108_v27 }
 0xa1b   : > { %v3309_v62 = vsel %vm233_vm10, %v3295_v46, %v6688_v58  ;;  %v3265_v8 = vmul.f32 1.442695, %v3232_v37  ;;  %vm3245_vm2 = vcmp.gt.f32.partialorder %v3232_v37, 0.0  ;;  %v3162_v30 = vsub.f32 %v6728_v32, %v3058_v23 }
 0xa1c   : > { %v4692_v43 = vpop.eup %4691  ;;  %3322 = vst [vmem:[%s6772_s18 + $0x28] sm:$0xff] %v3309_v62  ;;  %v3149_v39 = vsub.f32 %v3123_v59, %v3136_v50 }
 0xa1d   : > { %4697 = vpow2.f32 %v3265_v8  ;;  %v3199_v44 = vmul.f32 %v4692_v43, %v3160_v56 }
 0xa1e   : > { %v3175_v22 = vadd.f32 1e-05, %v3149_v39 }
 0xa1f   : > { %v4694_v52 = vpop.eup %4693  ;;  %v3216_v60 = vmul.f32 %v6752_v6, %v3199_v44  ;;  %v3045_v63 = vpop.xlane.xlu1 %3044 }
 0xa20   : > { %v3519_v57 = vadd.f32 -1.0, %v4694_v52  ;;  %4699 = vrsqrt.f32 %v3175_v22  ;;  %v3059_v54 = vmul.f32 0.125, %v3045_v63 }
 0xa21   : > { %v3233_v16 = vadd.f32 %v6756_v48, %v3216_v60 }
 0xa22   : > { %v3296_v58 = vsel %vm3244_vm1, %v3231_v5, %v3519_v57  ;;  %v3137_v2 = vmul.f32 %v3059_v54, %v3059_v54  ;;  %v3163_v50 = vsub.f32 %v6736_v31, %v3059_v54 }
 0xa23   : > { %v3310_v28 = vsel %vm233_vm10, %v3296_v58, %v6696_v14  ;;  %v3267_v12 = vmul.f32 1.442695, %v3233_v16  ;;  %vm3246_vm3 = vcmp.gt.f32.partialorder %v3233_v16, 0.0 }
 0xa24   : > { %v4696_v3 = vpop.eup %4695  ;;  %3323 = vst [vmem:[%s6772_s18 + $0x30] sm:$0xff] %v3310_v28 }
 0xa25   : > { %4701 = vpow2.f32 %v3267_v12  ;;  %v3200_v21 = vmul.f32 %v4696_v3, %v3161_v0 }
 0xa27   : > { %v4698_v15 = vpop.eup %4697  ;;  %v3217_v20 = vmul.f32 %v6752_v6, %v3200_v21  ;;  %v3047_v36 = vpop.xlane.xlu0 %3046 }
 0xa28   : > { %v3520_v55 = vadd.f32 -1.0, %v4698_v15  ;;  %v3060_v4 = vmul.f32 0.125, %v3047_v36 }
 0xa29   : > { %v3234_v10 = vadd.f32 %v6756_v48, %v3217_v20  ;;  %v3112_v14 = vpop.xlane.xlu1 %3111 }
 0xa2a   : > { %v3297_v29 = vsel %vm3245_vm2, %v3232_v37, %v3520_v55  ;;  %v3138_v35 = vmul.f32 %v3060_v4, %v3060_v4  ;;  %v3125_v53 = vmul.f32 0.125, %v3112_v14  ;;  %v4700_v49 = vpop.eup %4699  ;;  %v3164_v23 = vsub.f32 %v6741_v25, %v3060_v4 }
 0xa2b   : > { %v3311_v5 = vsel %vm233_vm10, %v3297_v29, %v6704_v61  ;;  %v3269_v24 = vmul.f32 1.442695, %v3234_v10  ;;  %v3110_v45 = vpop.xlane.xlu0 %3109  ;;  %v3201_v11 = vmul.f32 %v4700_v49, %v3162_v30  ;;  %vm3247_vm4 = vcmp.gt.f32.partialorder %v3234_v10, 0.0 }
 0xa2c   : > { %3324 = vst [vmem:[%s6772_s18 + $0x38] sm:$0xff] %v3311_v5  ;;  %v3151_v51 = vsub.f32 %v3125_v53, %v3138_v35  ;;  %v3124_v47 = vmul.f32 0.125, %v3110_v45 }
 0xa2d   : > { %4703 = vpow2.f32 %v3269_v24  ;;  %v3218_v41 = vmul.f32 %v6752_v6, %v3201_v11 }
 0xa2e   : > { %v3177_v19 = vadd.f32 1e-05, %v3151_v51  ;;  %v3150_v42 = vsub.f32 %v3124_v47, %v3137_v2 }
 0xa2f   : > { %v4702_v9 = vpop.eup %4701  ;;  %v3235_v26 = vadd.f32 %v6756_v48, %v3218_v41 }
 0xa30   : > { %v3521_v18 = vadd.f32 -1.0, %v4702_v9  ;;  %4705 = vrsqrt.f32 %v3177_v19  ;;  %v3176_v40 = vadd.f32 1e-05, %v3150_v42 }
 0xa31   : > { %v3271_v33 = vmul.f32 1.442695, %v3235_v26  ;;  %vm3248_vm5 = vcmp.gt.f32.partialorder %v3235_v26, 0.0 }
 0xa32   : > { %v3298_v61 = vsel %vm3246_vm3, %v3233_v16, %v3521_v18  ;;  %4707 = vrsqrt.f32 %v3176_v40 }
 0xa33   : > { %v3312_v7 = vsel %vm233_vm10, %v3298_v61, %v6712_v17  ;;  %4709 = vpow2.f32 %v3271_v33 }
 0xa34   : > { %3325 = vst [vmem:[%s6772_s18 + $0x40] sm:$0xff] %v3312_v7 }
 0xa37   : > { %v4704_v1 = vpop.eup %4703 }
 0xa38   : > { %v3522_v13 = vadd.f32 -1.0, %v4704_v1 }
 0xa3a   : > { %v4706_v37 = vpop.eup %4705  ;;  %v3299_v27 = vsel %vm3247_vm4, %v3234_v10, %v3522_v13 }
 0xa3b   : > { %v3313_v46 = vsel %vm233_vm10, %v3299_v27, %v6720_v38  ;;  %v3203_v62 = vmul.f32 %v4706_v37, %v3164_v23 }
 0xa3c   : > { %v4708_v8 = vpop.eup %4707  ;;  %3326 = vst [vmem:[%s6772_s18 + $0x48] sm:$0xff] %v3313_v46 }
 0xa3d   : > { %v3220_v17 = vmul.f32 %v6752_v6, %v3203_v62  ;;  %v3202_v56 = vmul.f32 %v4708_v8, %v3163_v50  ;;  %v4710_v59 = vpop.eup %4709 }
 0xa3e   : > { %v3523_v43 = vadd.f32 -1.0, %v4710_v59 }
 0xa3f   : > { %v3237_v44 = vadd.f32 %v6756_v48, %v3220_v17  ;;  %v3219_v39 = vmul.f32 %v6752_v6, %v3202_v56 }
 0xa40   : > { %v3300_v52 = vsel %vm3248_vm5, %v3235_v26, %v3523_v43 }
 0xa41   : > { %v3275_v38 = vmul.f32 1.442695, %v3237_v44  ;;  %v3236_v60 = vadd.f32 %v6756_v48, %v3219_v39  ;;  %v3314_v22 = vsel %vm233_vm10, %v3300_v52, %v6728_v32  ;;  %vm3250_vm6 = vcmp.gt.f32.partialorder %v3237_v44, 0.0 }
 0xa42   : > { %3327 = vst [vmem:[%s6772_s18 + $0x50] sm:$0xff] %v3314_v22 }
 0xa43   : > { %4711 = vpow2.f32 %v3275_v38  ;;  %v3273_v57 = vmul.f32 1.442695, %v3236_v60  ;;  %vm3249_vm7 = vcmp.gt.f32.partialorder %v3236_v60, 0.0 }
 0xa45   : > { %4713 = vpow2.f32 %v3273_v57 }
 0xa4d   : > { %v4712_v16 = vpop.eup %4711 }
 0xa4e   : > { %v3525_v58 = vadd.f32 -1.0, %v4712_v16 }
 0xa4f   : > { %v4714_v6 = vpop.eup %4713 }
 0xa50   : > { %v3302_v28 = vsel %vm3250_vm6, %v3237_v44, %v3525_v58  ;;  %v3524_v48 = vadd.f32 -1.0, %v4714_v6 }
 0xa51   : > { %v3316_v32 = vsel %vm233_vm10, %v3302_v28, %v6741_v25 }
 0xa52   : > { %3329 = vst [vmem:[%s6772_s18 + $0x60] sm:$0xff] %v3316_v32  ;;  %v3301_v12 = vsel %vm3249_vm7, %v3236_v60, %v3524_v48 }
 0xa53   : > { %v3315_v0 = vsel %vm233_vm10, %v3301_v12, %v6736_v31 }
 0xa54   : > { %3328 = vst [vmem:[%s6772_s18 + $0x58] sm:$0xff] %v3315_v0 }
 0xa55   : > { %4817 = shalt.err (!%p4814_p1)
}
 0xa56   : > { %s4818_s10 = scalar_lea.hbm %s6852_s28, 1664  ;;  %s4822_s27 = scalar_lea.hbm %s6906_s3, 3328 }
 0xa57   : > { %p4819_p13 = scmp.ne.s32.totalorder %s6852_s28, %s4818_s10  ;;  %p4823_p4 = scmp.lt.u32.totalorder %s6852_s28, %s6906_s3 }
 0xa58   : > { %p4824_p5 = scmp.lt.u32.totalorder %s4822_s27, %s4818_s10  ;;  %p4826_p11 = scmp.lt.u32.totalorder %s4818_s10, %s6852_s28 }
 0xa59   : > { %p4820_p6 = pnand %p4819_p13, %p6920_p0 }
 0xa5a   : > { %p4825_p8 = por %p4824_p5, %p4823_p4 }
 0xa5b   : > { %p4821_p10 = pneg %p4820_p6 }
 0xa5c   : > { %p4827_p2 = por %p4826_p11, %p4825_p8 }
 0xa5e   : > { %p4828_p3 = pnand %p4827_p2, %p4821_p10 }
 0xa60   : > { %4831 = shalt.err (!%p4828_p3)
}
 0xa61   : > { %s4885_s17 = smov 128   ;;  %s4886_s18 = smov 8  }
 0xa62   : > { %4287 = dma.vmem_to_hbm [thread:$0]  (%p6920_p0), %s6855_s7, 1664, %s6852_s28, %s3331_s16, %s4885_s17, %s4885_s17, %s4886_s18  }
 0xa63 PF: > { %s3359_s20 = sand.u32 1, %s4862_s12   ;;  %p6921_p7 = scmp.ne.s32.totalorder %s6911_s19, 0 }
 0xa64   : > { %p6922_p9 = scmp.ge.s32.totalorder %s4874_s15, 2  ;;  %s3360_s8 = scalar_lea.sflag [#allocation4], %s3359_s20 }
 0xa66   : > { %p4301_p12 = pnand %p6922_p9, %p6921_p7 }
 0xa68   : > { %4857 = dma.done.wait (!%p4301_p12), %s3360_s8, 1664  }
 0xa69   : > { %4859 = vsyncadd (!%p4301_p12), %s3360_s8, 4294965632  ;;  %p17_p1 = scmp.ge.s32.totalorder %s5023_s23, 4   ;;  %s6923_s12 = smov %s4866_s13 }
 0xa6a   : > { %s6924_s13 = smov %s4870_s14  ;;  %s6925_s14 = smov %s5039_s9 }
 0xa6b   : > { %s6926_s15 = smov %s5023_s23  ;;  %19 = sbr.rel (!%p17_p1) target bundleno = 6 (0x6), region = 85 }
 0xa72   :  { %3365 = vsyncpa [#allocation3], 1 }
 0xa73   :  { %3367 = vsyncpa [#allocation3 + $0x1], 1 }
 0xa74   :  { %3368 = vsyncpa [#allocation6], 1 }
 0xa75   :  { %3369 = vsyncpa [#allocation4], 1 }
 0xa76   :  { %3371 = vsyncpa [#allocation4 + $0x1], 1 }

</bundles_post_ra>
